<compile_context>
chip_gen: v5e
topology: v5e:2x2
jax: 0.10.0
libtpu: 0.0.40
codegen_flags: <defaults>
</compile_context>

<pallas_src>
import functools

import jax
import jax.numpy as jnp
from jax import lax
from jax.experimental import pallas as pl
from jax.experimental.pallas import tpu as pltpu


def _lstm_kernel(x_ref, wih_ref, whh_ref, b_ref, out_ref, xw_sc, *, T, B, D, H):
    # x_ref  : (B, T*D)   f32; timestep t lives in lanes [t*D, (t+1)*D)
    # wih_ref: (D, 4H)    bf16 (= W_ih^T)
    # whh_ref: (H, 4H)    bf16 (= W_hh^T)
    # b_ref  : (1, 4H)    f32  (= b_ih + b_hh)
    # out_ref: (B, T*H)   timestep t lives in lanes [t*H, (t+1)*H)
    # xw_sc  : (B, T*4H)  f32 scratch holding the hoisted input projection
    G = 4 * H

    # ---- Hoisted input projection (independent of the recurrence) -----------
    # One (B, D) @ (D, 4H) bf16 MXU pass per timestep; every slice offset is a
    # compile-time constant multiple of 128 (lane-aligned, unmasked).
    for t in range(T):
        x_t = x_ref[:, t * D:(t + 1) * D].astype(jnp.bfloat16)
        xw_sc[:, t * G:(t + 1) * G] = (
            jnp.dot(x_t, wih_ref[...], preferred_element_type=jnp.float32)
            + b_ref[...]
        )

    # ---- Serial recurrence ---------------------------------------------------
    # TODO(synk): stage W_hh^T in the MXU once via pltpu.matmul_push_rhs /
    # matmul_acc_lhs / matmul_pop (and accumulate in the MRB on v7x) instead of
    # re-feeding the 128x512 RHS through jnp.dot every step.
    c = jnp.zeros((B, H), jnp.float32)
    h = None
    for t in range(T):  # full unroll — fine at T=8 (see module docstring for large T)
        gates = xw_sc[:, t * G:(t + 1) * G]                 # (B, 4H) f32
        if t > 0:
            gates = gates + jnp.dot(
                h.astype(jnp.bfloat16), whh_ref[...],
                preferred_element_type=jnp.float32,
            )

        i_g = jax.nn.sigmoid(gates[:, 0 * H:1 * H])
        f_g = jax.nn.sigmoid(gates[:, 1 * H:2 * H])
        g_g = jnp.tanh(gates[:, 2 * H:3 * H])
        o_g = jax.nn.sigmoid(gates[:, 3 * H:4 * H])

        c = f_g * c + i_g * g_g                              # f32 cell state
        h = o_g * jnp.tanh(c)                                # f32 hidden state

        # Lane-concatenated output: t*H is a multiple of 128 → lane-dense store.
        out_ref[:, t * H:(t + 1) * H] = h.astype(out_ref.dtype)


def tiny_rnn_forward(x, w_ih, w_hh, b_ih, b_hh):
    """x: (B, T, D) batch-first (PyTorch convention). Returns (B, T, H)."""
    B, T, D = x.shape
    H = w_hh.shape[1]  # w_hh: (4H, H)

    # Weight plumbing (tiny, amortized/fused by XLA under jit).
    wih_t = jnp.transpose(w_ih).astype(jnp.bfloat16)          # (D, 4H)
    whh_t = jnp.transpose(w_hh).astype(jnp.bfloat16)          # (H, 4H)
    bias = (b_ih + b_hh).reshape(1, 4 * H).astype(jnp.float32)

    # Activation path: a single free reshape. No transpose, no pad, no convert.
    x2d = x.reshape(B, T * D)

    kernel = functools.partial(_lstm_kernel, T=T, B=B, D=D, H=H)

    out2d = pl.pallas_call(
        kernel,
        out_shape=jax.ShapeDtypeStruct((B, T * H), x.dtype),
        in_specs=[pl.BlockSpec(memory_space=pltpu.MemorySpace.VMEM)] * 4,
        out_specs=pl.BlockSpec(memory_space=pltpu.MemorySpace.VMEM),
        scratch_shapes=[pltpu.VMEM((B, T * 4 * H), jnp.float32)],
        compiler_params=pltpu.CompilerParams(
            vmem_limit_bytes=32 * 1024 * 1024),
    )(x2d, wih_t, whh_t, bias)

    # Free reshape back to batch-first (B, T, H); no transpose, no slicing.
    return out2d.reshape(B, T, H)


def _reference_lstm(x, w_ih, w_hh, b_ih, b_hh):
    """Pure-JAX f32 reference matching torch.nn.LSTM forward (h0=c0=0)."""
    B, T, D = x.shape
    H = w_hh.shape[1]
    wih_t = w_ih.T
    whh_t = w_hh.T
    b = b_ih + b_hh

    def step(carry, x_t):
        h, c = carry
        gates = x_t @ wih_t + h @ whh_t + b
        i = jax.nn.sigmoid(gates[:, 0 * H:1 * H])
        f = jax.nn.sigmoid(gates[:, 1 * H:2 * H])
        g = jnp.tanh(gates[:, 2 * H:3 * H])
        o = jax.nn.sigmoid(gates[:, 3 * H:4 * H])
        c = f * c + i * g
        h = o * jnp.tanh(c)
        return (h, c), h

    h0 = jnp.zeros((B, H), jnp.float32)
    c0 = jnp.zeros((B, H), jnp.float32)
    _, hs = jax.lax.scan(step, (h0, c0), jnp.transpose(x, (1, 0, 2)))
    return jnp.transpose(hs, (1, 0, 2))


if __name__ == "__main__":
    # Module config: input_channel=128 -> D=128, hidden=128
    B, T, D, H = 2, 8, 128, 128

    key = jax.random.PRNGKey(0)
    kx, k1, k2, k3, k4 = jax.random.split(key, 5)

    # PyTorch LSTM parameter shapes:
    # weight_ih_l0 (4H, D), weight_hh_l0 (4H, H), bias_ih_l0 (4H,), bias_hh_l0 (4H,)
    scale = 1.0 / jnp.sqrt(jnp.float32(H))
    w_ih = jax.random.uniform(k1, (4 * H, D), jnp.float32, -scale, scale)
    w_hh = jax.random.uniform(k2, (4 * H, H), jnp.float32, -scale, scale)
    b_ih = jax.random.uniform(k3, (4 * H,), jnp.float32, -scale, scale)
    b_hh = jax.random.uniform(k4, (4 * H,), jnp.float32, -scale, scale)

    x = jax.random.normal(kx, (B, T, D), jnp.float32)

    fwd = jax.jit(tiny_rnn_forward)
    out = jax.block_until_ready(fwd(x, w_ih, w_hh, b_ih, b_hh))

    ref = _reference_lstm(x, w_ih, w_hh, b_ih, b_hh)
    assert out.shape == (B, T, H)
    # bf16 MXU operands vs exact-f32 reference → relaxed tolerance.
    assert jnp.allclose(out, ref, atol=3e-2, rtol=3e-2), "mismatch vs reference"

    print("KERNEL_OK")
</pallas_src>

<mosaic_0001>
module attributes {stable_mosaic.version = 11 : i64} {
  func.func @_lstm_kernel(%arg0: memref<2x1024xf32, #tpu.memory_space<vmem>>, %arg1: memref<128x512xbf16, #tpu.memory_space<vmem>>, %arg2: memref<128x512xbf16, #tpu.memory_space<vmem>>, %arg3: memref<1x512xf32, #tpu.memory_space<vmem>>, %arg4: memref<2x1024xf32, #tpu.memory_space<vmem>>, %arg5: memref<2x4096xf32, #tpu.memory_space<vmem>>) attributes {dimension_semantics = [], scalar_prefetch = 0 : i64, scratch_operands = 1 : i64, tpu.core_type = #tpu.core_type<tc>} {
    %c0 = arith.constant 0 : index
    %c0_0 = arith.constant 0 : index
    %0 = vector.load %arg0[%c0, %c0_0] : memref<2x1024xf32, #tpu.memory_space<vmem>>, vector<2x128xf32>
    %1 = arith.truncf %0 : vector<2x128xf32> to vector<2x128xbf16>
    %c0_1 = arith.constant 0 : index
    %c0_2 = arith.constant 0 : index
    %2 = vector.load %arg1[%c0_1, %c0_2] : memref<128x512xbf16, #tpu.memory_space<vmem>>, vector<128x512xbf16>
    %cst = arith.constant dense<0.000000e+00> : vector<2x512xf32>
    %3 = tpu.matmul %1, %2, %cst {dimension_numbers = #tpu.dot_dimension_numbers<[1], [0], [0], [1], [0, 0, 1, 1], [], []>} : vector<2x128xbf16>, vector<128x512xbf16>, vector<2x512xf32> -> vector<2x512xf32>
    %c0_3 = arith.constant 0 : index
    %c0_4 = arith.constant 0 : index
    %4 = vector.load %arg3[%c0_3, %c0_4] : memref<1x512xf32, #tpu.memory_space<vmem>>, vector<1x512xf32>
    %5 = vector.broadcast %4 : vector<1x512xf32> to vector<2x512xf32>
    %6 = arith.addf %3, %5 : vector<2x512xf32>
    %c0_5 = arith.constant 0 : index
    %c0_6 = arith.constant 0 : index
    %7 = vector.load %arg5[%c0_5, %c0_6] : memref<2x4096xf32, #tpu.memory_space<vmem>>, vector<2x512xf32>
    tpu.vector_store %arg5[%c0_5, %c0_6], %6 {strides = array<i32>} : memref<2x4096xf32, #tpu.memory_space<vmem>>, vector<2x512xf32>,
    %c0_7 = arith.constant 0 : index
    %c128 = arith.constant 128 : index
    %8 = vector.load %arg0[%c0_7, %c128] : memref<2x1024xf32, #tpu.memory_space<vmem>>, vector<2x128xf32>
    %9 = arith.truncf %8 : vector<2x128xf32> to vector<2x128xbf16>
    %c0_8 = arith.constant 0 : index
    %c0_9 = arith.constant 0 : index
    %10 = vector.load %arg1[%c0_8, %c0_9] : memref<128x512xbf16, #tpu.memory_space<vmem>>, vector<128x512xbf16>
    %cst_10 = arith.constant dense<0.000000e+00> : vector<2x512xf32>
    %11 = tpu.matmul %9, %10, %cst_10 {dimension_numbers = #tpu.dot_dimension_numbers<[1], [0], [0], [1], [0, 0, 1, 1], [], []>} : vector<2x128xbf16>, vector<128x512xbf16>, vector<2x512xf32> -> vector<2x512xf32>
    %c0_11 = arith.constant 0 : index
    %c0_12 = arith.constant 0 : index
    %12 = vector.load %arg3[%c0_11, %c0_12] : memref<1x512xf32, #tpu.memory_space<vmem>>, vector<1x512xf32>
    %13 = vector.broadcast %12 : vector<1x512xf32> to vector<2x512xf32>
    %14 = arith.addf %11, %13 : vector<2x512xf32>
    %c0_13 = arith.constant 0 : index
    %c512 = arith.constant 512 : index
    %15 = vector.load %arg5[%c0_13, %c512] : memref<2x4096xf32, #tpu.memory_space<vmem>>, vector<2x512xf32>
    tpu.vector_store %arg5[%c0_13, %c512], %14 {strides = array<i32>} : memref<2x4096xf32, #tpu.memory_space<vmem>>, vector<2x512xf32>,
    %c0_14 = arith.constant 0 : index
    %c256 = arith.constant 256 : index
    %16 = vector.load %arg0[%c0_14, %c256] : memref<2x1024xf32, #tpu.memory_space<vmem>>, vector<2x128xf32>
    %17 = arith.truncf %16 : vector<2x128xf32> to vector<2x128xbf16>
    %c0_15 = arith.constant 0 : index
    %c0_16 = arith.constant 0 : index
    %18 = vector.load %arg1[%c0_15, %c0_16] : memref<128x512xbf16, #tpu.memory_space<vmem>>, vector<128x512xbf16>
    %cst_17 = arith.constant dense<0.000000e+00> : vector<2x512xf32>
    %19 = tpu.matmul %17, %18, %cst_17 {dimension_numbers = #tpu.dot_dimension_numbers<[1], [0], [0], [1], [0, 0, 1, 1], [], []>} : vector<2x128xbf16>, vector<128x512xbf16>, vector<2x512xf32> -> vector<2x512xf32>
    %c0_18 = arith.constant 0 : index
    %c0_19 = arith.constant 0 : index
    %20 = vector.load %arg3[%c0_18, %c0_19] : memref<1x512xf32, #tpu.memory_space<vmem>>, vector<1x512xf32>
    %21 = vector.broadcast %20 : vector<1x512xf32> to vector<2x512xf32>
    %22 = arith.addf %19, %21 : vector<2x512xf32>
    %c0_20 = arith.constant 0 : index
    %c1024 = arith.constant 1024 : index
    %23 = vector.load %arg5[%c0_20, %c1024] : memref<2x4096xf32, #tpu.memory_space<vmem>>, vector<2x512xf32>
    tpu.vector_store %arg5[%c0_20, %c1024], %22 {strides = array<i32>} : memref<2x4096xf32, #tpu.memory_space<vmem>>, vector<2x512xf32>,
    %c0_21 = arith.constant 0 : index
    %c384 = arith.constant 384 : index
    %24 = vector.load %arg0[%c0_21, %c384] : memref<2x1024xf32, #tpu.memory_space<vmem>>, vector<2x128xf32>
    %25 = arith.truncf %24 : vector<2x128xf32> to vector<2x128xbf16>
    %c0_22 = arith.constant 0 : index
    %c0_23 = arith.constant 0 : index
    %26 = vector.load %arg1[%c0_22, %c0_23] : memref<128x512xbf16, #tpu.memory_space<vmem>>, vector<128x512xbf16>
    %cst_24 = arith.constant dense<0.000000e+00> : vector<2x512xf32>
    %27 = tpu.matmul %25, %26, %cst_24 {dimension_numbers = #tpu.dot_dimension_numbers<[1], [0], [0], [1], [0, 0, 1, 1], [], []>} : vector<2x128xbf16>, vector<128x512xbf16>, vector<2x512xf32> -> vector<2x512xf32>
    %c0_25 = arith.constant 0 : index
    %c0_26 = arith.constant 0 : index
    %28 = vector.load %arg3[%c0_25, %c0_26] : memref<1x512xf32, #tpu.memory_space<vmem>>, vector<1x512xf32>
    %29 = vector.broadcast %28 : vector<1x512xf32> to vector<2x512xf32>
    %30 = arith.addf %27, %29 : vector<2x512xf32>
    %c0_27 = arith.constant 0 : index
    %c1536 = arith.constant 1536 : index
    %31 = vector.load %arg5[%c0_27, %c1536] : memref<2x4096xf32, #tpu.memory_space<vmem>>, vector<2x512xf32>
    tpu.vector_store %arg5[%c0_27, %c1536], %30 {strides = array<i32>} : memref<2x4096xf32, #tpu.memory_space<vmem>>, vector<2x512xf32>,
    %c0_28 = arith.constant 0 : index
    %c512_29 = arith.constant 512 : index
    %32 = vector.load %arg0[%c0_28, %c512_29] : memref<2x1024xf32, #tpu.memory_space<vmem>>, vector<2x128xf32>
    %33 = arith.truncf %32 : vector<2x128xf32> to vector<2x128xbf16>
    %c0_30 = arith.constant 0 : index
    %c0_31 = arith.constant 0 : index
    %34 = vector.load %arg1[%c0_30, %c0_31] : memref<128x512xbf16, #tpu.memory_space<vmem>>, vector<128x512xbf16>
    %cst_32 = arith.constant dense<0.000000e+00> : vector<2x512xf32>
    %35 = tpu.matmul %33, %34, %cst_32 {dimension_numbers = #tpu.dot_dimension_numbers<[1], [0], [0], [1], [0, 0, 1, 1], [], []>} : vector<2x128xbf16>, vector<128x512xbf16>, vector<2x512xf32> -> vector<2x512xf32>
    %c0_33 = arith.constant 0 : index
    %c0_34 = arith.constant 0 : index
    %36 = vector.load %arg3[%c0_33, %c0_34] : memref<1x512xf32, #tpu.memory_space<vmem>>, vector<1x512xf32>
    %37 = vector.broadcast %36 : vector<1x512xf32> to vector<2x512xf32>
    %38 = arith.addf %35, %37 : vector<2x512xf32>
    %c0_35 = arith.constant 0 : index
    %c2048 = arith.constant 2048 : index
    %39 = vector.load %arg5[%c0_35, %c2048] : memref<2x4096xf32, #tpu.memory_space<vmem>>, vector<2x512xf32>
    tpu.vector_store %arg5[%c0_35, %c2048], %38 {strides = array<i32>} : memref<2x4096xf32, #tpu.memory_space<vmem>>, vector<2x512xf32>,
    %c0_36 = arith.constant 0 : index
    %c640 = arith.constant 640 : index
    %40 = vector.load %arg0[%c0_36, %c640] : memref<2x1024xf32, #tpu.memory_space<vmem>>, vector<2x128xf32>
    %41 = arith.truncf %40 : vector<2x128xf32> to vector<2x128xbf16>
    %c0_37 = arith.constant 0 : index
    %c0_38 = arith.constant 0 : index
    %42 = vector.load %arg1[%c0_37, %c0_38] : memref<128x512xbf16, #tpu.memory_space<vmem>>, vector<128x512xbf16>
    %cst_39 = arith.constant dense<0.000000e+00> : vector<2x512xf32>
    %43 = tpu.matmul %41, %42, %cst_39 {dimension_numbers = #tpu.dot_dimension_numbers<[1], [0], [0], [1], [0, 0, 1, 1], [], []>} : vector<2x128xbf16>, vector<128x512xbf16>, vector<2x512xf32> -> vector<2x512xf32>
    %c0_40 = arith.constant 0 : index
    %c0_41 = arith.constant 0 : index
    %44 = vector.load %arg3[%c0_40, %c0_41] : memref<1x512xf32, #tpu.memory_space<vmem>>, vector<1x512xf32>
    %45 = vector.broadcast %44 : vector<1x512xf32> to vector<2x512xf32>
    %46 = arith.addf %43, %45 : vector<2x512xf32>
    %c0_42 = arith.constant 0 : index
    %c2560 = arith.constant 2560 : index
    %47 = vector.load %arg5[%c0_42, %c2560] : memref<2x4096xf32, #tpu.memory_space<vmem>>, vector<2x512xf32>
    tpu.vector_store %arg5[%c0_42, %c2560], %46 {strides = array<i32>} : memref<2x4096xf32, #tpu.memory_space<vmem>>, vector<2x512xf32>,
    %c0_43 = arith.constant 0 : index
    %c768 = arith.constant 768 : index
    %48 = vector.load %arg0[%c0_43, %c768] : memref<2x1024xf32, #tpu.memory_space<vmem>>, vector<2x128xf32>
    %49 = arith.truncf %48 : vector<2x128xf32> to vector<2x128xbf16>
    %c0_44 = arith.constant 0 : index
    %c0_45 = arith.constant 0 : index
    %50 = vector.load %arg1[%c0_44, %c0_45] : memref<128x512xbf16, #tpu.memory_space<vmem>>, vector<128x512xbf16>
    %cst_46 = arith.constant dense<0.000000e+00> : vector<2x512xf32>
    %51 = tpu.matmul %49, %50, %cst_46 {dimension_numbers = #tpu.dot_dimension_numbers<[1], [0], [0], [1], [0, 0, 1, 1], [], []>} : vector<2x128xbf16>, vector<128x512xbf16>, vector<2x512xf32> -> vector<2x512xf32>
    %c0_47 = arith.constant 0 : index
    %c0_48 = arith.constant 0 : index
    %52 = vector.load %arg3[%c0_47, %c0_48] : memref<1x512xf32, #tpu.memory_space<vmem>>, vector<1x512xf32>
    %53 = vector.broadcast %52 : vector<1x512xf32> to vector<2x512xf32>
    %54 = arith.addf %51, %53 : vector<2x512xf32>
    %c0_49 = arith.constant 0 : index
    %c3072 = arith.constant 3072 : index
    %55 = vector.load %arg5[%c0_49, %c3072] : memref<2x4096xf32, #tpu.memory_space<vmem>>, vector<2x512xf32>
    tpu.vector_store %arg5[%c0_49, %c3072], %54 {strides = array<i32>} : memref<2x4096xf32, #tpu.memory_space<vmem>>, vector<2x512xf32>,
    %c0_50 = arith.constant 0 : index
    %c896 = arith.constant 896 : index
    %56 = vector.load %arg0[%c0_50, %c896] : memref<2x1024xf32, #tpu.memory_space<vmem>>, vector<2x128xf32>
    %57 = arith.truncf %56 : vector<2x128xf32> to vector<2x128xbf16>
    %c0_51 = arith.constant 0 : index
    %c0_52 = arith.constant 0 : index
    %58 = vector.load %arg1[%c0_51, %c0_52] : memref<128x512xbf16, #tpu.memory_space<vmem>>, vector<128x512xbf16>
    %cst_53 = arith.constant dense<0.000000e+00> : vector<2x512xf32>
    %59 = tpu.matmul %57, %58, %cst_53 {dimension_numbers = #tpu.dot_dimension_numbers<[1], [0], [0], [1], [0, 0, 1, 1], [], []>} : vector<2x128xbf16>, vector<128x512xbf16>, vector<2x512xf32> -> vector<2x512xf32>
    %c0_54 = arith.constant 0 : index
    %c0_55 = arith.constant 0 : index
    %60 = vector.load %arg3[%c0_54, %c0_55] : memref<1x512xf32, #tpu.memory_space<vmem>>, vector<1x512xf32>
    %61 = vector.broadcast %60 : vector<1x512xf32> to vector<2x512xf32>
    %62 = arith.addf %59, %61 : vector<2x512xf32>
    %c0_56 = arith.constant 0 : index
    %c3584 = arith.constant 3584 : index
    %63 = vector.load %arg5[%c0_56, %c3584] : memref<2x4096xf32, #tpu.memory_space<vmem>>, vector<2x512xf32>
    tpu.vector_store %arg5[%c0_56, %c3584], %62 {strides = array<i32>} : memref<2x4096xf32, #tpu.memory_space<vmem>>, vector<2x512xf32>,
    %cst_57 = arith.constant 0.000000e+00 : f32
    %64 = vector.broadcast %cst_57 : f32 to vector<2x128xf32>
    %c0_58 = arith.constant 0 : index
    %c0_59 = arith.constant 0 : index
    %65 = vector.load %arg5[%c0_58, %c0_59] : memref<2x4096xf32, #tpu.memory_space<vmem>>, vector<2x512xf32>
    %66 = vector.extract_strided_slice %65 {offsets = [0, 0], sizes = [2, 128], strides = [1, 1]} : vector<2x512xf32> to vector<2x128xf32>
    %67 = arith.negf %66 : vector<2x128xf32>
    %68 = math.exp %67 : vector<2x128xf32>
    %cst_60 = arith.constant 1.000000e+00 : f32
    %69 = vector.broadcast %cst_60 : f32 to vector<2x128xf32>
    %70 = arith.addf %69, %68 : vector<2x128xf32>
    %71 = arith.divf %69, %70 : vector<2x128xf32>
    %72 = vector.extract_strided_slice %65 {offsets = [0, 128], sizes = [2, 128], strides = [1, 1]} : vector<2x512xf32> to vector<2x128xf32>
    %73 = arith.negf %72 : vector<2x128xf32>
    %74 = math.exp %73 : vector<2x128xf32>
    %cst_61 = arith.constant 1.000000e+00 : f32
    %75 = vector.broadcast %cst_61 : f32 to vector<2x128xf32>
    %76 = arith.addf %75, %74 : vector<2x128xf32>
    %77 = arith.divf %75, %76 : vector<2x128xf32>
    %78 = vector.extract_strided_slice %65 {offsets = [0, 256], sizes = [2, 128], strides = [1, 1]} : vector<2x512xf32> to vector<2x128xf32>
    %79 = math.tanh %78 : vector<2x128xf32>
    %80 = vector.extract_strided_slice %65 {offsets = [0, 384], sizes = [2, 128], strides = [1, 1]} : vector<2x512xf32> to vector<2x128xf32>
    %81 = arith.negf %80 : vector<2x128xf32>
    %82 = math.exp %81 : vector<2x128xf32>
    %cst_62 = arith.constant 1.000000e+00 : f32
    %83 = vector.broadcast %cst_62 : f32 to vector<2x128xf32>
    %84 = arith.addf %83, %82 : vector<2x128xf32>
    %85 = arith.divf %83, %84 : vector<2x128xf32>
    %86 = arith.mulf %77, %64 : vector<2x128xf32>
    %87 = arith.mulf %71, %79 : vector<2x128xf32>
    %88 = arith.addf %86, %87 : vector<2x128xf32>
    %89 = math.tanh %88 : vector<2x128xf32>
    %90 = arith.mulf %85, %89 : vector<2x128xf32>
    %c0_63 = arith.constant 0 : index
    %c0_64 = arith.constant 0 : index
    %91 = vector.load %arg4[%c0_63, %c0_64] : memref<2x1024xf32, #tpu.memory_space<vmem>>, vector<2x128xf32>
    tpu.vector_store %arg4[%c0_63, %c0_64], %90 {strides = array<i32>} : memref<2x1024xf32, #tpu.memory_space<vmem>>, vector<2x128xf32>,
    %c0_65 = arith.constant 0 : index
    %c512_66 = arith.constant 512 : index
    %92 = vector.load %arg5[%c0_65, %c512_66] : memref<2x4096xf32, #tpu.memory_space<vmem>>, vector<2x512xf32>
    %93 = arith.truncf %90 : vector<2x128xf32> to vector<2x128xbf16>
    %c0_67 = arith.constant 0 : index
    %c0_68 = arith.constant 0 : index
    %94 = vector.load %arg2[%c0_67, %c0_68] : memref<128x512xbf16, #tpu.memory_space<vmem>>, vector<128x512xbf16>
    %cst_69 = arith.constant dense<0.000000e+00> : vector<2x512xf32>
    %95 = tpu.matmul %93, %94, %cst_69 {dimension_numbers = #tpu.dot_dimension_numbers<[1], [0], [0], [1], [0, 0, 1, 1], [], []>} : vector<2x128xbf16>, vector<128x512xbf16>, vector<2x512xf32> -> vector<2x512xf32>
    %96 = arith.addf %92, %95 : vector<2x512xf32>
    %97 = vector.extract_strided_slice %96 {offsets = [0, 0], sizes = [2, 128], strides = [1, 1]} : vector<2x512xf32> to vector<2x128xf32>
    %98 = arith.negf %97 : vector<2x128xf32>
    %99 = math.exp %98 : vector<2x128xf32>
    %cst_70 = arith.constant 1.000000e+00 : f32
    %100 = vector.broadcast %cst_70 : f32 to vector<2x128xf32>
    %101 = arith.addf %100, %99 : vector<2x128xf32>
    %102 = arith.divf %100, %101 : vector<2x128xf32>
    %103 = vector.extract_strided_slice %96 {offsets = [0, 128], sizes = [2, 128], strides = [1, 1]} : vector<2x512xf32> to vector<2x128xf32>
    %104 = arith.negf %103 : vector<2x128xf32>
    %105 = math.exp %104 : vector<2x128xf32>
    %cst_71 = arith.constant 1.000000e+00 : f32
    %106 = vector.broadcast %cst_71 : f32 to vector<2x128xf32>
    %107 = arith.addf %106, %105 : vector<2x128xf32>
    %108 = arith.divf %106, %107 : vector<2x128xf32>
    %109 = vector.extract_strided_slice %96 {offsets = [0, 256], sizes = [2, 128], strides = [1, 1]} : vector<2x512xf32> to vector<2x128xf32>
    %110 = math.tanh %109 : vector<2x128xf32>
    %111 = vector.extract_strided_slice %96 {offsets = [0, 384], sizes = [2, 128], strides = [1, 1]} : vector<2x512xf32> to vector<2x128xf32>
    %112 = arith.negf %111 : vector<2x128xf32>
    %113 = math.exp %112 : vector<2x128xf32>
    %cst_72 = arith.constant 1.000000e+00 : f32
    %114 = vector.broadcast %cst_72 : f32 to vector<2x128xf32>
    %115 = arith.addf %114, %113 : vector<2x128xf32>
    %116 = arith.divf %114, %115 : vector<2x128xf32>
    %117 = arith.mulf %108, %88 : vector<2x128xf32>
    %118 = arith.mulf %102, %110 : vector<2x128xf32>
    %119 = arith.addf %117, %118 : vector<2x128xf32>
    %120 = math.tanh %119 : vector<2x128xf32>
    %121 = arith.mulf %116, %120 : vector<2x128xf32>
    %c0_73 = arith.constant 0 : index
    %c128_74 = arith.constant 128 : index
    %122 = vector.load %arg4[%c0_73, %c128_74] : memref<2x1024xf32, #tpu.memory_space<vmem>>, vector<2x128xf32>
    tpu.vector_store %arg4[%c0_73, %c128_74], %121 {strides = array<i32>} : memref<2x1024xf32, #tpu.memory_space<vmem>>, vector<2x128xf32>,
    %c0_75 = arith.constant 0 : index
    %c1024_76 = arith.constant 1024 : index
    %123 = vector.load %arg5[%c0_75, %c1024_76] : memref<2x4096xf32, #tpu.memory_space<vmem>>, vector<2x512xf32>
    %124 = arith.truncf %121 : vector<2x128xf32> to vector<2x128xbf16>
    %c0_77 = arith.constant 0 : index
    %c0_78 = arith.constant 0 : index
    %125 = vector.load %arg2[%c0_77, %c0_78] : memref<128x512xbf16, #tpu.memory_space<vmem>>, vector<128x512xbf16>
    %cst_79 = arith.constant dense<0.000000e+00> : vector<2x512xf32>
    %126 = tpu.matmul %124, %125, %cst_79 {dimension_numbers = #tpu.dot_dimension_numbers<[1], [0], [0], [1], [0, 0, 1, 1], [], []>} : vector<2x128xbf16>, vector<128x512xbf16>, vector<2x512xf32> -> vector<2x512xf32>
    %127 = arith.addf %123, %126 : vector<2x512xf32>
    %128 = vector.extract_strided_slice %127 {offsets = [0, 0], sizes = [2, 128], strides = [1, 1]} : vector<2x512xf32> to vector<2x128xf32>
    %129 = arith.negf %128 : vector<2x128xf32>
    %130 = math.exp %129 : vector<2x128xf32>
    %cst_80 = arith.constant 1.000000e+00 : f32
    %131 = vector.broadcast %cst_80 : f32 to vector<2x128xf32>
    %132 = arith.addf %131, %130 : vector<2x128xf32>
    %133 = arith.divf %131, %132 : vector<2x128xf32>
    %134 = vector.extract_strided_slice %127 {offsets = [0, 128], sizes = [2, 128], strides = [1, 1]} : vector<2x512xf32> to vector<2x128xf32>
    %135 = arith.negf %134 : vector<2x128xf32>
    %136 = math.exp %135 : vector<2x128xf32>
    %cst_81 = arith.constant 1.000000e+00 : f32
    %137 = vector.broadcast %cst_81 : f32 to vector<2x128xf32>
    %138 = arith.addf %137, %136 : vector<2x128xf32>
    %139 = arith.divf %137, %138 : vector<2x128xf32>
    %140 = vector.extract_strided_slice %127 {offsets = [0, 256], sizes = [2, 128], strides = [1, 1]} : vector<2x512xf32> to vector<2x128xf32>
    %141 = math.tanh %140 : vector<2x128xf32>
    %142 = vector.extract_strided_slice %127 {offsets = [0, 384], sizes = [2, 128], strides = [1, 1]} : vector<2x512xf32> to vector<2x128xf32>
    %143 = arith.negf %142 : vector<2x128xf32>
    %144 = math.exp %143 : vector<2x128xf32>
    %cst_82 = arith.constant 1.000000e+00 : f32
    %145 = vector.broadcast %cst_82 : f32 to vector<2x128xf32>
    %146 = arith.addf %145, %144 : vector<2x128xf32>
    %147 = arith.divf %145, %146 : vector<2x128xf32>
    %148 = arith.mulf %139, %119 : vector<2x128xf32>
    %149 = arith.mulf %133, %141 : vector<2x128xf32>
    %150 = arith.addf %148, %149 : vector<2x128xf32>
    %151 = math.tanh %150 : vector<2x128xf32>
    %152 = arith.mulf %147, %151 : vector<2x128xf32>
    %c0_83 = arith.constant 0 : index
    %c256_84 = arith.constant 256 : index
    %153 = vector.load %arg4[%c0_83, %c256_84] : memref<2x1024xf32, #tpu.memory_space<vmem>>, vector<2x128xf32>
    tpu.vector_store %arg4[%c0_83, %c256_84], %152 {strides = array<i32>} : memref<2x1024xf32, #tpu.memory_space<vmem>>, vector<2x128xf32>,
    %c0_85 = arith.constant 0 : index
    %c1536_86 = arith.constant 1536 : index
    %154 = vector.load %arg5[%c0_85, %c1536_86] : memref<2x4096xf32, #tpu.memory_space<vmem>>, vector<2x512xf32>
    %155 = arith.truncf %152 : vector<2x128xf32> to vector<2x128xbf16>
    %c0_87 = arith.constant 0 : index
    %c0_88 = arith.constant 0 : index
    %156 = vector.load %arg2[%c0_87, %c0_88] : memref<128x512xbf16, #tpu.memory_space<vmem>>, vector<128x512xbf16>
    %cst_89 = arith.constant dense<0.000000e+00> : vector<2x512xf32>
    %157 = tpu.matmul %155, %156, %cst_89 {dimension_numbers = #tpu.dot_dimension_numbers<[1], [0], [0], [1], [0, 0, 1, 1], [], []>} : vector<2x128xbf16>, vector<128x512xbf16>, vector<2x512xf32> -> vector<2x512xf32>
    %158 = arith.addf %154, %157 : vector<2x512xf32>
    %159 = vector.extract_strided_slice %158 {offsets = [0, 0], sizes = [2, 128], strides = [1, 1]} : vector<2x512xf32> to vector<2x128xf32>
    %160 = arith.negf %159 : vector<2x128xf32>
    %161 = math.exp %160 : vector<2x128xf32>
    %cst_90 = arith.constant 1.000000e+00 : f32
    %162 = vector.broadcast %cst_90 : f32 to vector<2x128xf32>
    %163 = arith.addf %162, %161 : vector<2x128xf32>
    %164 = arith.divf %162, %163 : vector<2x128xf32>
    %165 = vector.extract_strided_slice %158 {offsets = [0, 128], sizes = [2, 128], strides = [1, 1]} : vector<2x512xf32> to vector<2x128xf32>
    %166 = arith.negf %165 : vector<2x128xf32>
    %167 = math.exp %166 : vector<2x128xf32>
    %cst_91 = arith.constant 1.000000e+00 : f32
    %168 = vector.broadcast %cst_91 : f32 to vector<2x128xf32>
    %169 = arith.addf %168, %167 : vector<2x128xf32>
    %170 = arith.divf %168, %169 : vector<2x128xf32>
    %171 = vector.extract_strided_slice %158 {offsets = [0, 256], sizes = [2, 128], strides = [1, 1]} : vector<2x512xf32> to vector<2x128xf32>
    %172 = math.tanh %171 : vector<2x128xf32>
    %173 = vector.extract_strided_slice %158 {offsets = [0, 384], sizes = [2, 128], strides = [1, 1]} : vector<2x512xf32> to vector<2x128xf32>
    %174 = arith.negf %173 : vector<2x128xf32>
    %175 = math.exp %174 : vector<2x128xf32>
    %cst_92 = arith.constant 1.000000e+00 : f32
    %176 = vector.broadcast %cst_92 : f32 to vector<2x128xf32>
    %177 = arith.addf %176, %175 : vector<2x128xf32>
    %178 = arith.divf %176, %177 : vector<2x128xf32>
    %179 = arith.mulf %170, %150 : vector<2x128xf32>
    %180 = arith.mulf %164, %172 : vector<2x128xf32>
    %181 = arith.addf %179, %180 : vector<2x128xf32>
    %182 = math.tanh %181 : vector<2x128xf32>
    %183 = arith.mulf %178, %182 : vector<2x128xf32>
    %c0_93 = arith.constant 0 : index
    %c384_94 = arith.constant 384 : index
    %184 = vector.load %arg4[%c0_93, %c384_94] : memref<2x1024xf32, #tpu.memory_space<vmem>>, vector<2x128xf32>
    tpu.vector_store %arg4[%c0_93, %c384_94], %183 {strides = array<i32>} : memref<2x1024xf32, #tpu.memory_space<vmem>>, vector<2x128xf32>,
    %c0_95 = arith.constant 0 : index
    %c2048_96 = arith.constant 2048 : index
    %185 = vector.load %arg5[%c0_95, %c2048_96] : memref<2x4096xf32, #tpu.memory_space<vmem>>, vector<2x512xf32>
    %186 = arith.truncf %183 : vector<2x128xf32> to vector<2x128xbf16>
    %c0_97 = arith.constant 0 : index
    %c0_98 = arith.constant 0 : index
    %187 = vector.load %arg2[%c0_97, %c0_98] : memref<128x512xbf16, #tpu.memory_space<vmem>>, vector<128x512xbf16>
    %cst_99 = arith.constant dense<0.000000e+00> : vector<2x512xf32>
    %188 = tpu.matmul %186, %187, %cst_99 {dimension_numbers = #tpu.dot_dimension_numbers<[1], [0], [0], [1], [0, 0, 1, 1], [], []>} : vector<2x128xbf16>, vector<128x512xbf16>, vector<2x512xf32> -> vector<2x512xf32>
    %189 = arith.addf %185, %188 : vector<2x512xf32>
    %190 = vector.extract_strided_slice %189 {offsets = [0, 0], sizes = [2, 128], strides = [1, 1]} : vector<2x512xf32> to vector<2x128xf32>
    %191 = arith.negf %190 : vector<2x128xf32>
    %192 = math.exp %191 : vector<2x128xf32>
    %cst_100 = arith.constant 1.000000e+00 : f32
    %193 = vector.broadcast %cst_100 : f32 to vector<2x128xf32>
    %194 = arith.addf %193, %192 : vector<2x128xf32>
    %195 = arith.divf %193, %194 : vector<2x128xf32>
    %196 = vector.extract_strided_slice %189 {offsets = [0, 128], sizes = [2, 128], strides = [1, 1]} : vector<2x512xf32> to vector<2x128xf32>
    %197 = arith.negf %196 : vector<2x128xf32>
    %198 = math.exp %197 : vector<2x128xf32>
    %cst_101 = arith.constant 1.000000e+00 : f32
    %199 = vector.broadcast %cst_101 : f32 to vector<2x128xf32>
    %200 = arith.addf %199, %198 : vector<2x128xf32>
    %201 = arith.divf %199, %200 : vector<2x128xf32>
    %202 = vector.extract_strided_slice %189 {offsets = [0, 256], sizes = [2, 128], strides = [1, 1]} : vector<2x512xf32> to vector<2x128xf32>
    %203 = math.tanh %202 : vector<2x128xf32>
    %204 = vector.extract_strided_slice %189 {offsets = [0, 384], sizes = [2, 128], strides = [1, 1]} : vector<2x512xf32> to vector<2x128xf32>
    %205 = arith.negf %204 : vector<2x128xf32>
    %206 = math.exp %205 : vector<2x128xf32>
    %cst_102 = arith.constant 1.000000e+00 : f32
    %207 = vector.broadcast %cst_102 : f32 to vector<2x128xf32>
    %208 = arith.addf %207, %206 : vector<2x128xf32>
    %209 = arith.divf %207, %208 : vector<2x128xf32>
    %210 = arith.mulf %201, %181 : vector<2x128xf32>
    %211 = arith.mulf %195, %203 : vector<2x128xf32>
    %212 = arith.addf %210, %211 : vector<2x128xf32>
    %213 = math.tanh %212 : vector<2x128xf32>
    %214 = arith.mulf %209, %213 : vector<2x128xf32>
    %c0_103 = arith.constant 0 : index
    %c512_104 = arith.constant 512 : index
    %215 = vector.load %arg4[%c0_103, %c512_104] : memref<2x1024xf32, #tpu.memory_space<vmem>>, vector<2x128xf32>
    tpu.vector_store %arg4[%c0_103, %c512_104], %214 {strides = array<i32>} : memref<2x1024xf32, #tpu.memory_space<vmem>>, vector<2x128xf32>,
    %c0_105 = arith.constant 0 : index
    %c2560_106 = arith.constant 2560 : index
    %216 = vector.load %arg5[%c0_105, %c2560_106] : memref<2x4096xf32, #tpu.memory_space<vmem>>, vector<2x512xf32>
    %217 = arith.truncf %214 : vector<2x128xf32> to vector<2x128xbf16>
    %c0_107 = arith.constant 0 : index
    %c0_108 = arith.constant 0 : index
    %218 = vector.load %arg2[%c0_107, %c0_108] : memref<128x512xbf16, #tpu.memory_space<vmem>>, vector<128x512xbf16>
    %cst_109 = arith.constant dense<0.000000e+00> : vector<2x512xf32>
    %219 = tpu.matmul %217, %218, %cst_109 {dimension_numbers = #tpu.dot_dimension_numbers<[1], [0], [0], [1], [0, 0, 1, 1], [], []>} : vector<2x128xbf16>, vector<128x512xbf16>, vector<2x512xf32> -> vector<2x512xf32>
    %220 = arith.addf %216, %219 : vector<2x512xf32>
    %221 = vector.extract_strided_slice %220 {offsets = [0, 0], sizes = [2, 128], strides = [1, 1]} : vector<2x512xf32> to vector<2x128xf32>
    %222 = arith.negf %221 : vector<2x128xf32>
    %223 = math.exp %222 : vector<2x128xf32>
    %cst_110 = arith.constant 1.000000e+00 : f32
    %224 = vector.broadcast %cst_110 : f32 to vector<2x128xf32>
    %225 = arith.addf %224, %223 : vector<2x128xf32>
    %226 = arith.divf %224, %225 : vector<2x128xf32>
    %227 = vector.extract_strided_slice %220 {offsets = [0, 128], sizes = [2, 128], strides = [1, 1]} : vector<2x512xf32> to vector<2x128xf32>
    %228 = arith.negf %227 : vector<2x128xf32>
    %229 = math.exp %228 : vector<2x128xf32>
    %cst_111 = arith.constant 1.000000e+00 : f32
    %230 = vector.broadcast %cst_111 : f32 to vector<2x128xf32>
    %231 = arith.addf %230, %229 : vector<2x128xf32>
    %232 = arith.divf %230, %231 : vector<2x128xf32>
    %233 = vector.extract_strided_slice %220 {offsets = [0, 256], sizes = [2, 128], strides = [1, 1]} : vector<2x512xf32> to vector<2x128xf32>
    %234 = math.tanh %233 : vector<2x128xf32>
    %235 = vector.extract_strided_slice %220 {offsets = [0, 384], sizes = [2, 128], strides = [1, 1]} : vector<2x512xf32> to vector<2x128xf32>
    %236 = arith.negf %235 : vector<2x128xf32>
    %237 = math.exp %236 : vector<2x128xf32>
    %cst_112 = arith.constant 1.000000e+00 : f32
    %238 = vector.broadcast %cst_112 : f32 to vector<2x128xf32>
    %239 = arith.addf %238, %237 : vector<2x128xf32>
    %240 = arith.divf %238, %239 : vector<2x128xf32>
    %241 = arith.mulf %232, %212 : vector<2x128xf32>
    %242 = arith.mulf %226, %234 : vector<2x128xf32>
    %243 = arith.addf %241, %242 : vector<2x128xf32>
    %244 = math.tanh %243 : vector<2x128xf32>
    %245 = arith.mulf %240, %244 : vector<2x128xf32>
    %c0_113 = arith.constant 0 : index
    %c640_114 = arith.constant 640 : index
    %246 = vector.load %arg4[%c0_113, %c640_114] : memref<2x1024xf32, #tpu.memory_space<vmem>>, vector<2x128xf32>
    tpu.vector_store %arg4[%c0_113, %c640_114], %245 {strides = array<i32>} : memref<2x1024xf32, #tpu.memory_space<vmem>>, vector<2x128xf32>,
    %c0_115 = arith.constant 0 : index
    %c3072_116 = arith.constant 3072 : index
    %247 = vector.load %arg5[%c0_115, %c3072_116] : memref<2x4096xf32, #tpu.memory_space<vmem>>, vector<2x512xf32>
    %248 = arith.truncf %245 : vector<2x128xf32> to vector<2x128xbf16>
    %c0_117 = arith.constant 0 : index
    %c0_118 = arith.constant 0 : index
    %249 = vector.load %arg2[%c0_117, %c0_118] : memref<128x512xbf16, #tpu.memory_space<vmem>>, vector<128x512xbf16>
    %cst_119 = arith.constant dense<0.000000e+00> : vector<2x512xf32>
    %250 = tpu.matmul %248, %249, %cst_119 {dimension_numbers = #tpu.dot_dimension_numbers<[1], [0], [0], [1], [0, 0, 1, 1], [], []>} : vector<2x128xbf16>, vector<128x512xbf16>, vector<2x512xf32> -> vector<2x512xf32>
    %251 = arith.addf %247, %250 : vector<2x512xf32>
    %252 = vector.extract_strided_slice %251 {offsets = [0, 0], sizes = [2, 128], strides = [1, 1]} : vector<2x512xf32> to vector<2x128xf32>
    %253 = arith.negf %252 : vector<2x128xf32>
    %254 = math.exp %253 : vector<2x128xf32>
    %cst_120 = arith.constant 1.000000e+00 : f32
    %255 = vector.broadcast %cst_120 : f32 to vector<2x128xf32>
    %256 = arith.addf %255, %254 : vector<2x128xf32>
    %257 = arith.divf %255, %256 : vector<2x128xf32>
    %258 = vector.extract_strided_slice %251 {offsets = [0, 128], sizes = [2, 128], strides = [1, 1]} : vector<2x512xf32> to vector<2x128xf32>
    %259 = arith.negf %258 : vector<2x128xf32>
    %260 = math.exp %259 : vector<2x128xf32>
    %cst_121 = arith.constant 1.000000e+00 : f32
    %261 = vector.broadcast %cst_121 : f32 to vector<2x128xf32>
    %262 = arith.addf %261, %260 : vector<2x128xf32>
    %263 = arith.divf %261, %262 : vector<2x128xf32>
    %264 = vector.extract_strided_slice %251 {offsets = [0, 256], sizes = [2, 128], strides = [1, 1]} : vector<2x512xf32> to vector<2x128xf32>
    %265 = math.tanh %264 : vector<2x128xf32>
    %266 = vector.extract_strided_slice %251 {offsets = [0, 384], sizes = [2, 128], strides = [1, 1]} : vector<2x512xf32> to vector<2x128xf32>
    %267 = arith.negf %266 : vector<2x128xf32>
    %268 = math.exp %267 : vector<2x128xf32>
    %cst_122 = arith.constant 1.000000e+00 : f32
    %269 = vector.broadcast %cst_122 : f32 to vector<2x128xf32>
    %270 = arith.addf %269, %268 : vector<2x128xf32>
    %271 = arith.divf %269, %270 : vector<2x128xf32>
    %272 = arith.mulf %263, %243 : vector<2x128xf32>
    %273 = arith.mulf %257, %265 : vector<2x128xf32>
    %274 = arith.addf %272, %273 : vector<2x128xf32>
    %275 = math.tanh %274 : vector<2x128xf32>
    %276 = arith.mulf %271, %275 : vector<2x128xf32>
    %c0_123 = arith.constant 0 : index
    %c768_124 = arith.constant 768 : index
    %277 = vector.load %arg4[%c0_123, %c768_124] : memref<2x1024xf32, #tpu.memory_space<vmem>>, vector<2x128xf32>
    tpu.vector_store %arg4[%c0_123, %c768_124], %276 {strides = array<i32>} : memref<2x1024xf32, #tpu.memory_space<vmem>>, vector<2x128xf32>,
    %c0_125 = arith.constant 0 : index
    %c3584_126 = arith.constant 3584 : index
    %278 = vector.load %arg5[%c0_125, %c3584_126] : memref<2x4096xf32, #tpu.memory_space<vmem>>, vector<2x512xf32>
    %279 = arith.truncf %276 : vector<2x128xf32> to vector<2x128xbf16>
    %c0_127 = arith.constant 0 : index
    %c0_128 = arith.constant 0 : index
    %280 = vector.load %arg2[%c0_127, %c0_128] : memref<128x512xbf16, #tpu.memory_space<vmem>>, vector<128x512xbf16>
    %cst_129 = arith.constant dense<0.000000e+00> : vector<2x512xf32>
    %281 = tpu.matmul %279, %280, %cst_129 {dimension_numbers = #tpu.dot_dimension_numbers<[1], [0], [0], [1], [0, 0, 1, 1], [], []>} : vector<2x128xbf16>, vector<128x512xbf16>, vector<2x512xf32> -> vector<2x512xf32>
    %282 = arith.addf %278, %281 : vector<2x512xf32>
    %283 = vector.extract_strided_slice %282 {offsets = [0, 0], sizes = [2, 128], strides = [1, 1]} : vector<2x512xf32> to vector<2x128xf32>
    %284 = arith.negf %283 : vector<2x128xf32>
    %285 = math.exp %284 : vector<2x128xf32>
    %cst_130 = arith.constant 1.000000e+00 : f32
    %286 = vector.broadcast %cst_130 : f32 to vector<2x128xf32>
    %287 = arith.addf %286, %285 : vector<2x128xf32>
    %288 = arith.divf %286, %287 : vector<2x128xf32>
    %289 = vector.extract_strided_slice %282 {offsets = [0, 128], sizes = [2, 128], strides = [1, 1]} : vector<2x512xf32> to vector<2x128xf32>
    %290 = arith.negf %289 : vector<2x128xf32>
    %291 = math.exp %290 : vector<2x128xf32>
    %cst_131 = arith.constant 1.000000e+00 : f32
    %292 = vector.broadcast %cst_131 : f32 to vector<2x128xf32>
    %293 = arith.addf %292, %291 : vector<2x128xf32>
    %294 = arith.divf %292, %293 : vector<2x128xf32>
    %295 = vector.extract_strided_slice %282 {offsets = [0, 256], sizes = [2, 128], strides = [1, 1]} : vector<2x512xf32> to vector<2x128xf32>
    %296 = math.tanh %295 : vector<2x128xf32>
    %297 = vector.extract_strided_slice %282 {offsets = [0, 384], sizes = [2, 128], strides = [1, 1]} : vector<2x512xf32> to vector<2x128xf32>
    %298 = arith.negf %297 : vector<2x128xf32>
    %299 = math.exp %298 : vector<2x128xf32>
    %cst_132 = arith.constant 1.000000e+00 : f32
    %300 = vector.broadcast %cst_132 : f32 to vector<2x128xf32>
    %301 = arith.addf %300, %299 : vector<2x128xf32>
    %302 = arith.divf %300, %301 : vector<2x128xf32>
    %303 = arith.mulf %294, %274 : vector<2x128xf32>
    %304 = arith.mulf %288, %296 : vector<2x128xf32>
    %305 = arith.addf %303, %304 : vector<2x128xf32>
    %306 = math.tanh %305 : vector<2x128xf32>
    %307 = arith.mulf %302, %306 : vector<2x128xf32>
    %c0_133 = arith.constant 0 : index
    %c896_134 = arith.constant 896 : index
    %308 = vector.load %arg4[%c0_133, %c896_134] : memref<2x1024xf32, #tpu.memory_space<vmem>>, vector<2x128xf32>
    tpu.vector_store %arg4[%c0_133, %c896_134], %307 {strides = array<i32>} : memref<2x1024xf32, #tpu.memory_space<vmem>>, vector<2x128xf32>,
    return
  }
}

</mosaic_0001>

<bundles_post_ra>
// kernel: tiny_rnn_forward.1
= control target key start
LH: loop header
LB: loop body
LE: loop exit
PB: predicated region body
PF: predicated region fallthrough
CT: control target
= control target key end

     0   :  { %vm280_vm0 = vcmask 1041408   ;;  %vm282_vm1 = vcmask 1045508   ;;  %vm284_vm2 = vcmask 1043456   ;;  %s10384_s1 = inlined_call_operand.vmem [shape: bf16[128,512], index: 1, kind: input, shape index: {}]   ;;  %s10385_s0 = inlined_call_operand.vmem [shape: f32[2,1024], index: 0, kind: input, shape index: {}]   ;;  %s10386_s3 = inlined_call_operand.vmem [shape: f32[1,512], index: 3, kind: input, shape index: {}]   ;;  %s10387_s4 = inlined_call_operand.vmem [shape: f32[2,1024], index: 4, kind: output, shape index: {}]   ;;  %s10388_s2 = inlined_call_operand.vmem [shape: bf16[128,512], index: 2, kind: input, shape index: {}]  }
   0x1   :  { %v4657_v0 = vld [vmem:[%s10384_s1 + $0xe0] sm:$0xf]  ;;  %v6517_v1 = vld [vmem:[%s10384_s1 + $0xec] sm:$0xf0]  ;;  %v6515_v2 = vld [vmem:[%s10384_s1 + $0xe4] sm:$0xf] }
   0x2   :  { %v4658_v3 = vor.u32 %v6517_v1, %v4657_v0  ;;  %v4659_v4 = vld [vmem:[%s10384_s1 + $0xf0] sm:$0xf0]  ;;  %v4665_v5 = vld [vmem:[%s10384_s1 + $0xe8] sm:$0xf]  ;;  %v6518_v6 = vld [vmem:[%s10384_s1 + $0xf4] sm:$0xf0] }
   0x3   :  { %v4662_v7 = vor.u32 %v6515_v2, %v4659_v4  ;;  %v4666_v8 = vor.u32 %v6518_v6, %v4665_v5  ;;  %v6516_v9 = vld [vmem:[%s10384_s1 + $0xec] sm:$0xf]  ;;  %v4667_v10 = vld [vmem:[%s10384_s1 + $0xf8] sm:$0xf0]  ;;  %v4641_v11 = vld [vmem:[%s10384_s1 + $0xc0] sm:$0xf] }
   0x4   :  { %221 = vmatpush.bf16.msra.mxu0 %v4658_v3  ;;  %v4670_v12 = vor.u32 %v6516_v9, %v4667_v10  ;;  %v6513_v13 = vld [vmem:[%s10384_s1 + $0xcc] sm:$0xf0]  ;;  %v6511_v14 = vld [vmem:[%s10384_s1 + $0xc4] sm:$0xf]  ;;  %v4643_v15 = vld [vmem:[%s10384_s1 + $0xd0] sm:$0xf0] }
   0x5   :  { %234 = vmatpush.bf16.msra.mxu1 %v4662_v7  ;;  %247 = vmatpush.bf16.msra.mxu2 %v4666_v8  ;;  %v4642_v16 = vor.u32 %v6513_v13, %v4641_v11  ;;  %v4646_v17 = vor.u32 %v6511_v14, %v4643_v15  ;;  %v4649_v18 = vld [vmem:[%s10384_s1 + $0xc8] sm:$0xf]  ;;  %v6514_v19 = vld [vmem:[%s10384_s1 + $0xd4] sm:$0xf0]  ;;  %v6512_v20 = vld [vmem:[%s10384_s1 + $0xcc] sm:$0xf] }
   0x6   :  { %260 = vmatpush.bf16.msra.mxu3 %v4670_v12  ;;  %v4650_v21 = vor.u32 %v6514_v19, %v4649_v18  ;;  %v4651_v22 = vld [vmem:[%s10384_s1 + $0xd8] sm:$0xf0]  ;;  %v4625_v23 = vld [vmem:[%s10384_s1 + $0xa0] sm:$0xf]  ;;  %v6509_v24 = vld [vmem:[%s10384_s1 + $0xac] sm:$0xf0] }
   0x7   :  { %v4654_v25 = vor.u32 %v6512_v20, %v4651_v22  ;;  %v6507_v26 = vld [vmem:[%s10384_s1 + $0xa4] sm:$0xf]  ;;  %v4627_v27 = vld [vmem:[%s10384_s1 + $0xb0] sm:$0xf0]  ;;  %v4633_v28 = vld [vmem:[%s10384_s1 + $0xa8] sm:$0xf]  ;;  %v4626_v29 = vor.u32 %v6509_v24, %v4625_v23 }
   0x8   :  { %222 = vmatpush.bf16.msra.mxu0 %v4642_v16  ;;  %v6510_v30 = vld [vmem:[%s10384_s1 + $0xb4] sm:$0xf0]  ;;  %v6508_v31 = vld [vmem:[%s10384_s1 + $0xac] sm:$0xf]  ;;  %v4635_v32 = vld [vmem:[%s10384_s1 + $0xb8] sm:$0xf0]  ;;  %v4630_v33 = vor.u32 %v6507_v26, %v4627_v27 }
   0x9   :  { %235 = vmatpush.bf16.msra.mxu1 %v4646_v17  ;;  %248 = vmatpush.bf16.msra.mxu2 %v4650_v21  ;;  %v4634_v34 = vor.u32 %v6510_v30, %v4633_v28  ;;  %v4609_v35 = vld [vmem:[%s10384_s1 + $0x80] sm:$0xf]  ;;  %v6505_v36 = vld [vmem:[%s10384_s1 + $0x8c] sm:$0xf0]  ;;  %v6503_v37 = vld [vmem:[%s10384_s1 + $0x84] sm:$0xf]  ;;  %v4638_v38 = vor.u32 %v6508_v31, %v4635_v32 }
   0xa   :  { %261 = vmatpush.bf16.msra.mxu3 %v4654_v25  ;;  %v4611_v39 = vld [vmem:[%s10384_s1 + $0x90] sm:$0xf0]  ;;  %v4617_v40 = vld [vmem:[%s10384_s1 + $0x88] sm:$0xf]  ;;  %v6506_v41 = vld [vmem:[%s10384_s1 + $0x94] sm:$0xf0]  ;;  %v4610_v44 = vor.u32 %v6505_v36, %v4609_v35 }
   0xb   :  { %v6504_v42 = vld [vmem:[%s10384_s1 + $0x8c] sm:$0xf]  ;;  %v4619_v43 = vld [vmem:[%s10384_s1 + $0x98] sm:$0xf0]  ;;  %v4614_v45 = vor.u32 %v6503_v37, %v4611_v39  ;;  %v4618_v46 = vor.u32 %v6506_v41, %v4617_v40  ;;  %v4593_v47 = vld [vmem:[%s10384_s1 + $0x60] sm:$0xf] }
   0xc   :  { %223 = vmatpush.bf16.msra.mxu0 %v4626_v29  ;;  %v6501_v48 = vld [vmem:[%s10384_s1 + $0x6c] sm:$0xf0]  ;;  %v6499_v49 = vld [vmem:[%s10384_s1 + $0x64] sm:$0xf]  ;;  %v4622_v50 = vor.u32 %v6504_v42, %v4619_v43  ;;  %v4595_v51 = vld [vmem:[%s10384_s1 + $0x70] sm:$0xf0] }
   0xd   :  { %236 = vmatpush.bf16.msra.mxu1 %v4630_v33  ;;  %249 = vmatpush.bf16.msra.mxu2 %v4634_v34  ;;  %v4601_v52 = vld [vmem:[%s10384_s1 + $0x68] sm:$0xf]  ;;  %v6502_v53 = vld [vmem:[%s10384_s1 + $0x74] sm:$0xf0]  ;;  %v6500_v54 = vld [vmem:[%s10384_s1 + $0x6c] sm:$0xf]  ;;  %v4594_v56 = vor.u32 %v6501_v48, %v4593_v47  ;;  %v4598_v57 = vor.u32 %v6499_v49, %v4595_v51 }
   0xe   :  { %262 = vmatpush.bf16.msra.mxu3 %v4638_v38  ;;  %v4603_v55 = vld [vmem:[%s10384_s1 + $0x78] sm:$0xf0]  ;;  %v4602_v58 = vor.u32 %v6502_v53, %v4601_v52  ;;  %v4577_v59 = vld [vmem:[%s10384_s1 + $0x40] sm:$0xf]  ;;  %v6497_v60 = vld [vmem:[%s10384_s1 + $0x4c] sm:$0xf0] }
   0xf   :  { %v6495_v61 = vld [vmem:[%s10384_s1 + $0x44] sm:$0xf]  ;;  %v4606_v62 = vor.u32 %v6500_v54, %v4603_v55  ;;  %v4579_v63 = vld [vmem:[%s10384_s1 + $0x50] sm:$0xf0]  ;;  %v4585_v0 = vld [vmem:[%s10384_s1 + $0x48] sm:$0xf]  ;;  %v4578_v4 = vor.u32 %v6497_v60, %v4577_v59 }
  0x10   :  { %224 = vmatpush.bf16.msra.mxu0 %v4610_v44  ;;  %v6498_v1 = vld [vmem:[%s10384_s1 + $0x54] sm:$0xf0]  ;;  %v6496_v2 = vld [vmem:[%s10384_s1 + $0x4c] sm:$0xf]  ;;  %v4587_v3 = vld [vmem:[%s10384_s1 + $0x58] sm:$0xf0]  ;;  %v4582_v5 = vor.u32 %v6495_v61, %v4579_v63 }
  0x11   :  { %237 = vmatpush.bf16.msra.mxu1 %v4614_v45  ;;  %250 = vmatpush.bf16.msra.mxu2 %v4618_v46  ;;  %v4586_v6 = vor.u32 %v6498_v1, %v4585_v0  ;;  %v4561_v7 = vld [vmem:[%s10384_s1 + $0x20] sm:$0xf]  ;;  %v6493_v8 = vld [vmem:[%s10384_s1 + $0x2c] sm:$0xf0]  ;;  %v6491_v9 = vld [vmem:[%s10384_s1 + $0x24] sm:$0xf]  ;;  %v4590_v10 = vor.u32 %v6496_v2, %v4587_v3 }
  0x12   :  { %263 = vmatpush.bf16.msra.mxu3 %v4622_v50  ;;  %v4563_v11 = vld [vmem:[%s10384_s1 + $0x30] sm:$0xf0]  ;;  %v4569_v12 = vld [vmem:[%s10384_s1 + $0x28] sm:$0xf]  ;;  %v6494_v13 = vld [vmem:[%s10384_s1 + $0x34] sm:$0xf0]  ;;  %v4562_v16 = vor.u32 %v6493_v8, %v4561_v7 }
  0x13   :  { %v6492_v14 = vld [vmem:[%s10384_s1 + $0x2c] sm:$0xf]  ;;  %v4571_v15 = vld [vmem:[%s10384_s1 + $0x38] sm:$0xf0]  ;;  %v4545_v17 = vld [vmem:[%s10384_s1] sm:$0xf]  ;;  %v4566_v19 = vor.u32 %v6491_v9, %v4563_v11  ;;  %v4570_v20 = vor.u32 %v6494_v13, %v4569_v12 }
  0x14   :  { %225 = vmatpush.bf16.msra.mxu0 %v4594_v56  ;;  %v6489_v18 = vld [vmem:[%s10384_s1 + $0xc] sm:$0xf0]  ;;  %v6487_v21 = vld [vmem:[%s10384_s1 + $0x4] sm:$0xf]  ;;  %v4547_v22 = vld [vmem:[%s10384_s1 + $0x10] sm:$0xf0]  ;;  %v4574_v24 = vor.u32 %v6492_v14, %v4571_v15 }
  0x15   :  { %238 = vmatpush.bf16.msra.mxu1 %v4598_v57  ;;  %251 = vmatpush.bf16.msra.mxu2 %v4602_v58  ;;  %v4553_v23 = vld [vmem:[%s10384_s1 + $0x8] sm:$0xf]  ;;  %v6490_v25 = vld [vmem:[%s10384_s1 + $0x14] sm:$0xf0]  ;;  %v6488_v26 = vld [vmem:[%s10384_s1 + $0xc] sm:$0xf]  ;;  %v4546_v31 = vor.u32 %v6489_v18, %v4545_v17  ;;  %v4550_v35 = vor.u32 %v6487_v21, %v4547_v22 }
  0x16   :  { %264 = vmatpush.bf16.msra.mxu3 %v4606_v62  ;;  %v4555_v27 = vld [vmem:[%s10384_s1 + $0x18] sm:$0xf0]  ;;  %v4785_v28 = vld [vmem:[%s10384_s1 + $0xe0] sm:$0xf]  ;;  %v6549_v29 = vld [vmem:[%s10384_s1 + $0xec] sm:$0xf0]  ;;  %v4554_v36 = vor.u32 %v6490_v25, %v4553_v23 }
  0x17   :  { %v6547_v30 = vld [vmem:[%s10384_s1 + $0xe4] sm:$0xf]  ;;  %v4787_v32 = vld [vmem:[%s10384_s1 + $0xf0] sm:$0xf0]  ;;  %v4793_v33 = vld [vmem:[%s10384_s1 + $0xe8] sm:$0xf]  ;;  %v4558_v40 = vor.u32 %v6488_v26, %v4555_v27  ;;  %v4786_v41 = vor.u32 %v6549_v29, %v4785_v28 }
  0x18   :  { %226 = vmatpush.bf16.msra.mxu0 %v4578_v4  ;;  %v6550_v34 = vld [vmem:[%s10384_s1 + $0xf4] sm:$0xf0]  ;;  %v6548_v37 = vld [vmem:[%s10384_s1 + $0xec] sm:$0xf]  ;;  %v4795_v38 = vld [vmem:[%s10384_s1 + $0xf8] sm:$0xf0]  ;;  %v4790_v42 = vor.u32 %v6547_v30, %v4787_v32 }
  0x19   :  { %239 = vmatpush.bf16.msra.mxu1 %v4582_v5  ;;  %252 = vmatpush.bf16.msra.mxu2 %v4586_v6  ;;  %v17_v39 = vld [vmem:[%s10385_s0] sm:$0x3]  ;;  %v4794_v43 = vor.u32 %v6550_v34, %v4793_v33  ;;  %v6545_v45 = vld [vmem:[%s10384_s1 + $0xcc] sm:$0xf0]  ;;  %v6543_v46 = vld [vmem:[%s10384_s1 + $0xc4] sm:$0xf]  ;;  %v4798_v47 = vor.u32 %v6548_v37, %v4795_v38 }
  0x1a   :  { %265 = vmatpush.bf16.msra.mxu3 %v4590_v10  ;;  %v4769_v44 = vld [vmem:[%s10384_s1 + $0xc0] sm:$0xf]  ;;  %v4771_v48 = vld [vmem:[%s10384_s1 + $0xd0] sm:$0xf0]  ;;  %v4777_v49 = vld [vmem:[%s10384_s1 + $0xc8] sm:$0xf]  ;;  %v18_v51 = vpack.c.bf16 %v17_v39, %v17_v39 }
  0x1b   :  { %v6546_v50 = vld [vmem:[%s10384_s1 + $0xd4] sm:$0xf0]  ;;  %v6544_v52 = vld [vmem:[%s10384_s1 + $0xcc] sm:$0xf]  ;;  %v4779_v53 = vld [vmem:[%s10384_s1 + $0xd8] sm:$0xf0]  ;;  %v4770_v54 = vor.u32 %v6545_v45, %v4769_v44  ;;  %v4774_v55 = vor.u32 %v6543_v46, %v4771_v48 }
  0x1c   :  { %227 = vmatpush.bf16.msra.mxu0 %v4562_v16  ;;  %v4778_v56 = vor.u32 %v6546_v50, %v4777_v49  ;;  %v4753_v57 = vld [vmem:[%s10384_s1 + $0xa0] sm:$0xf]  ;;  %v6541_v58 = vld [vmem:[%s10384_s1 + $0xac] sm:$0xf0]  ;;  %v6539_v59 = vld [vmem:[%s10384_s1 + $0xa4] sm:$0xf]  ;;  %v4782_v60 = vor.u32 %v6544_v52, %v4779_v53 }
  0x1d   :  { %240 = vmatpush.bf16.msra.mxu1 %v4566_v19  ;;  %253 = vmatpush.bf16.msra.mxu2 %v4570_v20  ;;  %v4755_v61 = vld [vmem:[%s10384_s1 + $0xb0] sm:$0xf0]  ;;  %v4761_v62 = vld [vmem:[%s10384_s1 + $0xa8] sm:$0xf]  ;;  %v6542_v63 = vld [vmem:[%s10384_s1 + $0xb4] sm:$0xf0]  ;;  %v4754_v2 = vor.u32 %v6541_v58, %v4753_v57 }
  0x1e   :  { %266 = vmatpush.bf16.msra.mxu3 %v4574_v24  ;;  %v6540_v0 = vld [vmem:[%s10384_s1 + $0xac] sm:$0xf]  ;;  %v4763_v1 = vld [vmem:[%s10384_s1 + $0xb8] sm:$0xf0]  ;;  %v4758_v3 = vor.u32 %v6539_v59, %v4755_v61  ;;  %v4762_v4 = vor.u32 %v6542_v63, %v4761_v62  ;;  %v4737_v5 = vld [vmem:[%s10384_s1 + $0x80] sm:$0xf] }
  0x1f   :  { %v6537_v6 = vld [vmem:[%s10384_s1 + $0x8c] sm:$0xf0]  ;;  %v6535_v7 = vld [vmem:[%s10384_s1 + $0x84] sm:$0xf]  ;;  %v4766_v8 = vor.u32 %v6540_v0, %v4763_v1  ;;  %v4739_v9 = vld [vmem:[%s10384_s1 + $0x90] sm:$0xf0] }
  0x20   :  { %228 = vmatpush.bf16.msra.mxu0 %v4546_v31  ;;  %v4745_v10 = vld [vmem:[%s10384_s1 + $0x88] sm:$0xf]  ;;  %v6538_v11 = vld [vmem:[%s10384_s1 + $0x94] sm:$0xf0]  ;;  %v6536_v12 = vld [vmem:[%s10384_s1 + $0x8c] sm:$0xf]  ;;  %v4738_v14 = vor.u32 %v6537_v6, %v4737_v5  ;;  %v4742_v15 = vor.u32 %v6535_v7, %v4739_v9 }
  0x21   :  { %241 = vmatpush.bf16.msra.mxu1 %v4550_v35  ;;  %254 = vmatpush.bf16.msra.mxu2 %v4554_v36  ;;  %v4747_v13 = vld [vmem:[%s10384_s1 + $0x98] sm:$0xf0]  ;;  %v4746_v16 = vor.u32 %v6538_v11, %v4745_v10  ;;  %v4721_v17 = vld [vmem:[%s10384_s1 + $0x60] sm:$0xf]  ;;  %v6533_v18 = vld [vmem:[%s10384_s1 + $0x6c] sm:$0xf0] }
  0x22   :  { %267 = vmatpush.bf16.msra.mxu3 %v4558_v40  ;;  %v6531_v19 = vld [vmem:[%s10384_s1 + $0x64] sm:$0xf]  ;;  %v4750_v20 = vor.u32 %v6536_v12, %v4747_v13  ;;  %v4723_v21 = vld [vmem:[%s10384_s1 + $0x70] sm:$0xf0]  ;;  %v4729_v22 = vld [vmem:[%s10384_s1 + $0x68] sm:$0xf]  ;;  %v4722_v26 = vor.u32 %v6533_v18, %v4721_v17 }
  0x23   :  { %229 = vmatmul.bf16.vlgmr.msra.gmra.mxu0 %v18_v51  ;;  %v6534_v23 = vld [vmem:[%s10384_s1 + $0x74] sm:$0xf0]  ;;  %v6532_v24 = vld [vmem:[%s10384_s1 + $0x6c] sm:$0xf]  ;;  %v4731_v25 = vld [vmem:[%s10384_s1 + $0x78] sm:$0xf0]  ;;  %v4726_v27 = vor.u32 %v6531_v19, %v4723_v21 }
  0x24   :  { %492 = vmatpush.bf16.msrb.mxu0 %v4786_v41  ;;  %255 = vmatmul.bf16.vlgmr.msra.gmra.mxu2 %v18_v51  ;;  %v4730_v28 = vor.u32 %v6534_v23, %v4729_v22  ;;  %v4705_v29 = vld [vmem:[%s10384_s1 + $0x40] sm:$0xf]  ;;  %v6529_v30 = vld [vmem:[%s10384_s1 + $0x4c] sm:$0xf0]  ;;  %v6527_v31 = vld [vmem:[%s10384_s1 + $0x44] sm:$0xf]  ;;  %v4734_v32 = vor.u32 %v6532_v24, %v4731_v25 }
  0x25   :  { %505 = vmatpush.bf16.msrb.mxu1 %v4790_v42  ;;  %518 = vmatpush.bf16.msrb.mxu2 %v4794_v43  ;;  %v4707_v33 = vld [vmem:[%s10384_s1 + $0x50] sm:$0xf0]  ;;  %v4713_v34 = vld [vmem:[%s10384_s1 + $0x48] sm:$0xf]  ;;  %v6530_v35 = vld [vmem:[%s10384_s1 + $0x54] sm:$0xf0]  ;;  %v4706_v38 = vor.u32 %v6529_v30, %v4705_v29 }
  0x26   :  { %531 = vmatpush.bf16.msrb.mxu3 %v4798_v47  ;;  %242 = vmatmul.bf16.vlgmr.msra.gmra.mxu1 %v18_v51  ;;  %v6528_v36 = vld [vmem:[%s10384_s1 + $0x4c] sm:$0xf]  ;;  %v4715_v37 = vld [vmem:[%s10384_s1 + $0x58] sm:$0xf0]  ;;  %v4710_v39 = vor.u32 %v6527_v31, %v4707_v33  ;;  %v4714_v40 = vor.u32 %v6530_v35, %v4713_v34  ;;  %v4689_v41 = vld [vmem:[%s10384_s1 + $0x20] sm:$0xf] }
  0x27   :  { %268 = vmatmul.bf16.vlgmr.msra.gmra.mxu3 %v18_v51  ;;  %v6525_v42 = vld [vmem:[%s10384_s1 + $0x2c] sm:$0xf0]  ;;  %v6523_v43 = vld [vmem:[%s10384_s1 + $0x24] sm:$0xf]  ;;  %v4718_v44 = vor.u32 %v6528_v36, %v4715_v37  ;;  %v4691_v45 = vld [vmem:[%s10384_s1 + $0x30] sm:$0xf0] }
  0x28   :  { %493 = vmatpush.bf16.msrb.mxu0 %v4770_v54  ;;  %v4697_v46 = vld [vmem:[%s10384_s1 + $0x28] sm:$0xf]  ;;  %v6526_v47 = vld [vmem:[%s10384_s1 + $0x34] sm:$0xf0]  ;;  %v6524_v48 = vld [vmem:[%s10384_s1 + $0x2c] sm:$0xf]  ;;  %v4690_v50 = vor.u32 %v6525_v42, %v4689_v41  ;;  %v4694_v53 = vor.u32 %v6523_v43, %v4691_v45 }
  0x29   :  { %506 = vmatpush.bf16.msrb.mxu1 %v4774_v55  ;;  %519 = vmatpush.bf16.msrb.mxu2 %v4778_v56  ;;  %v4699_v49 = vld [vmem:[%s10384_s1 + $0x38] sm:$0xf0]  ;;  %v4673_v51 = vld [vmem:[%s10384_s1] sm:$0xf]  ;;  %v6521_v52 = vld [vmem:[%s10384_s1 + $0xc] sm:$0xf0]  ;;  %v4698_v54 = vor.u32 %v6526_v47, %v4697_v46 }
  0x2a   :  { %532 = vmatpush.bf16.msrb.mxu3 %v4782_v60  ;;  %v6519_v55 = vld [vmem:[%s10384_s1 + $0x4] sm:$0xf]  ;;  %v4675_v56 = vld [vmem:[%s10384_s1 + $0x10] sm:$0xf0]  ;;  %v4681_v57 = vld [vmem:[%s10384_s1 + $0x8] sm:$0xf]  ;;  %v4702_v58 = vor.u32 %v6524_v48, %v4699_v49  ;;  %v4674_v1 = vor.u32 %v6521_v52, %v4673_v51 }
  0x2b   :  { %v6522_v59 = vld [vmem:[%s10384_s1 + $0x14] sm:$0xf0]  ;;  %v6520_v60 = vld [vmem:[%s10384_s1 + $0xc] sm:$0xf]  ;;  %v4683_v61 = vld [vmem:[%s10384_s1 + $0x18] sm:$0xf0]  ;;  %v4678_v5 = vor.u32 %v6519_v55, %v4675_v56 }
  0x2c   :  { %494 = vmatpush.bf16.msrb.mxu0 %v4754_v2  ;;  %v4913_v62 = vld [vmem:[%s10384_s1 + $0xe0] sm:$0xf]  ;;  %v6581_v63 = vld [vmem:[%s10384_s1 + $0xec] sm:$0xf0]  ;;  %v6579_v0 = vld [vmem:[%s10384_s1 + $0xe4] sm:$0xf]  ;;  %v4682_v6 = vor.u32 %v6522_v59, %v4681_v57  ;;  %v4686_v9 = vor.u32 %v6520_v60, %v4683_v61 }
  0x2d   :  { %507 = vmatpush.bf16.msrb.mxu1 %v4758_v3  ;;  %520 = vmatpush.bf16.msrb.mxu2 %v4762_v4  ;;  %v4915_v2 = vld [vmem:[%s10384_s1 + $0xf0] sm:$0xf0]  ;;  %v4921_v3 = vld [vmem:[%s10384_s1 + $0xe8] sm:$0xf]  ;;  %v6582_v4 = vld [vmem:[%s10384_s1 + $0xf4] sm:$0xf0]  ;;  %v4914_v10 = vor.u32 %v6581_v63, %v4913_v62 }
  0x2e   :  { %533 = vmatpush.bf16.msrb.mxu3 %v4766_v8  ;;  %v6580_v7 = vld [vmem:[%s10384_s1 + $0xec] sm:$0xf]  ;;  %v4923_v8 = vld [vmem:[%s10384_s1 + $0xf8] sm:$0xf0]  ;;  %v288_v11 = vld [vmem:[%s10385_s0 + $0x2] sm:$0x3]  ;;  %v4918_v12 = vor.u32 %v6579_v0, %v4915_v2  ;;  %v4922_v13 = vor.u32 %v6582_v4, %v4921_v3 }
  0x2f   :  { %v4926_v17 = vor.u32 %v6580_v7, %v4923_v8  ;;  %v4899_v18 = vld [vmem:[%s10384_s1 + $0xd0] sm:$0xf0]  ;;  %v4905_v19 = vld [vmem:[%s10384_s1 + $0xc8] sm:$0xf]  ;;  %v289_v21 = vpack.c.bf16 %v288_v11, %v288_v11  ;;  %v6576_v22 = vld [vmem:[%s10384_s1 + $0xcc] sm:$0xf] }
  0x30   :  { %495 = vmatpush.bf16.msrb.mxu0 %v4738_v14  ;;  %v4897_v14 = vld [vmem:[%s10384_s1 + $0xc0] sm:$0xf]  ;;  %v4907_v23 = vld [vmem:[%s10384_s1 + $0xd8] sm:$0xf0]  ;;  %v6571_v29 = vld [vmem:[%s10384_s1 + $0xa4] sm:$0xf] }
  0x31   :  { %508 = vmatpush.bf16.msrb.mxu1 %v4742_v15  ;;  %521 = vmatpush.bf16.msrb.mxu2 %v4746_v16  ;;  %v6577_v15 = vld [vmem:[%s10384_s1 + $0xcc] sm:$0xf0]  ;;  %v6575_v16 = vld [vmem:[%s10384_s1 + $0xc4] sm:$0xf]  ;;  %v4910_v30 = vor.u32 %v6576_v22, %v4907_v23  ;;  %v4883_v31 = vld [vmem:[%s10384_s1 + $0xb0] sm:$0xf0] }
  0x32   :  { %534 = vmatpush.bf16.msrb.mxu3 %v4750_v20  ;;  %v6578_v20 = vld [vmem:[%s10384_s1 + $0xd4] sm:$0xf0]  ;;  %v4898_v24 = vor.u32 %v6577_v15, %v4897_v14  ;;  %v4902_v25 = vor.u32 %v6575_v16, %v4899_v18  ;;  %v6572_v34 = vld [vmem:[%s10384_s1 + $0xac] sm:$0xf]  ;;  %v4891_v35 = vld [vmem:[%s10384_s1 + $0xb8] sm:$0xf0]  ;;  %v4886_v37 = vor.u32 %v6571_v29, %v4883_v31 }
  0x33   :  { %v6574_v33 = vld [vmem:[%s10384_s1 + $0xb4] sm:$0xf0]  ;;  %v6567_v41 = vld [vmem:[%s10384_s1 + $0x84] sm:$0xf]  ;;  %v4894_v42 = vor.u32 %v6572_v34, %v4891_v35  ;;  %v4867_v43 = vld [vmem:[%s10384_s1 + $0x90] sm:$0xf0] }
  0x34   :  { %496 = vmatpush.bf16.msrb.mxu0 %v4722_v26  ;;  %v4906_v26 = vor.u32 %v6578_v20, %v4905_v19  ;;  %v6570_v45 = vld [vmem:[%s10384_s1 + $0x94] sm:$0xf0]  ;;  %v6568_v46 = vld [vmem:[%s10384_s1 + $0x8c] sm:$0xf]  ;;  %v4875_v47 = vld [vmem:[%s10384_s1 + $0x98] sm:$0xf0]  ;;  %v4870_v49 = vor.u32 %v6567_v41, %v4867_v43 }
  0x35   :  { %509 = vmatpush.bf16.msrb.mxu1 %v4726_v27  ;;  %522 = vmatpush.bf16.msrb.mxu2 %v4730_v28  ;;  %v4881_v27 = vld [vmem:[%s10384_s1 + $0xa0] sm:$0xf]  ;;  %v6573_v28 = vld [vmem:[%s10384_s1 + $0xac] sm:$0xf0]  ;;  %v4851_v55 = vld [vmem:[%s10384_s1 + $0x70] sm:$0xf0] }
  0x36   :  { %535 = vmatpush.bf16.msrb.mxu3 %v4734_v32  ;;  %v4889_v32 = vld [vmem:[%s10384_s1 + $0xa8] sm:$0xf]  ;;  %v4882_v36 = vor.u32 %v6573_v28, %v4881_v27  ;;  %v4849_v51 = vld [vmem:[%s10384_s1 + $0x60] sm:$0xf]  ;;  %v6565_v52 = vld [vmem:[%s10384_s1 + $0x6c] sm:$0xf0] }
  0x37   :  { %v4857_v56 = vld [vmem:[%s10384_s1 + $0x68] sm:$0xf]  ;;  %v6566_v57 = vld [vmem:[%s10384_s1 + $0x74] sm:$0xf0]  ;;  %v4859_v59 = vld [vmem:[%s10384_s1 + $0x78] sm:$0xf0]  ;;  %v4850_v60 = vor.u32 %v6565_v52, %v4849_v51 }
  0x38   :  { %497 = vmatpush.bf16.msrb.mxu0 %v4706_v38  ;;  %v4890_v38 = vor.u32 %v6574_v33, %v4889_v32  ;;  %v4858_v62 = vor.u32 %v6566_v57, %v4857_v56  ;;  %v4833_v63 = vld [vmem:[%s10384_s1 + $0x40] sm:$0xf]  ;;  %v6561_v0 = vld [vmem:[%s10384_s1 + $0x4c] sm:$0xf0]  ;;  %v4835_v3 = vld [vmem:[%s10384_s1 + $0x50] sm:$0xf0] }
  0x39   :  { %510 = vmatpush.bf16.msrb.mxu1 %v4710_v39  ;;  %523 = vmatpush.bf16.msrb.mxu2 %v4714_v40  ;;  %v4865_v39 = vld [vmem:[%s10384_s1 + $0x80] sm:$0xf]  ;;  %v6569_v40 = vld [vmem:[%s10384_s1 + $0x8c] sm:$0xf0]  ;;  %v4841_v4 = vld [vmem:[%s10384_s1 + $0x48] sm:$0xf]  ;;  %v4834_v8 = vor.u32 %v6561_v0, %v4833_v63 }
  0x3a   :  { %536 = vmatpush.bf16.msrb.mxu3 %v4718_v44  ;;  %v4873_v44 = vld [vmem:[%s10384_s1 + $0x88] sm:$0xf]  ;;  %v4866_v48 = vor.u32 %v6569_v40, %v4865_v39  ;;  %v4843_v7 = vld [vmem:[%s10384_s1 + $0x58] sm:$0xf0]  ;;  %v4817_v11 = vld [vmem:[%s10384_s1 + $0x20] sm:$0xf] }
  0x3b   :  { %v4819_v15 = vld [vmem:[%s10384_s1 + $0x30] sm:$0xf0]  ;;  %v4825_v16 = vld [vmem:[%s10384_s1 + $0x28] sm:$0xf]  ;;  %v6556_v18 = vld [vmem:[%s10384_s1 + $0x2c] sm:$0xf] }
  0x3c   :  { %498 = vmatpush.bf16.msrb.mxu0 %v4690_v50  ;;  %v4874_v50 = vor.u32 %v6570_v45, %v4873_v44  ;;  %v4827_v19 = vld [vmem:[%s10384_s1 + $0x38] sm:$0xf0]  ;;  %v6553_v22 = vld [vmem:[%s10384_s1 + $0xc] sm:$0xf0]  ;;  %v4809_v27 = vld [vmem:[%s10384_s1 + $0x8] sm:$0xf] }
  0x3d   :  { %511 = vmatpush.bf16.msrb.mxu1 %v4694_v53  ;;  %524 = vmatpush.bf16.msrb.mxu2 %v4698_v54  ;;  %v6563_v53 = vld [vmem:[%s10384_s1 + $0x64] sm:$0xf]  ;;  %v4878_v54 = vor.u32 %v6568_v46, %v4875_v47  ;;  %v4830_v28 = vor.u32 %v6556_v18, %v4827_v19  ;;  %v6554_v29 = vld [vmem:[%s10384_s1 + $0x14] sm:$0xf0]  ;;  %v4811_v31 = vld [vmem:[%s10384_s1 + $0x18] sm:$0xf0] }
  0x3e   :  { %537 = vmatpush.bf16.msrb.mxu3 %v4702_v58  ;;  %v6564_v58 = vld [vmem:[%s10384_s1 + $0x6c] sm:$0xf]  ;;  %v4854_v61 = vor.u32 %v6563_v53, %v4851_v55  ;;  %v5041_v32 = vld [vmem:[%s10384_s1 + $0xe0] sm:$0xf]  ;;  %v6613_v33 = vld [vmem:[%s10384_s1 + $0xec] sm:$0xf0]  ;;  %v4810_v40 = vor.u32 %v6554_v29, %v4809_v27 }
  0x3f   :  { %v4862_v2 = vor.u32 %v6564_v58, %v4859_v59  ;;  %v6611_v34 = vld [vmem:[%s10384_s1 + $0xe4] sm:$0xf]  ;;  %v6612_v41 = vld [vmem:[%s10384_s1 + $0xec] sm:$0xf]  ;;  %v5042_v45 = vor.u32 %v6613_v33, %v5041_v32  ;;  %v5027_v52 = vld [vmem:[%s10384_s1 + $0xd0] sm:$0xf0] }
  0x40   :  { %499 = vmatpush.bf16.msrb.mxu0 %v4674_v1  ;;  %v6559_v1 = vld [vmem:[%s10384_s1 + $0x44] sm:$0xf]  ;;  %v5033_v53 = vld [vmem:[%s10384_s1 + $0xc8] sm:$0xf]  ;;  %v6608_v56 = vld [vmem:[%s10384_s1 + $0xcc] sm:$0xf] }
  0x41   :  { %512 = vmatpush.bf16.msrb.mxu1 %v4678_v5  ;;  %525 = vmatpush.bf16.msrb.mxu2 %v4682_v6  ;;  %v6562_v5 = vld [vmem:[%s10384_s1 + $0x54] sm:$0xf0]  ;;  %v6560_v6 = vld [vmem:[%s10384_s1 + $0x4c] sm:$0xf]  ;;  %v556_v43 = vld [vmem:[%s10385_s0 + $0x4] sm:$0x3] }
  0x42   :  { %538 = vmatpush.bf16.msrb.mxu3 %v4686_v9  ;;  %v4838_v9 = vor.u32 %v6559_v1, %v4835_v3  ;;  %v4846_v14 = vor.u32 %v6560_v6, %v4843_v7  ;;  %v557_v55 = vpack.c.bf16 %v556_v43, %v556_v43  ;;  %v5035_v57 = vld [vmem:[%s10384_s1 + $0xd8] sm:$0xf0]  ;;  %v6603_v63 = vld [vmem:[%s10384_s1 + $0xa4] sm:$0xf]  ;;  %v5011_v1 = vld [vmem:[%s10384_s1 + $0xb0] sm:$0xf0] }
  0x43   :  { %500 = vmatmul.bf16.vlgmr.msrb.gmra.mxu0 %v289_v21  ;;  %v5038_v0 = vor.u32 %v6608_v56, %v5035_v57  ;;  %v6606_v3 = vld [vmem:[%s10384_s1 + $0xb4] sm:$0xf0]  ;;  %v5014_v7 = vor.u32 %v6603_v63, %v5011_v1  ;;  %v4987_v29 = vld [vmem:[%s10384_s1 + $0x78] sm:$0xf0]  ;;  %v4961_v33 = vld [vmem:[%s10384_s1 + $0x40] sm:$0xf] }
  0x44   :  { %760 = vmatpush.bf16.msra.mxu0 %v4914_v10  ;;  %526 = vmatmul.bf16.vlgmr.msrb.gmra.mxu2 %v289_v21  ;;  %v4842_v10 = vor.u32 %v6562_v5, %v4841_v4  ;;  %v6604_v4 = vld [vmem:[%s10384_s1 + $0xac] sm:$0xf]  ;;  %v5019_v5 = vld [vmem:[%s10384_s1 + $0xb8] sm:$0xf0]  ;;  %v6598_v27 = vld [vmem:[%s10384_s1 + $0x74] sm:$0xf0] }
  0x45   :  { %773 = vmatpush.bf16.msra.mxu1 %v4918_v12  ;;  %786 = vmatpush.bf16.msra.mxu2 %v4922_v13  ;;  %v6557_v12 = vld [vmem:[%s10384_s1 + $0x2c] sm:$0xf0]  ;;  %v6555_v13 = vld [vmem:[%s10384_s1 + $0x24] sm:$0xf]  ;;  %v6586_v63 = vld [vmem:[%s10384_s1 + $0x14] sm:$0xf0] }
  0x46   :  { %799 = vmatpush.bf16.msra.mxu3 %v4926_v17  ;;  %513 = vmatmul.bf16.vlgmr.msrb.gmra.mxu1 %v289_v21  ;;  %v6558_v17 = vld [vmem:[%s10384_s1 + $0x34] sm:$0xf0]  ;;  %v4818_v20 = vor.u32 %v6557_v12, %v4817_v11  ;;  %v4822_v23 = vor.u32 %v6555_v13, %v4819_v15  ;;  %v6599_v11 = vld [vmem:[%s10384_s1 + $0x84] sm:$0xf]  ;;  %v5022_v12 = vor.u32 %v6604_v4, %v5019_v5  ;;  %v4995_v13 = vld [vmem:[%s10384_s1 + $0x90] sm:$0xf0] }
  0x47   :  { %539 = vmatmul.bf16.vlgmr.msrb.gmra.mxu3 %v289_v21  ;;  %v4801_v21 = vld [vmem:[%s10384_s1] sm:$0xf]  ;;  %v6602_v15 = vld [vmem:[%s10384_s1 + $0x94] sm:$0xf0]  ;;  %v4998_v19 = vor.u32 %v6599_v11, %v4995_v13  ;;  %v6585_v56 = vld [vmem:[%s10384_s1 + $0xc] sm:$0xf0] }
  0x48   :  { %761 = vmatpush.bf16.msra.mxu0 %v4898_v24  ;;  %v4826_v24 = vor.u32 %v6558_v17, %v4825_v16  ;;  %v4802_v35 = vor.u32 %v6553_v22, %v4801_v21  ;;  %v6600_v16 = vld [vmem:[%s10384_s1 + $0x8c] sm:$0xf]  ;;  %v5003_v17 = vld [vmem:[%s10384_s1 + $0x98] sm:$0xf0]  ;;  %v4977_v21 = vld [vmem:[%s10384_s1 + $0x60] sm:$0xf] }
  0x49   :  { %774 = vmatpush.bf16.msra.mxu1 %v4902_v25  ;;  %787 = vmatpush.bf16.msra.mxu2 %v4906_v26  ;;  %v6551_v25 = vld [vmem:[%s10384_s1 + $0x4] sm:$0xf]  ;;  %v4803_v26 = vld [vmem:[%s10384_s1 + $0x10] sm:$0xf0]  ;;  %v6597_v22 = vld [vmem:[%s10384_s1 + $0x6c] sm:$0xf0] }
  0x4a   :  { %800 = vmatpush.bf16.msra.mxu3 %v4910_v30  ;;  %v6552_v30 = vld [vmem:[%s10384_s1 + $0xc] sm:$0xf]  ;;  %v4806_v39 = vor.u32 %v6551_v25, %v4803_v26  ;;  %v4979_v25 = vld [vmem:[%s10384_s1 + $0x70] sm:$0xf0]  ;;  %v4985_v26 = vld [vmem:[%s10384_s1 + $0x68] sm:$0xf] }
  0x4b   :  { %v4814_v44 = vor.u32 %v6552_v30, %v4811_v31  ;;  %v4978_v30 = vor.u32 %v6597_v22, %v4977_v21  ;;  %v4986_v32 = vor.u32 %v6598_v27, %v4985_v26  ;;  %v4939_v1 = vld [vmem:[%s10384_s1 + $0x18] sm:$0xf0]  ;;  %v6643_v4 = vld [vmem:[%s10384_s1 + $0xe4] sm:$0xf]  ;;  %v6644_v11 = vld [vmem:[%s10384_s1 + $0xec] sm:$0xf] }
  0x4c   :  { %762 = vmatpush.bf16.msra.mxu0 %v4882_v36  ;;  %v5043_v36 = vld [vmem:[%s10384_s1 + $0xf0] sm:$0xf0]  ;;  %v824_v13 = vld [vmem:[%s10385_s0 + $0x6] sm:$0x3]  ;;  %v6640_v26 = vld [vmem:[%s10384_s1 + $0xcc] sm:$0xf] }
  0x4d   :  { %775 = vmatpush.bf16.msra.mxu1 %v4886_v37  ;;  %788 = vmatpush.bf16.msra.mxu2 %v4890_v38  ;;  %v5049_v37 = vld [vmem:[%s10384_s1 + $0xe8] sm:$0xf]  ;;  %v6614_v38 = vld [vmem:[%s10384_s1 + $0xf4] sm:$0xf0]  ;;  %v5046_v46 = vor.u32 %v6611_v34, %v5043_v36  ;;  %v6593_v34 = vld [vmem:[%s10384_s1 + $0x4c] sm:$0xf0] }
  0x4e   :  { %801 = vmatpush.bf16.msra.mxu3 %v4894_v42  ;;  %v5051_v42 = vld [vmem:[%s10384_s1 + $0xf8] sm:$0xf0]  ;;  %v5050_v47 = vor.u32 %v6614_v38, %v5049_v37  ;;  %v4963_v37 = vld [vmem:[%s10384_s1 + $0x50] sm:$0xf0]  ;;  %v4969_v38 = vld [vmem:[%s10384_s1 + $0x48] sm:$0xf] }
  0x4f   :  { %v5054_v51 = vor.u32 %v6612_v41, %v5051_v42  ;;  %v4971_v41 = vld [vmem:[%s10384_s1 + $0x58] sm:$0xf0]  ;;  %v4962_v42 = vor.u32 %v6593_v34, %v4961_v33  ;;  %v5155_v22 = vld [vmem:[%s10384_s1 + $0xd0] sm:$0xf0]  ;;  %v6635_v33 = vld [vmem:[%s10384_s1 + $0xa4] sm:$0xf] }
  0x50   :  { %763 = vmatpush.bf16.msra.mxu0 %v4866_v48  ;;  %v5025_v48 = vld [vmem:[%s10384_s1 + $0xc0] sm:$0xf]  ;;  %v5163_v27 = vld [vmem:[%s10384_s1 + $0xd8] sm:$0xf0] }
  0x51   :  { %776 = vmatpush.bf16.msra.mxu1 %v4870_v49  ;;  %789 = vmatpush.bf16.msra.mxu2 %v4874_v50  ;;  %v6609_v49 = vld [vmem:[%s10384_s1 + $0xcc] sm:$0xf0]  ;;  %v6607_v50 = vld [vmem:[%s10384_s1 + $0xc4] sm:$0xf]  ;;  %v5166_v34 = vor.u32 %v6640_v26, %v5163_v27 }
  0x52   :  { %802 = vmatpush.bf16.msra.mxu3 %v4878_v54  ;;  %v6610_v54 = vld [vmem:[%s10384_s1 + $0xd4] sm:$0xf0]  ;;  %v5026_v58 = vor.u32 %v6609_v49, %v5025_v48  ;;  %v5030_v59 = vor.u32 %v6607_v50, %v5027_v52  ;;  %v4947_v49 = vld [vmem:[%s10384_s1 + $0x30] sm:$0xf0]  ;;  %v4953_v50 = vld [vmem:[%s10384_s1 + $0x28] sm:$0xf] }
  0x53   :  { %v6588_v52 = vld [vmem:[%s10384_s1 + $0x2c] sm:$0xf]  ;;  %v6617_v26 = vld [vmem:[%s10384_s1 + $0xc] sm:$0xf0] }
  0x54   :  { %764 = vmatpush.bf16.msra.mxu0 %v4850_v60  ;;  %v5034_v60 = vor.u32 %v6610_v54, %v5033_v53  ;;  %v4955_v53 = vld [vmem:[%s10384_s1 + $0x38] sm:$0xf0] }
  0x55   :  { %777 = vmatpush.bf16.msra.mxu1 %v4854_v61  ;;  %790 = vmatpush.bf16.msra.mxu2 %v4858_v62  ;;  %v5009_v61 = vld [vmem:[%s10384_s1 + $0xa0] sm:$0xf]  ;;  %v6605_v62 = vld [vmem:[%s10384_s1 + $0xac] sm:$0xf0] }
  0x56   :  { %803 = vmatpush.bf16.msra.mxu3 %v4862_v2  ;;  %v5017_v2 = vld [vmem:[%s10384_s1 + $0xa8] sm:$0xf]  ;;  %v5010_v6 = vor.u32 %v6605_v62, %v5009_v61  ;;  %v4958_v62 = vor.u32 %v6588_v52, %v4955_v53 }
  0x57   :  { %v4937_v61 = vld [vmem:[%s10384_s1 + $0x8] sm:$0xf] }
  0x58   :  { %765 = vmatpush.bf16.msra.mxu0 %v4834_v8  ;;  %v5018_v8 = vor.u32 %v6606_v3, %v5017_v2  ;;  %v5169_v2 = vld [vmem:[%s10384_s1 + $0xe0] sm:$0xf]  ;;  %v6645_v3 = vld [vmem:[%s10384_s1 + $0xec] sm:$0xf0] }
  0x59   :  { %778 = vmatpush.bf16.msra.mxu1 %v4838_v9  ;;  %791 = vmatpush.bf16.msra.mxu2 %v4842_v10  ;;  %v4993_v9 = vld [vmem:[%s10384_s1 + $0x80] sm:$0xf]  ;;  %v6601_v10 = vld [vmem:[%s10384_s1 + $0x8c] sm:$0xf0] }
  0x5a   :  { %804 = vmatpush.bf16.msra.mxu3 %v4846_v14  ;;  %v5001_v14 = vld [vmem:[%s10384_s1 + $0x88] sm:$0xf]  ;;  %v4994_v18 = vor.u32 %v6601_v10, %v4993_v9  ;;  %v4938_v10 = vor.u32 %v6586_v63, %v4937_v61  ;;  %v6630_v61 = vld [vmem:[%s10384_s1 + $0x74] sm:$0xf0]  ;;  %v5115_v63 = vld [vmem:[%s10384_s1 + $0x78] sm:$0xf0] }
  0x5c   :  { %766 = vmatpush.bf16.msra.mxu0 %v4818_v20  ;;  %v5002_v20 = vor.u32 %v6602_v15, %v5001_v14  ;;  %v5170_v15 = vor.u32 %v6645_v3, %v5169_v2  ;;  %v5089_v3 = vld [vmem:[%s10384_s1 + $0x40] sm:$0xf] }
  0x5d   :  { %779 = vmatpush.bf16.msra.mxu1 %v4822_v23  ;;  %792 = vmatpush.bf16.msra.mxu2 %v4826_v24  ;;  %v6595_v23 = vld [vmem:[%s10384_s1 + $0x64] sm:$0xf]  ;;  %v5006_v24 = vor.u32 %v6600_v16, %v5003_v17 }
  0x5e   :  { %805 = vmatpush.bf16.msra.mxu3 %v4830_v28  ;;  %v6596_v28 = vld [vmem:[%s10384_s1 + $0x6c] sm:$0xf]  ;;  %v4982_v31 = vor.u32 %v6595_v23, %v4979_v25  ;;  %v5161_v23 = vld [vmem:[%s10384_s1 + $0xc8] sm:$0xf]  ;;  %v825_v25 = vpack.c.bf16 %v824_v13, %v824_v13 }
  0x5f   :  { %v4990_v36 = vor.u32 %v6596_v28, %v4987_v29 }
  0x60   :  { %767 = vmatpush.bf16.msra.mxu0 %v4802_v35  ;;  %v6591_v35 = vld [vmem:[%s10384_s1 + $0x44] sm:$0xf] }
  0x61   :  { %780 = vmatpush.bf16.msra.mxu1 %v4806_v39  ;;  %793 = vmatpush.bf16.msra.mxu2 %v4810_v40  ;;  %v6594_v39 = vld [vmem:[%s10384_s1 + $0x54] sm:$0xf0]  ;;  %v6592_v40 = vld [vmem:[%s10384_s1 + $0x4c] sm:$0xf]  ;;  %v4966_v43 = vor.u32 %v6591_v35, %v4963_v37  ;;  %v5139_v35 = vld [vmem:[%s10384_s1 + $0xb0] sm:$0xf0] }
  0x62   :  { %806 = vmatpush.bf16.msra.mxu3 %v4814_v44  ;;  %v4970_v44 = vor.u32 %v6594_v39, %v4969_v38  ;;  %v4974_v48 = vor.u32 %v6592_v40, %v4971_v41  ;;  %v6638_v37 = vld [vmem:[%s10384_s1 + $0xb4] sm:$0xf0]  ;;  %v6636_v38 = vld [vmem:[%s10384_s1 + $0xac] sm:$0xf]  ;;  %v5147_v39 = vld [vmem:[%s10384_s1 + $0xb8] sm:$0xf0]  ;;  %v5142_v41 = vor.u32 %v6635_v33, %v5139_v35 }
  0x63   :  { %768 = vmatmul.bf16.vlgmr.msra.gmra.mxu0 %v557_v55  ;;  %v6618_v33 = vld [vmem:[%s10384_s1 + $0x14] sm:$0xf0]  ;;  %v5067_v35 = vld [vmem:[%s10384_s1 + $0x18] sm:$0xf0] }
  0x64   :  { %1028 = vmatpush.bf16.msrb.mxu0 %v5042_v45  ;;  %794 = vmatmul.bf16.vlgmr.msra.gmra.mxu2 %v557_v55  ;;  %v4945_v45 = vld [vmem:[%s10384_s1 + $0x20] sm:$0xf] }
  0x65   :  { %1041 = vmatpush.bf16.msrb.mxu1 %v5046_v46  ;;  %1054 = vmatpush.bf16.msrb.mxu2 %v5050_v47  ;;  %v6589_v46 = vld [vmem:[%s10384_s1 + $0x2c] sm:$0xf0]  ;;  %v6587_v47 = vld [vmem:[%s10384_s1 + $0x24] sm:$0xf] }
  0x66   :  { %1067 = vmatpush.bf16.msrb.mxu3 %v5054_v51  ;;  %781 = vmatmul.bf16.vlgmr.msra.gmra.mxu1 %v557_v55  ;;  %v6590_v51 = vld [vmem:[%s10384_s1 + $0x34] sm:$0xf0]  ;;  %v4946_v54 = vor.u32 %v6589_v46, %v4945_v45  ;;  %v4950_v57 = vor.u32 %v6587_v47, %v4947_v49  ;;  %v6631_v45 = vld [vmem:[%s10384_s1 + $0x84] sm:$0xf]  ;;  %v5150_v46 = vor.u32 %v6636_v38, %v5147_v39  ;;  %v5123_v47 = vld [vmem:[%s10384_s1 + $0x90] sm:$0xf0] }
  0x67   :  { %807 = vmatmul.bf16.vlgmr.msra.gmra.mxu3 %v557_v55  ;;  %v4929_v55 = vld [vmem:[%s10384_s1] sm:$0xf]  ;;  %v6634_v49 = vld [vmem:[%s10384_s1 + $0x94] sm:$0xf0]  ;;  %v5126_v53 = vor.u32 %v6631_v45, %v5123_v47  ;;  %v6675_v38 = vld [vmem:[%s10384_s1 + $0xe4] sm:$0xf] }
  0x68   :  { %1029 = vmatpush.bf16.msrb.mxu0 %v5026_v58  ;;  %v4954_v58 = vor.u32 %v6590_v51, %v4953_v50  ;;  %v4930_v5 = vor.u32 %v6585_v56, %v4929_v55  ;;  %v6632_v50 = vld [vmem:[%s10384_s1 + $0x8c] sm:$0xf]  ;;  %v5131_v51 = vld [vmem:[%s10384_s1 + $0x98] sm:$0xf0]  ;;  %v5105_v55 = vld [vmem:[%s10384_s1 + $0x60] sm:$0xf] }
  0x69   :  { %1042 = vmatpush.bf16.msrb.mxu1 %v5030_v59  ;;  %1055 = vmatpush.bf16.msrb.mxu2 %v5034_v60  ;;  %v6583_v59 = vld [vmem:[%s10384_s1 + $0x4] sm:$0xf]  ;;  %v4931_v60 = vld [vmem:[%s10384_s1 + $0x10] sm:$0xf0]  ;;  %v6629_v56 = vld [vmem:[%s10384_s1 + $0x6c] sm:$0xf0] }
  0x6a   :  { %1068 = vmatpush.bf16.msrb.mxu3 %v5038_v0  ;;  %v6584_v0 = vld [vmem:[%s10384_s1 + $0xc] sm:$0xf]  ;;  %v4934_v9 = vor.u32 %v6583_v59, %v4931_v60  ;;  %v5107_v59 = vld [vmem:[%s10384_s1 + $0x70] sm:$0xf0]  ;;  %v5113_v60 = vld [vmem:[%s10384_s1 + $0x68] sm:$0xf] }
  0x6b   :  { %v4942_v14 = vor.u32 %v6584_v0, %v4939_v1  ;;  %v5106_v0 = vor.u32 %v6629_v56, %v5105_v55  ;;  %v5114_v2 = vor.u32 %v6630_v61, %v5113_v60  ;;  %v6676_v45 = vld [vmem:[%s10384_s1 + $0xec] sm:$0xf]  ;;  %v1092_v47 = vld [vmem:[%s10385_s0 + $0x8] sm:$0x3]  ;;  %v5283_v56 = vld [vmem:[%s10384_s1 + $0xd0] sm:$0xf0] }
  0x6c   :  { %1030 = vmatpush.bf16.msrb.mxu0 %v5010_v6  ;;  %v5171_v6 = vld [vmem:[%s10384_s1 + $0xf0] sm:$0xf0]  ;;  %v6672_v60 = vld [vmem:[%s10384_s1 + $0xcc] sm:$0xf]  ;;  %v5291_v61 = vld [vmem:[%s10384_s1 + $0xd8] sm:$0xf0] }
  0x6d   :  { %1043 = vmatpush.bf16.msrb.mxu1 %v5014_v7  ;;  %1056 = vmatpush.bf16.msrb.mxu2 %v5018_v8  ;;  %v5177_v7 = vld [vmem:[%s10384_s1 + $0xe8] sm:$0xf]  ;;  %v6646_v8 = vld [vmem:[%s10384_s1 + $0xf4] sm:$0xf0]  ;;  %v5174_v16 = vor.u32 %v6643_v4, %v5171_v6  ;;  %v6625_v4 = vld [vmem:[%s10384_s1 + $0x4c] sm:$0xf0] }
  0x6e   :  { %1069 = vmatpush.bf16.msrb.mxu3 %v5022_v12  ;;  %v5179_v12 = vld [vmem:[%s10384_s1 + $0xf8] sm:$0xf0]  ;;  %v5178_v17 = vor.u32 %v6646_v8, %v5177_v7  ;;  %v5091_v7 = vld [vmem:[%s10384_s1 + $0x50] sm:$0xf0]  ;;  %v5097_v8 = vld [vmem:[%s10384_s1 + $0x48] sm:$0xf] }
  0x6f   :  { %v5182_v21 = vor.u32 %v6644_v11, %v5179_v12  ;;  %v5099_v11 = vld [vmem:[%s10384_s1 + $0x58] sm:$0xf0]  ;;  %v5090_v12 = vor.u32 %v6625_v4, %v5089_v3  ;;  %v6667_v3 = vld [vmem:[%s10384_s1 + $0xa4] sm:$0xf]  ;;  %v5267_v4 = vld [vmem:[%s10384_s1 + $0xb0] sm:$0xf0] }
  0x70   :  { %1031 = vmatpush.bf16.msrb.mxu0 %v4994_v18  ;;  %v5153_v18 = vld [vmem:[%s10384_s1 + $0xc0] sm:$0xf] }
  0x71   :  { %1044 = vmatpush.bf16.msrb.mxu1 %v4998_v19  ;;  %1057 = vmatpush.bf16.msrb.mxu2 %v5002_v20  ;;  %v6641_v19 = vld [vmem:[%s10384_s1 + $0xcc] sm:$0xf0]  ;;  %v6639_v20 = vld [vmem:[%s10384_s1 + $0xc4] sm:$0xf] }
  0x72   :  { %1070 = vmatpush.bf16.msrb.mxu3 %v5006_v24  ;;  %v6642_v24 = vld [vmem:[%s10384_s1 + $0xd4] sm:$0xf0]  ;;  %v5154_v28 = vor.u32 %v6641_v19, %v5153_v18  ;;  %v5158_v29 = vor.u32 %v6639_v20, %v5155_v22  ;;  %v5075_v19 = vld [vmem:[%s10384_s1 + $0x30] sm:$0xf0]  ;;  %v5081_v20 = vld [vmem:[%s10384_s1 + $0x28] sm:$0xf] }
  0x73   :  { %v6620_v22 = vld [vmem:[%s10384_s1 + $0x2c] sm:$0xf] }
  0x74   :  { %1032 = vmatpush.bf16.msrb.mxu0 %v4978_v30  ;;  %v5162_v30 = vor.u32 %v6642_v24, %v5161_v23  ;;  %v5083_v23 = vld [vmem:[%s10384_s1 + $0x38] sm:$0xf0] }
  0x75   :  { %1045 = vmatpush.bf16.msrb.mxu1 %v4982_v31  ;;  %1058 = vmatpush.bf16.msrb.mxu2 %v4986_v32  ;;  %v5137_v31 = vld [vmem:[%s10384_s1 + $0xa0] sm:$0xf]  ;;  %v6637_v32 = vld [vmem:[%s10384_s1 + $0xac] sm:$0xf0] }
  0x76   :  { %1071 = vmatpush.bf16.msrb.mxu3 %v4990_v36  ;;  %v5145_v36 = vld [vmem:[%s10384_s1 + $0xa8] sm:$0xf]  ;;  %v5138_v40 = vor.u32 %v6637_v32, %v5137_v31  ;;  %v5086_v32 = vor.u32 %v6620_v22, %v5083_v23  ;;  %v6664_v22 = vld [vmem:[%s10384_s1 + $0x8c] sm:$0xf]  ;;  %v5259_v23 = vld [vmem:[%s10384_s1 + $0x98] sm:$0xf0] }
  0x77   :  { %v5065_v31 = vld [vmem:[%s10384_s1 + $0x8] sm:$0xf] }
  0x78   :  { %1033 = vmatpush.bf16.msrb.mxu0 %v4962_v42  ;;  %v5146_v42 = vor.u32 %v6638_v37, %v5145_v36  ;;  %v5297_v36 = vld [vmem:[%s10384_s1 + $0xe0] sm:$0xf]  ;;  %v6677_v37 = vld [vmem:[%s10384_s1 + $0xec] sm:$0xf0] }
  0x79   :  { %1046 = vmatpush.bf16.msrb.mxu1 %v4966_v43  ;;  %1059 = vmatpush.bf16.msrb.mxu2 %v4970_v44  ;;  %v5121_v43 = vld [vmem:[%s10384_s1 + $0x80] sm:$0xf]  ;;  %v6633_v44 = vld [vmem:[%s10384_s1 + $0x8c] sm:$0xf0] }
  0x7a   :  { %1072 = vmatpush.bf16.msrb.mxu3 %v4974_v48  ;;  %v5129_v48 = vld [vmem:[%s10384_s1 + $0x88] sm:$0xf]  ;;  %v5122_v52 = vor.u32 %v6633_v44, %v5121_v43  ;;  %v5066_v44 = vor.u32 %v6618_v33, %v5065_v31  ;;  %v5235_v31 = vld [vmem:[%s10384_s1 + $0x70] sm:$0xf0] }
  0x7c   :  { %1034 = vmatpush.bf16.msrb.mxu0 %v4946_v54  ;;  %v5130_v54 = vor.u32 %v6634_v49, %v5129_v48  ;;  %v5298_v49 = vor.u32 %v6677_v37, %v5297_v36  ;;  %v6662_v36 = vld [vmem:[%s10384_s1 + $0x74] sm:$0xf0] }
  0x7d   :  { %1047 = vmatpush.bf16.msrb.mxu1 %v4950_v57  ;;  %1060 = vmatpush.bf16.msrb.mxu2 %v4954_v58  ;;  %v6627_v57 = vld [vmem:[%s10384_s1 + $0x64] sm:$0xf]  ;;  %v5134_v58 = vor.u32 %v6632_v50, %v5131_v51 }
  0x7e   :  { %1073 = vmatpush.bf16.msrb.mxu3 %v4958_v62  ;;  %v6628_v62 = vld [vmem:[%s10384_s1 + $0x6c] sm:$0xf]  ;;  %v5110_v1 = vor.u32 %v6627_v57, %v5107_v59  ;;  %v5289_v57 = vld [vmem:[%s10384_s1 + $0xc8] sm:$0xf]  ;;  %v1093_v59 = vpack.c.bf16 %v1092_v47, %v1092_v47 }
  0x7f   :  { %v5118_v6 = vor.u32 %v6628_v62, %v5115_v63  ;;  %v5265_v63 = vld [vmem:[%s10384_s1 + $0xa0] sm:$0xf] }
  0x80   :  { %1035 = vmatpush.bf16.msrb.mxu0 %v4930_v5  ;;  %v6623_v5 = vld [vmem:[%s10384_s1 + $0x44] sm:$0xf] }
  0x81   :  { %1048 = vmatpush.bf16.msrb.mxu1 %v4934_v9  ;;  %1061 = vmatpush.bf16.msrb.mxu2 %v4938_v10  ;;  %v6626_v9 = vld [vmem:[%s10384_s1 + $0x54] sm:$0xf0]  ;;  %v6624_v10 = vld [vmem:[%s10384_s1 + $0x4c] sm:$0xf]  ;;  %v5094_v13 = vor.u32 %v6623_v5, %v5091_v7  ;;  %v5294_v5 = vor.u32 %v6672_v60, %v5291_v61 }
  0x82   :  { %1074 = vmatpush.bf16.msrb.mxu3 %v4942_v14  ;;  %v5098_v14 = vor.u32 %v6626_v9, %v5097_v8  ;;  %v5102_v18 = vor.u32 %v6624_v10, %v5099_v11  ;;  %v6670_v7 = vld [vmem:[%s10384_s1 + $0xb4] sm:$0xf0]  ;;  %v8164_v8 = vld [vmem:[%s10386_s3] sm:$0xf]  ;;  %v6668_v9 = vld [vmem:[%s10384_s1 + $0xac] sm:$0xf] }
  0x83   :  { %1036 = vmatmul.bf16.vlgmr.msrb.gmra.mxu0 %v825_v25  ;;  %v5275_v10 = vld [vmem:[%s10384_s1 + $0xb8] sm:$0xf0]  ;;  %v53_v33 = vperm.slane %v8164_v8, 0  ;;  %v55_v37 = vperm.slane %v8164_v8, 2 }
  0x84   :  { %1296 = vmatpush.bf16.msra.mxu0 %v5170_v15  ;;  %1062 = vmatmul.bf16.vlgmr.msrb.gmra.mxu2 %v825_v25  ;;  %v5073_v15 = vld [vmem:[%s10384_s1 + $0x20] sm:$0xf] }
  0x85   :  { %1309 = vmatpush.bf16.msra.mxu1 %v5174_v16  ;;  %1322 = vmatpush.bf16.msra.mxu2 %v5178_v17  ;;  %v6621_v16 = vld [vmem:[%s10384_s1 + $0x2c] sm:$0xf0]  ;;  %v6619_v17 = vld [vmem:[%s10384_s1 + $0x24] sm:$0xf] }
  0x86   :  { %1335 = vmatpush.bf16.msra.mxu3 %v5182_v21  ;;  %1049 = vmatmul.bf16.vlgmr.msrb.gmra.mxu1 %v825_v25  ;;  %v6622_v21 = vld [vmem:[%s10384_s1 + $0x34] sm:$0xf0]  ;;  %v5074_v24 = vor.u32 %v6621_v16, %v5073_v15  ;;  %v5078_v27 = vor.u32 %v6619_v17, %v5075_v19  ;;  %v6665_v15 = vld [vmem:[%s10384_s1 + $0x8c] sm:$0xf0]  ;;  %v6663_v16 = vld [vmem:[%s10384_s1 + $0x84] sm:$0xf] }
  0x87   :  { %1075 = vmatmul.bf16.vlgmr.msrb.gmra.mxu3 %v825_v25  ;;  %v5057_v25 = vld [vmem:[%s10384_s1] sm:$0xf]  ;;  %v54_v17 = vperm.slane %v8164_v8, 1  ;;  %v5251_v19 = vld [vmem:[%s10384_s1 + $0x90] sm:$0xf0] }
  0x88   :  { %1297 = vmatpush.bf16.msra.mxu0 %v5154_v28  ;;  %v5082_v28 = vor.u32 %v6622_v21, %v5081_v20  ;;  %v5058_v39 = vor.u32 %v6617_v26, %v5057_v25  ;;  %v5257_v20 = vld [vmem:[%s10384_s1 + $0x88] sm:$0xf]  ;;  %v6666_v21 = vld [vmem:[%s10384_s1 + $0x94] sm:$0xf0]  ;;  %v5233_v25 = vld [vmem:[%s10384_s1 + $0x60] sm:$0xf] }
  0x89   :  { %1310 = vmatpush.bf16.msra.mxu1 %v5158_v29  ;;  %1323 = vmatpush.bf16.msra.mxu2 %v5162_v30  ;;  %v6615_v29 = vld [vmem:[%s10384_s1 + $0x4] sm:$0xf]  ;;  %v5059_v30 = vld [vmem:[%s10384_s1 + $0x10] sm:$0xf0]  ;;  %v6661_v26 = vld [vmem:[%s10384_s1 + $0x6c] sm:$0xf0] }
  0x8a   :  { %1336 = vmatpush.bf16.msra.mxu3 %v5166_v34  ;;  %v6616_v34 = vld [vmem:[%s10384_s1 + $0xc] sm:$0xf]  ;;  %v5062_v43 = vor.u32 %v6615_v29, %v5059_v30  ;;  %v5258_v29 = vor.u32 %v6666_v21, %v5257_v20  ;;  %v6659_v30 = vld [vmem:[%s10384_s1 + $0x64] sm:$0xf]  ;;  %v5187_v20 = vld [vmem:[%s10384_s1 + $0x10] sm:$0xf0] }
  0x8b   :  { %v5070_v48 = vor.u32 %v6616_v34, %v5067_v35  ;;  %v5262_v34 = vor.u32 %v6664_v22, %v5259_v23  ;;  %v5241_v35 = vld [vmem:[%s10384_s1 + $0x68] sm:$0xf]  ;;  %v6650_v22 = vld [vmem:[%s10384_s1 + $0x14] sm:$0xf0] }
  0x8c   :  { %1298 = vmatpush.bf16.msra.mxu0 %v5138_v40  ;;  %v5299_v40 = vld [vmem:[%s10384_s1 + $0xf0] sm:$0xf0]  ;;  %v5193_v21 = vld [vmem:[%s10384_s1 + $0x8] sm:$0xf] }
  0x8d   :  { %1311 = vmatpush.bf16.msra.mxu1 %v5142_v41  ;;  %1324 = vmatpush.bf16.msra.mxu2 %v5146_v42  ;;  %v5305_v41 = vld [vmem:[%s10384_s1 + $0xe8] sm:$0xf]  ;;  %v6678_v42 = vld [vmem:[%s10384_s1 + $0xf4] sm:$0xf0]  ;;  %v5302_v50 = vor.u32 %v6675_v38, %v5299_v40  ;;  %v6660_v38 = vld [vmem:[%s10384_s1 + $0x6c] sm:$0xf] }
  0x8e   :  { %1337 = vmatpush.bf16.msra.mxu3 %v5150_v46  ;;  %v5307_v46 = vld [vmem:[%s10384_s1 + $0xf8] sm:$0xf0]  ;;  %v5306_v51 = vor.u32 %v6678_v42, %v5305_v41  ;;  %v56_v40 = vperm.slane %v8164_v8, 3  ;;  %v5234_v42 = vor.u32 %v6661_v26, %v5233_v25  ;;  %v5209_v8 = vld [vmem:[%s10384_s1 + $0x28] sm:$0xf] }
  0x8f   :  { %v5310_v55 = vor.u32 %v6676_v45, %v5307_v46  ;;  %v5238_v45 = vor.u32 %v6659_v30, %v5235_v31  ;;  %v5242_v46 = vor.u32 %v6662_v36, %v5241_v35  ;;  %v5195_v30 = vld [vmem:[%s10384_s1 + $0x18] sm:$0xf0]  ;;  %v5425_v31 = vld [vmem:[%s10384_s1 + $0xe0] sm:$0xf]  ;;  %v6707_v36 = vld [vmem:[%s10384_s1 + $0xe4] sm:$0xf] }
  0x90   :  { %1299 = vmatpush.bf16.msra.mxu0 %v5122_v52  ;;  %v5281_v52 = vld [vmem:[%s10384_s1 + $0xc0] sm:$0xf] }
  0x91   :  { %1312 = vmatpush.bf16.msra.mxu1 %v5126_v53  ;;  %1325 = vmatpush.bf16.msra.mxu2 %v5130_v54  ;;  %v6673_v53 = vld [vmem:[%s10384_s1 + $0xcc] sm:$0xf0]  ;;  %v6671_v54 = vld [vmem:[%s10384_s1 + $0xc4] sm:$0xf] }
  0x92   :  { %1338 = vmatpush.bf16.msra.mxu3 %v5134_v58  ;;  %v6674_v58 = vld [vmem:[%s10384_s1 + $0xd4] sm:$0xf0]  ;;  %v5282_v62 = vor.u32 %v6673_v53, %v5281_v52 }
  0x94   :  { %1300 = vmatpush.bf16.msra.mxu0 %v5106_v0  ;;  %v5286_v0 = vor.u32 %v6671_v54, %v5283_v56  ;;  %v6658_v56 = vld [vmem:[%s10384_s1 + $0x54] sm:$0xf0] }
  0x95   :  { %1313 = vmatpush.bf16.msra.mxu1 %v5110_v1  ;;  %1326 = vmatpush.bf16.msra.mxu2 %v5114_v2  ;;  %v5290_v1 = vor.u32 %v6674_v58, %v5289_v57  ;;  %v6669_v2 = vld [vmem:[%s10384_s1 + $0xac] sm:$0xf0]  ;;  %v6656_v58 = vld [vmem:[%s10384_s1 + $0x4c] sm:$0xf] }
  0x96   :  { %1339 = vmatpush.bf16.msra.mxu3 %v5118_v6  ;;  %v5273_v6 = vld [vmem:[%s10384_s1 + $0xa8] sm:$0xf]  ;;  %v5266_v11 = vor.u32 %v6669_v2, %v5265_v63  ;;  %v5201_v63 = vld [vmem:[%s10384_s1 + $0x20] sm:$0xf] }
  0x98   :  { %1301 = vmatpush.bf16.msra.mxu0 %v5090_v12  ;;  %v5249_v12 = vld [vmem:[%s10384_s1 + $0x80] sm:$0xf] }
  0x99   :  { %1314 = vmatpush.bf16.msra.mxu1 %v5094_v13  ;;  %1327 = vmatpush.bf16.msra.mxu2 %v5098_v14  ;;  %v5270_v13 = vor.u32 %v6667_v3, %v5267_v4  ;;  %v5274_v14 = vor.u32 %v6670_v7, %v5273_v6  ;;  %v5203_v6 = vld [vmem:[%s10384_s1 + $0x30] sm:$0xf0] }
  0x9a   :  { %1340 = vmatpush.bf16.msra.mxu3 %v5102_v18  ;;  %v5278_v18 = vor.u32 %v6668_v9, %v5275_v10  ;;  %v6654_v9 = vld [vmem:[%s10384_s1 + $0x34] sm:$0xf0]  ;;  %v6652_v10 = vld [vmem:[%s10384_s1 + $0x2c] sm:$0xf] }
  0x9b   :  { %v5210_v26 = vor.u32 %v6654_v9, %v5209_v8  ;;  %v6700_v8 = vld [vmem:[%s10384_s1 + $0xac] sm:$0xf]  ;;  %v5403_v9 = vld [vmem:[%s10384_s1 + $0xb8] sm:$0xf0] }
  0x9c   :  { %1302 = vmatpush.bf16.msra.mxu0 %v5074_v24  ;;  %v5250_v24 = vor.u32 %v6665_v15, %v5249_v12  ;;  %v5211_v12 = vld [vmem:[%s10384_s1 + $0x38] sm:$0xf0] }
  0x9d   :  { %1315 = vmatpush.bf16.msra.mxu1 %v5078_v27  ;;  %1328 = vmatpush.bf16.msra.mxu2 %v5082_v28  ;;  %v5254_v28 = vor.u32 %v6663_v16, %v5251_v19  ;;  %v6647_v19 = vld [vmem:[%s10384_s1 + $0x4] sm:$0xf] }
  0x9e   :  { %1341 = vmatpush.bf16.msra.mxu3 %v5086_v32 }
  0xa0   :  { %1303 = vmatpush.bf16.msra.mxu0 %v5058_v39  ;;  %v5243_v39 = vld [vmem:[%s10384_s1 + $0x78] sm:$0xf0]  ;;  %v230_v41 = vpop.f32.mrf.mxu0 }
  0xa1   :  { %1316 = vmatpush.bf16.msra.mxu1 %v5062_v43  ;;  %1329 = vmatpush.bf16.msra.mxu2 %v5066_v44  ;;  %v5217_v43 = vld [vmem:[%s10384_s1 + $0x40] sm:$0xf]  ;;  %v6657_v44 = vld [vmem:[%s10384_s1 + $0x4c] sm:$0xf0]  ;;  %v5246_v52 = vor.u32 %v6660_v38, %v5243_v39  ;;  %v5427_v38 = vld [vmem:[%s10384_s1 + $0xf0] sm:$0xf0] }
  0xa2   :  { %1342 = vmatpush.bf16.msra.mxu3 %v5070_v48  ;;  %v5218_v61 = vor.u32 %v6657_v44, %v5217_v43  ;;  %v5433_v39 = vld [vmem:[%s10384_s1 + $0xe8] sm:$0xf]  ;;  %v6708_v43 = vld [vmem:[%s10384_s1 + $0xec] sm:$0xf]  ;;  %v5435_v44 = vld [vmem:[%s10384_s1 + $0xf8] sm:$0xf0] }
  0xa3   :  { %1304 = vmatmul.bf16.vlgmr.msra.gmra.mxu0 %v1093_v59  ;;  %v243_v27 = vpop.f32.mrf.mxu1 }
  0xa4   :  { %1564 = vmatpush.bf16.msrb.mxu0 %v5298_v49  ;;  %1330 = vmatmul.bf16.vlgmr.msra.gmra.mxu2 %v1093_v59  ;;  %v244_v32 = vadd.f32 %v243_v27, %v54_v17  ;;  %v6655_v49 = vld [vmem:[%s10384_s1 + $0x44] sm:$0xf]  ;;  %v6648_v27 = vld [vmem:[%s10384_s1 + $0xc] sm:$0xf] }
  0xa5   :  { %1577 = vmatpush.bf16.msrb.mxu1 %v5302_v50  ;;  %1590 = vmatpush.bf16.msrb.mxu2 %v5306_v51  ;;  %v5219_v50 = vld [vmem:[%s10384_s1 + $0x50] sm:$0xf0]  ;;  %v231_v51 = vadd.f32 %v230_v41, %v53_v33  ;;  %v5190_v41 = vor.u32 %v6647_v19, %v5187_v20  ;;  %v8415_v19 = vld [vmem:[%s10384_s1 + $0x8c] sm:$0xf]  ;;  %v8420_v20 = vld [vmem:[%s10384_s1 + $0x98] sm:$0xf0] }
  0xa6   :  { %1603 = vmatpush.bf16.msrb.mxu3 %v5310_v55  ;;  %1317 = vmatmul.bf16.vlgmr.msra.gmra.mxu1 %v1093_v59  ;;  %v277_v47 = vrot.slane %v244_v32, 6  ;;  %v5225_v55 = vld [vmem:[%s10384_s1 + $0x48] sm:$0xf]  ;;  %v6709_v32 = vld [vmem:[%s10384_s1 + $0xec] sm:$0xf0] }
  0xa7   :  { %1343 = vmatmul.bf16.vlgmr.msra.gmra.mxu3 %v1093_v59  ;;  %v256_v48 = vpop.f32.mrf.mxu2  ;;  %v5227_v59 = vld [vmem:[%s10384_s1 + $0x58] sm:$0xf0]  ;;  %v5226_v3 = vor.u32 %v6658_v56, %v5225_v55  ;;  %v5417_v55 = vld [vmem:[%s10384_s1 + $0xc8] sm:$0xf]  ;;  %v6706_v56 = vld [vmem:[%s10384_s1 + $0xd4] sm:$0xf0] }
  0xa8   :  { %1565 = vmatpush.bf16.msrb.mxu0 %v5282_v62  ;;  %v257_v53 = vadd.f32 %v256_v48, %v55_v37  ;;  %v5222_v62 = vor.u32 %v6655_v49, %v5219_v50  ;;  %v281_v4 = vsel %vm280_vm0, %v231_v51, %v277_v47  ;;  %v5230_v7 = vor.u32 %v6656_v58, %v5227_v59  ;;  %v232_v15 = vpop.f32.mrf.mxu0  ;;  %v5409_v48 = vld [vmem:[%s10384_s1 + $0xc0] sm:$0xf]  ;;  %v6705_v51 = vld [vmem:[%s10384_s1 + $0xcc] sm:$0xf0] }
  0xa9   :  { %1578 = vmatpush.bf16.msrb.mxu1 %v5286_v0  ;;  %1591 = vmatpush.bf16.msrb.mxu2 %v5290_v1  ;;  %v6653_v0 = vld [vmem:[%s10384_s1 + $0x2c] sm:$0xf0]  ;;  %v5426_v47 = vor.u32 %v6709_v32, %v5425_v31  ;;  %v5430_v49 = vor.u32 %v6707_v36, %v5427_v38  ;;  %v8400_v15 = vld [vmem:[%s10384_s1 + $0x90] sm:$0xf0]  ;;  %v8455_v31 = vld [vmem:[%s10384_s1 + $0x68] sm:$0xf] }
  0xaa   :  { %1604 = vmatpush.bf16.msrb.mxu3 %v5294_v5  ;;  %v269_v54 = vpop.f32.mrf.mxu3  ;;  %v278_v60 = vrot.slane %v257_v53, 4  ;;  %v6651_v5 = vld [vmem:[%s10384_s1 + $0x24] sm:$0xf]  ;;  %v5202_v17 = vor.u32 %v6653_v0, %v5201_v63  ;;  %v5411_v53 = vld [vmem:[%s10384_s1 + $0xd0] sm:$0xf0]  ;;  %v5410_v0 = vor.u32 %v6705_v51, %v5409_v48 }
  0xab   :  { %v270_v57 = vadd.f32 %v269_v54, %v56_v40  ;;  %v245_v1 = vpop.f32.mrf.mxu1  ;;  %v6710_v40 = vld [vmem:[%s10384_s1 + $0xf4] sm:$0xf0]  ;;  %v5438_v54 = vor.u32 %v6708_v43, %v5435_v44  ;;  %v8468_v36 = vld [vmem:[%s10384_s1 + $0x6c] sm:$0xf] }
  0xac   :  { %1566 = vmatpush.bf16.msrb.mxu0 %v5266_v11  ;;  %v5434_v50 = vor.u32 %v6710_v40, %v5433_v39  ;;  %v6699_v1 = vld [vmem:[%s10384_s1 + $0xa4] sm:$0xf]  ;;  %v8460_v32 = vld [vmem:[%s10384_s1 + $0x74] sm:$0xf0]  ;;  %v5390_v40 = vor.u32 %v8415_v19, %v8420_v20 }
  0xad   :  { %1579 = vmatpush.bf16.msrb.mxu1 %v5270_v13  ;;  %1592 = vmatpush.bf16.msrb.mxu2 %v5274_v14  ;;  %v279_v2 = vrot.slane %v270_v57, 2  ;;  %v5185_v13 = vld [vmem:[%s10384_s1] sm:$0xf]  ;;  %v6649_v14 = vld [vmem:[%s10384_s1 + $0xc] sm:$0xf0]  ;;  %v5370_v44 = vor.u32 %v8460_v32, %v8455_v31 }
  0xae   :  { %1605 = vmatpush.bf16.msrb.mxu3 %v5278_v18  ;;  %v5206_v18 = vor.u32 %v6651_v5, %v5203_v6  ;;  %v5186_v37 = vor.u32 %v6649_v14, %v5185_v13  ;;  %v6704_v57 = vld [vmem:[%s10384_s1 + $0xcc] sm:$0xf]  ;;  %v5418_v6 = vor.u32 %v6706_v56, %v5417_v55  ;;  %v8390_v13 = vld [vmem:[%s10384_s1 + $0x8c] sm:$0xf0]  ;;  %v8395_v14 = vld [vmem:[%s10384_s1 + $0x84] sm:$0xf] }
  0xaf   :  { %v283_v11 = vsel %vm282_vm1, %v278_v60, %v279_v2  ;;  %v5419_v60 = vld [vmem:[%s10384_s1 + $0xd8] sm:$0xf0]  ;;  %v5395_v2 = vld [vmem:[%s10384_s1 + $0xb0] sm:$0xf0] }
  0xb0   :  { %1567 = vmatpush.bf16.msrb.mxu0 %v5250_v24  ;;  %v8281_v16 = vsel %vm284_vm2, %v281_v4, %v283_v11  ;;  %v5422_v11 = vor.u32 %v6704_v57, %v5419_v60 }
  0xb1   :  { %1580 = vmatpush.bf16.msrb.mxu1 %v5254_v28  ;;  %1593 = vmatpush.bf16.msrb.mxu2 %v5258_v29  ;;  %v5567_v23 = vmul.f32 -1.442695, %v8281_v16  ;;  %v2185_v24 = vrot.slane %v8281_v16, 2  ;;  %v2209_v25 = vrot.slane %v8281_v16, 6  ;;  %v258_v28 = vpop.f32.mrf.mxu2  ;;  %v5214_v29 = vor.u32 %v6652_v10, %v5211_v12  ;;  %v8385_v12 = vld [vmem:[%s10384_s1 + $0x80] sm:$0xf] }
  0xb2   :  { %1606 = vmatpush.bf16.msrb.mxu3 %v5262_v34  ;;  %v271_v33 = vpop.f32.mrf.mxu3  ;;  %v8449_v28 = vld [vmem:[%s10386_s3] sm:$0xf]  ;;  %v5378_v38 = vor.u32 %v8390_v13, %v8385_v12 }
  0xb3   :  { %6967 = vpow2.f32 %v5567_v23  ;;  %v5568_v34 = vmul.f32 -1.442695, %v2185_v24  ;;  %v5569_v35 = vmul.f32 -1.442695, %v2209_v25  ;;  %v8429_v23 = vld [vmem:[%s10384_s1 + $0x60] sm:$0xf] }
  0xb4   :  { %1568 = vmatpush.bf16.msrb.mxu0 %v5234_v42  ;;  %v5194_v42 = vor.u32 %v6650_v22, %v5193_v21  ;;  %v8434_v24 = vld [vmem:[%s10384_s1 + $0x6c] sm:$0xf0]  ;;  %v325_v33 = vperm.slane %v8449_v28, 1  ;;  %v326_v51 = vperm.slane %v8449_v28, 2  ;;  %v327_v56 = vperm.slane %v8449_v28, 3 }
  0xb5   :  { %1581 = vmatpush.bf16.msrb.mxu1 %v5238_v45  ;;  %1594 = vmatpush.bf16.msrb.mxu2 %v5242_v46  ;;  %6969 = vpow2.f32 %v5568_v34  ;;  %v1360_v45 = vld [vmem:[%s10385_s0 + $0xa] sm:$0x3]  ;;  %v5198_v46 = vor.u32 %v6648_v27, %v5195_v30  ;;  %v8444_v27 = vld [vmem:[%s10384_s1 + $0x70] sm:$0xf0]  ;;  %v2206_v34 = vrot.slane %v8281_v16, 4  ;;  %v5382_v16 = vor.u32 %v8395_v14, %v8400_v15 }
  0xb6   :  { %1607 = vmatpush.bf16.msrb.mxu3 %v5246_v52  ;;  %6971 = vpow2.f32 %v5569_v35  ;;  %v6703_v52 = vld [vmem:[%s10384_s1 + $0xc4] sm:$0xf]  ;;  %v1361_v58 = vpack.c.bf16 %v1360_v45, %v1360_v45  ;;  %v5406_v35 = vor.u32 %v6700_v8, %v5403_v9  ;;  %v5353_v8 = vld [vmem:[%s10384_s1 + $0x48] sm:$0xf]  ;;  %v6690_v9 = vld [vmem:[%s10384_s1 + $0x54] sm:$0xf0] }
  0xb7   :  { %v5414_v5 = vor.u32 %v6703_v52, %v5411_v53 }
  0xb8   :  { %1569 = vmatpush.bf16.msrb.mxu0 %v5218_v61  ;;  %v5393_v61 = vld [vmem:[%s10384_s1 + $0xa0] sm:$0xf] }
  0xb9   :  { %1582 = vmatpush.bf16.msrb.mxu1 %v5222_v62  ;;  %1595 = vmatpush.bf16.msrb.mxu2 %v5226_v3  ;;  %v6968_v59 = vpop.eup %6967  ;;  %v6701_v62 = vld [vmem:[%s10384_s1 + $0xac] sm:$0xf0]  ;;  %v5401_v3 = vld [vmem:[%s10384_s1 + $0xa8] sm:$0xf] }
  0xba   :  { %1608 = vmatpush.bf16.msrb.mxu3 %v5230_v7  ;;  %v8361_v63 = vadd.f32 1.0, %v6968_v59  ;;  %v6702_v7 = vld [vmem:[%s10384_s1 + $0xb4] sm:$0xf0]  ;;  %v5394_v25 = vor.u32 %v6701_v62, %v5393_v61  ;;  %v6689_v61 = vld [vmem:[%s10384_s1 + $0x4c] sm:$0xf0] }
  0xbb   :  { %v6970_v4 = vpop.eup %6969  ;;  %v5402_v30 = vor.u32 %v6702_v7, %v5401_v3  ;;  %v8519_v62 = vld [vmem:[%s10384_s1 + $0x44] sm:$0xf] }
  0xbc   :  { %1570 = vmatpush.bf16.msrb.mxu0 %v5202_v17  ;;  %v6972_v10 = vpop.eup %6971  ;;  %6973 = vrcp.f32 %v8361_v63  ;;  %v8405_v17 = vld [vmem:[%s10384_s1 + $0x88] sm:$0xf]  ;;  %v8422_v21 = vadd.f32 1.0, %v6970_v4  ;;  %vm2174_vm3 = vweird.f32 %v8361_v63  ;;  %v2178_v59 = vand.u32 2147483647, %v8361_v63 }
  0xbd   :  { %1583 = vmatpush.bf16.msrb.mxu1 %v5206_v18  ;;  %1596 = vmatpush.bf16.msrb.mxu2 %v5210_v26  ;;  %v8410_v18 = vld [vmem:[%s10384_s1 + $0x94] sm:$0xf0]  ;;  %v8424_v22 = vadd.f32 1.0, %v6972_v10  ;;  %v8439_v26 = vld [vmem:[%s10384_s1 + $0x64] sm:$0xf] }
  0xbe   :  { %1609 = vmatpush.bf16.msrb.mxu3 %v5214_v29  ;;  %6975 = vrcp.f32 %v8422_v21  ;;  %v5398_v29 = vor.u32 %v6699_v1, %v5395_v2  ;;  %v5386_v39 = vor.u32 %v8410_v18, %v8405_v17  ;;  %v5366_v43 = vor.u32 %v8439_v26, %v8444_v27  ;;  %v5347_v2 = vld [vmem:[%s10384_s1 + $0x50] sm:$0xf0]  ;;  %v6688_v17 = vld [vmem:[%s10384_s1 + $0x4c] sm:$0xf]  ;;  %v5355_v18 = vld [vmem:[%s10384_s1 + $0x58] sm:$0xf0] }
  0xbf   :  { %6977 = vrcp.f32 %v8424_v22  ;;  %vm2196_vm5 = vweird.f32 %v8422_v21  ;;  %v2200_v4 = vand.u32 2147483647, %v8422_v21  ;;  %vm8554_vm8 = vcmp.eq.f32.partialorder %v2178_v59, 8.507059e+37  ;;  %v6680_v59 = vld [vmem:[%s10384_s1 + $0xc] sm:$0xf] }
  0xc0   :  { %1571 = vmatpush.bf16.msrb.mxu0 %v5186_v37  ;;  %v8473_v37 = vld [vmem:[%s10384_s1 + $0x78] sm:$0xf0]  ;;  %6979 = vtanh.f32 %v2206_v34  ;;  %v501_v57 = vpop.f32.mrf.mxu0  ;;  %v6683_v34 = vld [vmem:[%s10384_s1 + $0x24] sm:$0xf]  ;;  %v5358_v27 = vor.u32 %v6688_v17, %v5355_v18  ;;  %vm2220_vm11 = vweird.f32 %v8424_v22  ;;  %v2226_v17 = vand.u32 2147483648, %v8424_v22 }
  0xc1   :  { %1584 = vmatpush.bf16.msrb.mxu1 %v5190_v41  ;;  %1597 = vmatpush.bf16.msrb.mxu2 %v5194_v42  ;;  %v5362_v42 = vor.u32 %v8434_v24, %v8429_v23  ;;  %v5374_v48 = vor.u32 %v8468_v36, %v8473_v37  ;;  %vm8593_vm10 = vcmp.eq.f32.partialorder %v2200_v4, 8.507059e+37  ;;  %v2224_v23 = vand.u32 2147483647, %v8424_v22  ;;  %v5547_v37 = vld [vmem:[%s10384_s1 + $0xd8] sm:$0xf0] }
  0xc2   :  { %1610 = vmatpush.bf16.msrb.mxu3 %v5198_v46  ;;  %v8483_v41 = vpop.eup %6973  ;;  %v324_v46 = vperm.slane %v8449_v28, 0  ;;  %v5329_v28 = vld [vmem:[%s10384_s1 + $0x20] sm:$0xf] }
  0xc3   :  { %1572 = vmatmul.bf16.vlgmr.msrb.gmra.mxu0 %v1361_v58  ;;  %v514_v45 = vpop.f32.mrf.mxu1  ;;  %vm2175_vm4 = vweird.f32 %v8483_v41  ;;  %vm8709_vm14 = vcmp.eq.f32.partialorder %v2224_v23, 8.507059e+37 }
  0xc4   :  { %1832 = vmatpush.bf16.msra.mxu0 %v5426_v47  ;;  %1598 = vmatmul.bf16.vlgmr.msrb.gmra.mxu2 %v1361_v58  ;;  %v2170_v47 = vmul.f32 %v8483_v41, %v8361_v63  ;;  %v8499_v52 = vpop.eup %6975  ;;  %vm8533_vm7 = vmor %vm2174_vm3, %vm2175_vm4 }
  0xc5   :  { %1845 = vmatpush.bf16.msra.mxu1 %v5430_v49  ;;  %1858 = vmatpush.bf16.msra.mxu2 %v5434_v50  ;;  %v515_v49 = vadd.f32 %v514_v45, %v325_v33  ;;  %v2180_v50 = vand.u32 2147483648, %v8361_v63  ;;  %v2192_v60 = vmul.f32 %v8499_v52, %v8422_v21  ;;  %vm2197_vm6 = vweird.f32 %v8499_v52 }
  0xc6   :  { %1871 = vmatpush.bf16.msra.mxu3 %v5438_v54  ;;  %1585 = vmatmul.bf16.vlgmr.msrb.gmra.mxu1 %v1361_v58  ;;  %v2171_v53 = vsub.f32 1.0, %v2170_v47  ;;  %v8505_v54 = vld [vmem:[%s10384_s1 + $0x40] sm:$0xf]  ;;  %v5354_v33 = vor.u32 %v6690_v9, %v5353_v8  ;;  %vm8582_vm9 = vmor %vm2196_vm5, %vm2197_vm6  ;;  %v6742_v9 = vld [vmem:[%s10384_s1 + $0xf4] sm:$0xf0] }
  0xc7   :  { %1611 = vmatmul.bf16.vlgmr.msrb.gmra.mxu3 %v1361_v58  ;;  %v548_v55 = vrot.slane %v515_v49, 6  ;;  %v8508_v58 = vpop.eup %6977  ;;  %v527_v3 = vpop.f32.mrf.mxu2  ;;  %v2193_v7 = vsub.f32 1.0, %v2192_v60  ;;  %v2181_v14 = vor.u32 1.1754944e-38, %v2180_v50  ;;  %v5346_v15 = vor.u32 %v6689_v61, %v8505_v54  ;;  %v6679_v49 = vld [vmem:[%s10384_s1 + $0x4] sm:$0xf] }
  0xc8   :  { %1833 = vmatpush.bf16.msra.mxu0 %v5410_v0  ;;  %v502_v0 = vadd.f32 %v501_v57, %v324_v46  ;;  %v2172_v1 = vmul.f32 %v8483_v41, %v2171_v53  ;;  %v528_v10 = vadd.f32 %v527_v3, %v326_v51  ;;  %v2216_v63 = vmul.f32 %v8508_v58, %v8424_v22  ;;  %v6980_v20 = vpop.eup %6979  ;;  %v503_v46 = vpop.f32.mrf.mxu0  ;;  %v5315_v50 = vld [vmem:[%s10384_s1 + $0x10] sm:$0xf0]  ;;  %v6682_v57 = vld [vmem:[%s10384_s1 + $0x14] sm:$0xf0]  ;;  %v6736_v22 = vld [vmem:[%s10384_s1 + $0xcc] sm:$0xf] }
  0xc9   :  { %1846 = vmatpush.bf16.msra.mxu1 %v5414_v5  ;;  %1859 = vmatpush.bf16.msra.mxu2 %v5418_v6  ;;  %v2202_v5 = vand.u32 2147483648, %v8422_v21  ;;  %v2194_v24 = vmul.f32 %v8499_v52, %v2193_v7  ;;  %v5555_v6 = vld [vmem:[%s10384_s1 + $0xf0] sm:$0xf0]  ;;  %v5561_v7 = vld [vmem:[%s10384_s1 + $0xe8] sm:$0xf]  ;;  %vm2221_vm12 = vweird.f32 %v8508_v58 }
  0xca   :  { %1872 = vmatpush.bf16.msra.mxu3 %v5422_v11  ;;  %v540_v11 = vpop.f32.mrf.mxu3  ;;  %v551_v12 = vsel %vm280_vm0, %v502_v0, %v548_v55  ;;  %v2173_v13 = vadd.f32 %v8483_v41, %v2172_v1  ;;  %v2217_v21 = vsub.f32 1.0, %v2216_v63  ;;  %v5323_v0 = vld [vmem:[%s10384_s1 + $0x18] sm:$0xf0]  ;;  %v5553_v1 = vld [vmem:[%s10384_s1 + $0xe0] sm:$0xf]  ;;  %vm8686_vm13 = vmor %vm2220_vm11, %vm2221_vm12 }
  0xcb   :  { %v541_v19 = vadd.f32 %v540_v11, %v327_v56  ;;  %v516_v31 = vpop.f32.mrf.mxu1  ;;  %v2203_v26 = vor.u32 1.1754944e-38, %v2202_v5  ;;  %v5321_v56 = vld [vmem:[%s10384_s1 + $0x8] sm:$0xf]  ;;  %v6739_v5 = vld [vmem:[%s10384_s1 + $0xe4] sm:$0xf] }
  0xcc   :  { %1834 = vmatpush.bf16.msra.mxu0 %v5394_v25  ;;  %v5350_v25 = vor.u32 %v8519_v62, %v5347_v2  ;;  %v2177_v32 = vsel %vm8533_vm7, %v8483_v41, %v2173_v13  ;;  %v6741_v2 = vld [vmem:[%s10384_s1 + $0xec] sm:$0xf0]  ;;  %v2218_v4 = vmul.f32 %v8508_v58, %v2217_v21  ;;  %v5322_v63 = vor.u32 %v6682_v57, %v5321_v56  ;;  %v5521_v21 = vld [vmem:[%s10384_s1 + $0xa0] sm:$0xf]  ;;  %v6732_v46 = vld [vmem:[%s10384_s1 + $0xac] sm:$0xf] }
  0xcd   :  { %1847 = vmatpush.bf16.msra.mxu1 %v5398_v29  ;;  %1860 = vmatpush.bf16.msra.mxu2 %v5402_v30  ;;  %v6685_v29 = vld [vmem:[%s10384_s1 + $0x2c] sm:$0xf0]  ;;  %v549_v30 = vrot.slane %v528_v10, 4  ;;  %v550_v36 = vrot.slane %v541_v19, 2  ;;  %v2182_v41 = vsel %vm8554_vm8, %v2181_v14, %v2177_v32  ;;  %v6740_v10 = vld [vmem:[%s10384_s1 + $0xec] sm:$0xf]  ;;  %v5326_v13 = vor.u32 %v6680_v59, %v5323_v0 }
  0xce   :  { %1873 = vmatpush.bf16.msra.mxu3 %v5406_v35  ;;  %v5331_v35 = vld [vmem:[%s10384_s1 + $0x30] sm:$0xf0]  ;;  %v5330_v47 = vor.u32 %v6685_v29, %v5329_v28  ;;  %v2231_v61 = vmul.f32 %v6980_v20, %v2182_v41  ;;  %v5563_v14 = vld [vmem:[%s10384_s1 + $0xf8] sm:$0xf0]  ;;  %v5554_v18 = vor.u32 %v6741_v2, %v5553_v1  ;;  %v5537_v19 = vld [vmem:[%s10384_s1 + $0xc0] sm:$0xf]  ;;  %v2219_v20 = vadd.f32 %v8508_v58, %v2218_v4 }
  0xcf   :  { %v552_v45 = vsel %vm282_vm1, %v549_v30, %v550_v36  ;;  %v5334_v54 = vor.u32 %v6683_v34, %v5331_v35  ;;  %v529_v60 = vpop.f32.mrf.mxu2  ;;  %v5562_v28 = vor.u32 %v6742_v9, %v5561_v7  ;;  %v6737_v29 = vld [vmem:[%s10384_s1 + $0xcc] sm:$0xf0]  ;;  %v6735_v30 = vld [vmem:[%s10384_s1 + $0xc4] sm:$0xf]  ;;  %v5566_v32 = vor.u32 %v6740_v10, %v5563_v14  ;;  %v5545_v34 = vld [vmem:[%s10384_s1 + $0xc8] sm:$0xf] }
  0xd0   :  { %1835 = vmatpush.bf16.msra.mxu0 %v5378_v38  ;;  %v5337_v38 = vld [vmem:[%s10384_s1 + $0x28] sm:$0xf]  ;;  %v8619_v51 = vsel %vm284_vm2, %v551_v12, %v552_v45  ;;  %v5318_v12 = vor.u32 %v6679_v49, %v5315_v50  ;;  %v6738_v35 = vld [vmem:[%s10384_s1 + $0xd4] sm:$0xf0]  ;;  %v6733_v41 = vld [vmem:[%s10384_s1 + $0xac] sm:$0xf0] }
  0xd1   :  { %1848 = vmatpush.bf16.msra.mxu1 %v5382_v16  ;;  %1861 = vmatpush.bf16.msra.mxu2 %v5386_v39  ;;  %v6686_v16 = vld [vmem:[%s10384_s1 + $0x34] sm:$0xf0]  ;;  %v2195_v39 = vadd.f32 %v8499_v52, %v2194_v24  ;;  %v5522_v50 = vor.u32 %v6733_v41, %v5521_v21  ;;  %v6729_v57 = vld [vmem:[%s10384_s1 + $0x8c] sm:$0xf0]  ;;  %v6727_v59 = vld [vmem:[%s10384_s1 + $0x84] sm:$0xf] }
  0xd2   :  { %1874 = vmatpush.bf16.msra.mxu3 %v5390_v40  ;;  %v5338_v55 = vor.u32 %v6686_v16, %v5337_v38  ;;  %v542_v3 = vpop.f32.mrf.mxu3  ;;  %v2223_v38 = vsel %vm8686_vm13, %v8508_v58, %v2219_v20  ;;  %v5546_v40 = vor.u32 %v6738_v35, %v5545_v34  ;;  %v6731_v58 = vld [vmem:[%s10384_s1 + $0xa4] sm:$0xf]  ;;  %v6734_v45 = vld [vmem:[%s10384_s1 + $0xb4] sm:$0xf0]  ;;  %v6728_v2 = vld [vmem:[%s10384_s1 + $0x8c] sm:$0xf] }
  0xd3   :  { %v2199_v53 = vsel %vm8582_vm9, %v8499_v52, %v2195_v39  ;;  %v6730_v0 = vld [vmem:[%s10384_s1 + $0x94] sm:$0xf0]  ;;  %v5515_v3 = vld [vmem:[%s10384_s1 + $0x98] sm:$0xf0]  ;;  %v6725_v10 = vld [vmem:[%s10384_s1 + $0x6c] sm:$0xf0] }
  0xd4   :  { %1836 = vmatpush.bf16.msra.mxu0 %v5362_v42  ;;  %v6684_v42 = vld [vmem:[%s10384_s1 + $0x2c] sm:$0xf]  ;;  %v2204_v52 = vsel %vm8593_vm10, %v2203_v26, %v2199_v53  ;;  %v2227_v26 = vor.u32 1.1754944e-38, %v2226_v17  ;;  %v5505_v53 = vld [vmem:[%s10384_s1 + $0x80] sm:$0xf] }
  0xd5   :  { %1849 = vmatpush.bf16.msra.mxu1 %v5366_v43  ;;  %1862 = vmatpush.bf16.msra.mxu2 %v5370_v44  ;;  %v5339_v43 = vld [vmem:[%s10384_s1 + $0x38] sm:$0xf0]  ;;  %v5313_v44 = vld [vmem:[%s10384_s1] sm:$0xf]  ;;  %v2230_v11 = vmul.f32 0.0, %v2204_v52  ;;  %v5506_v4 = vor.u32 %v6729_v57, %v5505_v53 }
  0xd6   :  { %1875 = vmatpush.bf16.msra.mxu3 %v5374_v48  ;;  %v6681_v48 = vld [vmem:[%s10384_s1 + $0xc] sm:$0xf0]  ;;  %v5342_v62 = vor.u32 %v6684_v42, %v5339_v43  ;;  %v5550_v42 = vor.u32 %v6736_v22, %v5547_v37  ;;  %v5523_v43 = vld [vmem:[%s10384_s1 + $0xb0] sm:$0xf0]  ;;  %v5497_v14 = vld [vmem:[%s10384_s1 + $0x68] sm:$0xf] }
  0xd7   :  { %v5314_v8 = vor.u32 %v6681_v48, %v5313_v44  ;;  %v8674_v24 = vadd.f32 %v2231_v61, %v2230_v11  ;;  %v5529_v44 = vld [vmem:[%s10384_s1 + $0xa8] sm:$0xf]  ;;  %v2228_v48 = vsel %vm8709_vm14, %v2227_v26, %v2223_v38  ;;  %v5507_v61 = vld [vmem:[%s10384_s1 + $0x90] sm:$0xf0]  ;;  %v6723_v11 = vld [vmem:[%s10384_s1 + $0x64] sm:$0xf] }
  0xd8   :  { %1837 = vmatpush.bf16.msra.mxu0 %v5346_v15  ;;  %v1628_v15 = vld [vmem:[%s10385_s0 + $0xc] sm:$0x3]  ;;  %v5530_v56 = vor.u32 %v6734_v45, %v5529_v44  ;;  %v6719_v34 = vld [vmem:[%s10384_s1 + $0x44] sm:$0xf]  ;;  %v5475_v22 = vld [vmem:[%s10384_s1 + $0x50] sm:$0xf0] }
  0xd9   :  { %1850 = vmatpush.bf16.msra.mxu1 %v5350_v25  ;;  %1863 = vmatpush.bf16.msra.mxu2 %v5354_v33  ;;  %v5558_v25 = vor.u32 %v6739_v5, %v5555_v6  ;;  %v5539_v33 = vld [vmem:[%s10384_s1 + $0xd0] sm:$0xf0]  ;;  %v1629_v36 = vpack.c.bf16 %v1628_v15, %v1628_v15  ;;  %6981 = vtanh.f32 %v8674_v24  ;;  %v5489_v5 = vld [vmem:[%s10384_s1 + $0x60] sm:$0xf]  ;;  %v6726_v15 = vld [vmem:[%s10384_s1 + $0x74] sm:$0xf0]  ;;  %v5478_v44 = vor.u32 %v6719_v34, %v5475_v22 }
  0xda   :  { %1876 = vmatpush.bf16.msra.mxu3 %v5358_v27  ;;  %v5538_v27 = vor.u32 %v6737_v29, %v5537_v19  ;;  %v5542_v39 = vor.u32 %v6735_v30, %v5539_v33  ;;  %v5499_v19 = vld [vmem:[%s10384_s1 + $0x78] sm:$0xf0]  ;;  %v5498_v31 = vor.u32 %v6726_v15, %v5497_v14  ;;  %v6721_v33 = vld [vmem:[%s10384_s1 + $0x4c] sm:$0xf0]  ;;  %v5481_v37 = vld [vmem:[%s10384_s1 + $0x48] sm:$0xf] }
  0xdb   :  { %v6722_v26 = vld [vmem:[%s10384_s1 + $0x54] sm:$0xf0]  ;;  %v5465_v53 = vld [vmem:[%s10384_s1 + $0x28] sm:$0xf]  ;;  %v5686_v15 = vld [vmem:[%s10388_s2 + $0xf0] sm:$0xf0] }
  0xdc   :  { %1838 = vmatpush.bf16.msra.mxu0 %v5330_v47  ;;  %v5531_v47 = vld [vmem:[%s10384_s1 + $0xb8] sm:$0xf0]  ;;  %v5482_v45 = vor.u32 %v6722_v26, %v5481_v37  ;;  %v6769_v34 = vld [vmem:[%s10388_s2 + $0xcc] sm:$0xf0]  ;;  %v5670_v22 = vld [vmem:[%s10388_s2 + $0xd0] sm:$0xf0] }
  0xdd   :  { %1851 = vmatpush.bf16.msra.mxu1 %v5334_v54  ;;  %1864 = vmatpush.bf16.msra.mxu2 %v5338_v55  ;;  %v8745_v54 = vld [vmem:[%s10386_s3] sm:$0xf]  ;;  %v5526_v55 = vor.u32 %v6731_v58, %v5523_v43  ;;  %v5534_v52 = vor.u32 %v6732_v46, %v5531_v47  ;;  %v6717_v46 = vld [vmem:[%s10384_s1 + $0x2c] sm:$0xf0]  ;;  %v6715_v47 = vld [vmem:[%s10384_s1 + $0x24] sm:$0xf] }
  0xde   :  { %1877 = vmatpush.bf16.msra.mxu3 %v5342_v62  ;;  %v593_v60 = vperm.slane %v8745_v54, 1  ;;  %v5513_v62 = vld [vmem:[%s10384_s1 + $0x88] sm:$0xf]  ;;  %v592_v7 = vperm.slane %v8745_v54, 0  ;;  %v594_v17 = vperm.slane %v8745_v54, 2  ;;  %v595_v23 = vperm.slane %v8745_v54, 3 }
  0xdf   :  { %v6982_v49 = vpop.eup %6981  ;;  %v5514_v9 = vor.u32 %v6730_v0, %v5513_v62  ;;  %v5457_v58 = vld [vmem:[%s10384_s1 + $0x20] sm:$0xf]  ;;  %v6718_v54 = vld [vmem:[%s10384_s1 + $0x34] sm:$0xf0]  ;;  %v5676_v37 = vld [vmem:[%s10388_s2 + $0xc8] sm:$0xf] }
  0xe0   :  { %1839 = vmatpush.bf16.msra.mxu0 %v5314_v8  ;;  %v8763_v1 = vmul.f32 %v6982_v49, %v2228_v48  ;;  %v5510_v8 = vor.u32 %v6727_v59, %v5507_v61  ;;  %v6713_v61 = vld [vmem:[%s10384_s1 + $0xc] sm:$0xf0]  ;;  %v6770_v26 = vld [vmem:[%s10388_s2 + $0xd4] sm:$0xf0] }
  0xe1   :  { %1852 = vmatpush.bf16.msra.mxu1 %v5318_v12  ;;  %1865 = vmatpush.bf16.msra.mxu2 %v5322_v63  ;;  %v5491_v12 = vld [vmem:[%s10384_s1 + $0x70] sm:$0xf0] }
  0xe2   :  { %1878 = vmatpush.bf16.msra.mxu3 %v5326_v13  ;;  %2235 = vst [vmem:[%s10387_s4] sm:$0x3] %v8763_v1  ;;  %v5518_v13 = vor.u32 %v6728_v2, %v5515_v3  ;;  %v5494_v30 = vor.u32 %v6723_v11, %v5491_v12  ;;  %v5466_v2 = vor.u32 %v6718_v54, %v5465_v53  ;;  %v6711_v3 = vld [vmem:[%s10384_s1 + $0x4] sm:$0xf]  ;;  %v5684_v12 = vld [vmem:[%s10388_s2 + $0xe0] sm:$0xf] }
  0xe3   :  { %1840 = vmatmul.bf16.vlgmr.msra.gmra.mxu0 %v1629_v36  ;;  %v782_v6 = vpop.f32.mrf.mxu1  ;;  %v5636_v53 = vld [vmem:[%s10388_s2 + $0x80] sm:$0xf] }
  0xe4   :  { %2100 = vmatpush.bf16.msrb.mxu0 %v5554_v18  ;;  %1866 = vmatmul.bf16.vlgmr.msra.gmra.mxu2 %v1629_v36  ;;  %v783_v63 = vadd.f32 %v782_v6, %v593_v60  ;;  %v6724_v18 = vld [vmem:[%s10384_s1 + $0x6c] sm:$0xf]  ;;  %v5458_v60 = vor.u32 %v6717_v46, %v5457_v58  ;;  %v6765_v58 = vld [vmem:[%s10388_s2 + $0xac] sm:$0xf0]  ;;  %v6766_v46 = vld [vmem:[%s10388_s2 + $0xb4] sm:$0xf0] }
  0xe5   :  { %2113 = vmatpush.bf16.msrb.mxu1 %v5558_v25  ;;  %2126 = vmatpush.bf16.msrb.mxu2 %v5562_v28  ;;  %v769_v25 = vpop.f32.mrf.mxu0  ;;  %v5490_v28 = vor.u32 %v6725_v10, %v5489_v5  ;;  %v5449_v5 = vld [vmem:[%s10384_s1 + $0x8] sm:$0xf]  ;;  %v5451_v10 = vld [vmem:[%s10384_s1 + $0x18] sm:$0xf0] }
  0xe6   :  { %2139 = vmatpush.bf16.msrb.mxu3 %v5566_v32  ;;  %1853 = vmatmul.bf16.vlgmr.msra.gmra.mxu1 %v1629_v36  ;;  %v816_v20 = vrot.slane %v783_v63, 6  ;;  %v770_v29 = vadd.f32 %v769_v25, %v592_v7  ;;  %v5473_v32 = vld [vmem:[%s10384_s1 + $0x40] sm:$0xf]  ;;  %v6773_v63 = vld [vmem:[%s10388_s2 + $0xec] sm:$0xf0] }
  0xe7   :  { %1879 = vmatmul.bf16.vlgmr.msra.gmra.mxu3 %v1629_v36  ;;  %v795_v35 = vpop.f32.mrf.mxu2  ;;  %v5502_v36 = vor.u32 %v6724_v18, %v5499_v19  ;;  %v5474_v41 = vor.u32 %v6721_v33, %v5473_v32  ;;  %v6774_v18 = vld [vmem:[%s10388_s2 + $0xf4] sm:$0xf0]  ;;  %v5694_v25 = vld [vmem:[%s10388_s2 + $0xf8] sm:$0xf0]  ;;  %v5668_v33 = vld [vmem:[%s10388_s2 + $0xc0] sm:$0xf] }
  0xe8   :  { %2101 = vmatpush.bf16.msrb.mxu0 %v5538_v27  ;;  %v796_v27 = vadd.f32 %v795_v35, %v594_v17  ;;  %v819_v16 = vsel %vm280_vm0, %v770_v29, %v816_v20  ;;  %v5692_v17 = vld [vmem:[%s10388_s2 + $0xe8] sm:$0xf]  ;;  %v6767_v35 = vld [vmem:[%s10388_s2 + $0xc4] sm:$0xf] }
  0xe9   :  { %2114 = vmatpush.bf16.msrb.mxu1 %v5542_v39  ;;  %2127 = vmatpush.bf16.msrb.mxu2 %v5546_v40  ;;  %v6720_v39 = vld [vmem:[%s10384_s1 + $0x4c] sm:$0xf]  ;;  %v5483_v40 = vld [vmem:[%s10384_s1 + $0x58] sm:$0xf0]  ;;  %v5693_v32 = vor.u32 %v6774_v18, %v5692_v17 }
  0xea   :  { %2140 = vmatpush.bf16.msrb.mxu3 %v5550_v42  ;;  %v808_v38 = vpop.f32.mrf.mxu3  ;;  %v817_v42 = vrot.slane %v796_v27, 4  ;;  %v5486_v49 = vor.u32 %v6720_v39, %v5483_v40  ;;  %v5669_v39 = vor.u32 %v6769_v34, %v5668_v33  ;;  %v5652_v40 = vld [vmem:[%s10388_s2 + $0xa0] sm:$0xf]  ;;  %v6756_v18 = vld [vmem:[%s10388_s2 + $0x6c] sm:$0xf] }
  0xeb   :  { %v809_v21 = vadd.f32 %v808_v38, %v595_v23  ;;  %v784_v43 = vpop.f32.mrf.mxu1  ;;  %v6772_v23 = vld [vmem:[%s10388_s2 + $0xec] sm:$0xf]  ;;  %v6753_v33 = vld [vmem:[%s10388_s2 + $0x4c] sm:$0xf0]  ;;  %v6751_v34 = vld [vmem:[%s10388_s2 + $0x44] sm:$0xf] }
  0xec   :  { %2102 = vmatpush.bf16.msrb.mxu0 %v5522_v50  ;;  %v5459_v50 = vld [vmem:[%s10384_s1 + $0x30] sm:$0xf0]  ;;  %v6768_v38 = vld [vmem:[%s10388_s2 + $0xcc] sm:$0xf] }
  0xed   :  { %2115 = vmatpush.bf16.msrb.mxu1 %v5526_v55  ;;  %2128 = vmatpush.bf16.msrb.mxu2 %v5530_v56  ;;  %v818_v48 = vrot.slane %v809_v21, 2  ;;  %v6716_v55 = vld [vmem:[%s10384_s1 + $0x2c] sm:$0xf]  ;;  %v5467_v56 = vld [vmem:[%s10384_s1 + $0x38] sm:$0xf0]  ;;  %v771_v59 = vpop.f32.mrf.mxu0  ;;  %v5462_v0 = vor.u32 %v6715_v47, %v5459_v50  ;;  %v5673_v21 = vor.u32 %v6767_v35, %v5670_v22  ;;  %v5653_v50 = vor.u32 %v6765_v58, %v5652_v40 }
  0xee   :  { %2141 = vmatpush.bf16.msrb.mxu3 %v5534_v52  ;;  %v5441_v52 = vld [vmem:[%s10384_s1] sm:$0xf]  ;;  %v5470_v7 = vor.u32 %v6716_v55, %v5467_v56  ;;  %v5654_v43 = vld [vmem:[%s10388_s2 + $0xb0] sm:$0xf0]  ;;  %v6761_v56 = vld [vmem:[%s10388_s2 + $0x8c] sm:$0xf0] }
  0xef   :  { %v820_v57 = vsel %vm282_vm1, %v817_v42, %v818_v48  ;;  %v797_v6 = vpop.f32.mrf.mxu2  ;;  %v5442_v14 = vor.u32 %v6713_v61, %v5441_v52  ;;  %v6763_v42 = vld [vmem:[%s10388_s2 + $0xa4] sm:$0xf]  ;;  %v8951_v47 = vld [vmem:[%s10386_s3] sm:$0xf]  ;;  %v6764_v48 = vld [vmem:[%s10388_s2 + $0xac] sm:$0xf] }
  0xf0   :  { %2103 = vmatpush.bf16.msrb.mxu0 %v5506_v4  ;;  %v8859_v62 = vsel %vm284_vm2, %v819_v16, %v820_v57  ;;  %v5443_v4 = vld [vmem:[%s10384_s1 + $0x10] sm:$0xf0]  ;;  %v5678_v16 = vld [vmem:[%s10388_s2 + $0xd8] sm:$0xf0]  ;;  %v5657_v54 = vor.u32 %v6763_v42, %v5654_v43  ;;  %v6759_v57 = vld [vmem:[%s10388_s2 + $0x84] sm:$0xf] }
  0xf1   :  { %2116 = vmatpush.bf16.msrb.mxu1 %v5510_v8  ;;  %2129 = vmatpush.bf16.msrb.mxu2 %v5514_v9  ;;  %v6714_v8 = vld [vmem:[%s10384_s1 + $0x14] sm:$0xf0]  ;;  %v6712_v9 = vld [vmem:[%s10384_s1 + $0xc] sm:$0xf]  ;;  %v5446_v19 = vor.u32 %v6711_v3, %v5443_v4  ;;  %v861_v59 = vperm.slane %v8951_v47, 1  ;;  %v5637_v4 = vor.u32 %v6761_v56, %v5636_v53  ;;  %v862_v17 = vperm.slane %v8951_v47, 2 }
  0xf2   :  { %2142 = vmatpush.bf16.msrb.mxu3 %v5518_v13  ;;  %v810_v11 = vpop.f32.mrf.mxu3  ;;  %v6771_v13 = vld [vmem:[%s10388_s2 + $0xe4] sm:$0xf]  ;;  %v5450_v20 = vor.u32 %v6714_v8, %v5449_v5  ;;  %v5454_v29 = vor.u32 %v6712_v9, %v5451_v10  ;;  %v5638_v52 = vld [vmem:[%s10388_s2 + $0x90] sm:$0xf0]  ;;  %v5644_v61 = vld [vmem:[%s10388_s2 + $0x88] sm:$0xf] }
  0xf3   :  { %v5646_v3 = vld [vmem:[%s10388_s2 + $0x98] sm:$0xf0]  ;;  %v5620_v5 = vld [vmem:[%s10388_s2 + $0x60] sm:$0xf]  ;;  %v5641_v8 = vor.u32 %v6759_v57, %v5638_v52  ;;  %v6757_v10 = vld [vmem:[%s10388_s2 + $0x6c] sm:$0xf0] }
  0xf4   :  { %2104 = vmatpush.bf16.msrb.mxu0 %v5490_v28  ;;  %v1896_v28 = vld [vmem:[%s10385_s0 + $0xe] sm:$0x3]  ;;  %v6755_v11 = vld [vmem:[%s10388_s2 + $0x64] sm:$0xf]  ;;  %v5606_v22 = vld [vmem:[%s10388_s2 + $0x50] sm:$0xf0] }
  0xf5   :  { %2117 = vmatpush.bf16.msrb.mxu1 %v5494_v30  ;;  %2130 = vmatpush.bf16.msrb.mxu2 %v5498_v31  ;;  %v5685_v30 = vor.u32 %v6773_v63, %v5684_v12  ;;  %v5689_v31 = vor.u32 %v6771_v13, %v5686_v15  ;;  %v1897_v27 = vpack.c.bf16 %v1896_v28, %v1896_v28  ;;  %v5622_v12 = vld [vmem:[%s10388_s2 + $0x70] sm:$0xf0]  ;;  %v6758_v15 = vld [vmem:[%s10388_s2 + $0x74] sm:$0xf0]  ;;  %v5614_v40 = vld [vmem:[%s10388_s2 + $0x58] sm:$0xf0] }
  0xf6   :  { %2143 = vmatpush.bf16.msrb.mxu3 %v5502_v36  ;;  %v5697_v36 = vor.u32 %v6772_v23, %v5694_v25  ;;  %v863_v23 = vperm.slane %v8951_v47, 3  ;;  %v5621_v28 = vor.u32 %v6757_v10, %v5620_v5  ;;  %v5588_v58 = vld [vmem:[%s10388_s2 + $0x20] sm:$0xf]  ;;  %v5596_v53 = vld [vmem:[%s10388_s2 + $0x28] sm:$0xf] }
  0xf7   :  { %v5598_v56 = vld [vmem:[%s10388_s2 + $0x38] sm:$0xf0] }
  0xf8   :  { %2105 = vmatpush.bf16.msrb.mxu0 %v5474_v41  ;;  %v5677_v41 = vor.u32 %v6770_v26, %v5676_v37  ;;  %v5612_v37 = vld [vmem:[%s10388_s2 + $0x48] sm:$0xf]  ;;  %v6754_v26 = vld [vmem:[%s10388_s2 + $0x54] sm:$0xf0] }
  0xf9   :  { %2118 = vmatpush.bf16.msrb.mxu1 %v5478_v44  ;;  %2131 = vmatpush.bf16.msrb.mxu2 %v5482_v45  ;;  %v5681_v44 = vor.u32 %v6768_v38, %v5678_v16  ;;  %v5660_v45 = vld [vmem:[%s10388_s2 + $0xa8] sm:$0xf] }
  0xfa   :  { %2144 = vmatpush.bf16.msrb.mxu3 %v5486_v49  ;;  %v5662_v49 = vld [vmem:[%s10388_s2 + $0xb8] sm:$0xf0]  ;;  %v5661_v55 = vor.u32 %v6766_v46, %v5660_v45  ;;  %v5613_v45 = vor.u32 %v6754_v26, %v5612_v37  ;;  %v6749_v46 = vld [vmem:[%s10388_s2 + $0x2c] sm:$0xf0] }
  0xfc   :  { %2106 = vmatpush.bf16.msrb.mxu0 %v5458_v60  ;;  %v5665_v60 = vor.u32 %v6764_v48, %v5662_v49 }
  0xfd   :  { %2119 = vmatpush.bf16.msrb.mxu1 %v5462_v0  ;;  %2132 = vmatpush.bf16.msrb.mxu2 %v5466_v2  ;;  %v6762_v0 = vld [vmem:[%s10388_s2 + $0x94] sm:$0xf0]  ;;  %v6760_v2 = vld [vmem:[%s10388_s2 + $0x8c] sm:$0xf] }
  0xfe   :  { %2145 = vmatpush.bf16.msrb.mxu3 %v5470_v7  ;;  %v860_v7 = vperm.slane %v8951_v47, 0  ;;  %v5645_v9 = vor.u32 %v6762_v0, %v5644_v61  ;;  %v5649_v13 = vor.u32 %v6760_v2, %v5646_v3  ;;  %v6747_v47 = vld [vmem:[%s10388_s2 + $0x24] sm:$0xf]  ;;  %v5572_v2 = vld [vmem:[%s10388_s2] sm:$0xf] }
  0xff   :  { %v6745_v3 = vld [vmem:[%s10388_s2 + $0xc] sm:$0xf0] }
 0x100   :  { %2107 = vmatpush.bf16.msrb.mxu0 %v5442_v14  ;;  %v5628_v14 = vld [vmem:[%s10388_s2 + $0x68] sm:$0xf]  ;;  %v1037_v25 = vpop.f32.mrf.mxu0 }
 0x101   :  { %2120 = vmatpush.bf16.msrb.mxu1 %v5446_v19  ;;  %2133 = vmatpush.bf16.msrb.mxu2 %v5450_v20  ;;  %v5630_v19 = vld [vmem:[%s10388_s2 + $0x78] sm:$0xf0] }
 0x102   :  { %2146 = vmatpush.bf16.msrb.mxu3 %v5454_v29  ;;  %v1038_v29 = vadd.f32 %v1037_v25, %v860_v7  ;;  %v5574_v7 = vld [vmem:[%s10388_s2 + $0x10] sm:$0xf0] }
 0x103   :  { %2108 = vmatmul.bf16.vlgmr.msrb.gmra.mxu0 %v1897_v27  ;;  %v1050_v6 = vpop.f32.mrf.mxu1 }
 0x104   :  { %2430 = vmatpush.bf16.msra.mxu0 %v5685_v30  ;;  %2134 = vmatmul.bf16.vlgmr.msrb.gmra.mxu2 %v1897_v27  ;;  %v1051_v63 = vadd.f32 %v1050_v6, %v861_v59  ;;  %v5625_v30 = vor.u32 %v6755_v11, %v5622_v12  ;;  %v6744_v11 = vld [vmem:[%s10388_s2 + $0xc] sm:$0xf]  ;;  %v5582_v12 = vld [vmem:[%s10388_s2 + $0x18] sm:$0xf0] }
 0x105   :  { %2443 = vmatpush.bf16.msra.mxu1 %v5689_v31  ;;  %2456 = vmatpush.bf16.msra.mxu2 %v5693_v32  ;;  %v5629_v31 = vor.u32 %v6758_v15, %v5628_v14  ;;  %v5604_v32 = vld [vmem:[%s10388_s2 + $0x40] sm:$0xf]  ;;  %v5585_v15 = vor.u32 %v6744_v11, %v5582_v12 }
 0x106   :  { %2469 = vmatpush.bf16.msra.mxu3 %v5697_v36  ;;  %2121 = vmatmul.bf16.vlgmr.msrb.gmra.mxu1 %v1897_v27  ;;  %v1084_v20 = vrot.slane %v1051_v63, 6  ;;  %v5633_v36 = vor.u32 %v6756_v18, %v5630_v19  ;;  %v5573_v63 = vor.u32 %v6745_v3, %v5572_v2  ;;  %v1126_v18 = vld [vmem:[%s10386_s3] sm:$0xf] }
 0x107   :  { %2147 = vmatmul.bf16.vlgmr.msrb.gmra.mxu3 %v1897_v27  ;;  %v1063_v35 = vpop.f32.mrf.mxu2  ;;  %v1129_v19 = vperm.slane %v1126_v18, 1 }
 0x108   :  { %2431 = vmatpush.bf16.msra.mxu0 %v5669_v39  ;;  %v1064_v27 = vadd.f32 %v1063_v35, %v862_v17  ;;  %v1087_v16 = vsel %vm280_vm0, %v1038_v29, %v1084_v20  ;;  %v6752_v39 = vld [vmem:[%s10388_s2 + $0x4c] sm:$0xf]  ;;  %v1039_v59 = vpop.f32.mrf.mxu0  ;;  %v2237_v17 = vpack.c.bf16 %v8763_v1, %v8763_v1 }
 0x109   :  { %2444 = vmatpush.bf16.msra.mxu1 %v5673_v21  ;;  %2457 = vmatpush.bf16.msra.mxu2 %v5677_v41  ;;  %v5605_v41 = vor.u32 %v6753_v33, %v5604_v32  ;;  %v5617_v49 = vor.u32 %v6752_v39, %v5614_v40 }
 0x10a   :  { %2470 = vmatpush.bf16.msra.mxu3 %v5681_v44  ;;  %v1076_v38 = vpop.f32.mrf.mxu3  ;;  %v1085_v42 = vrot.slane %v1064_v27, 4  ;;  %v5609_v44 = vor.u32 %v6751_v34, %v5606_v22 }
 0x10b   :  { %v1077_v21 = vadd.f32 %v1076_v38, %v863_v23  ;;  %v1052_v43 = vpop.f32.mrf.mxu1  ;;  %v1128_v23 = vperm.slane %v1126_v18, 0 }
 0x10c   :  { %2432 = vmatpush.bf16.msra.mxu0 %v5653_v50  ;;  %v5590_v50 = vld [vmem:[%s10388_s2 + $0x30] sm:$0xf0] }
 0x10d   :  { %2445 = vmatpush.bf16.msra.mxu1 %v5657_v54  ;;  %2458 = vmatpush.bf16.msra.mxu2 %v5661_v55  ;;  %v1086_v48 = vrot.slane %v1077_v21, 2  ;;  %v6750_v54 = vld [vmem:[%s10388_s2 + $0x34] sm:$0xf0]  ;;  %v6748_v55 = vld [vmem:[%s10388_s2 + $0x2c] sm:$0xf]  ;;  %v5593_v61 = vor.u32 %v6747_v47, %v5590_v50 }
 0x10e   :  { %2471 = vmatpush.bf16.msra.mxu3 %v5665_v60  ;;  %v5589_v60 = vor.u32 %v6749_v46, %v5588_v58  ;;  %v5597_v0 = vor.u32 %v6750_v54, %v5596_v53  ;;  %v5601_v6 = vor.u32 %v6748_v55, %v5598_v56  ;;  %v1394_v21 = vld [vmem:[%s10386_s3] sm:$0xf] }
 0x10f   :  { %v1088_v57 = vsel %vm282_vm1, %v1085_v42, %v1086_v48  ;;  %v1065_v5 = vpop.f32.mrf.mxu2  ;;  %v1396_v42 = vperm.slane %v1394_v21, 0  ;;  %v1399_v46 = vperm.slane %v1394_v21, 3 }
 0x110   :  { %2433 = vmatpush.bf16.msra.mxu0 %v5637_v4  ;;  %v9062_v52 = vsel %vm284_vm2, %v1087_v16, %v1088_v57  ;;  %v6743_v4 = vld [vmem:[%s10388_s2 + $0x4] sm:$0xf] }
 0x111   :  { %2446 = vmatpush.bf16.msra.mxu1 %v5641_v8  ;;  %2459 = vmatpush.bf16.msra.mxu2 %v5645_v9  ;;  %v5580_v8 = vld [vmem:[%s10388_s2 + $0x8] sm:$0xf]  ;;  %v6746_v9 = vld [vmem:[%s10388_s2 + $0x14] sm:$0xf0] }
 0x112   :  { %2472 = vmatpush.bf16.msra.mxu3 %v5649_v13  ;;  %v1078_v10 = vpop.f32.mrf.mxu3  ;;  %v5577_v13 = vor.u32 %v6743_v4, %v5574_v7  ;;  %v5581_v14 = vor.u32 %v6746_v9, %v5580_v8  ;;  %v1662_v4 = vld [vmem:[%s10386_s3] sm:$0xf] }
 0x113   :  { %v1665_v5 = vperm.slane %v1662_v4, 1  ;;  %v1664_v7 = vperm.slane %v1662_v4, 0  ;;  %v1666_v9 = vperm.slane %v1662_v4, 2  ;;  %v1667_v11 = vperm.slane %v1662_v4, 3  ;;  %v5799_v4 = vld [vmem:[%s10388_s2 + $0xc0] sm:$0xf] }
 0x114   :  { %2434 = vmatpush.bf16.msra.mxu0 %v5621_v28  ;;  %v1130_v28 = vperm.slane %v1126_v18, 2 }
 0x115   :  { %2447 = vmatpush.bf16.msra.mxu1 %v5625_v30  ;;  %2460 = vmatpush.bf16.msra.mxu2 %v5629_v31  ;;  %v1131_v30 = vperm.slane %v1126_v18, 3 }
 0x116   :  { %2473 = vmatpush.bf16.msra.mxu3 %v5633_v36 }
 0x118   :  { %2435 = vmatpush.bf16.msra.mxu0 %v5605_v41  ;;  %v1397_v41 = vperm.slane %v1394_v21, 1 }
 0x119   :  { %2448 = vmatpush.bf16.msra.mxu1 %v5609_v44  ;;  %2461 = vmatpush.bf16.msra.mxu2 %v5613_v45  ;;  %v1398_v44 = vperm.slane %v1394_v21, 2 }
 0x11a   :  { %2474 = vmatpush.bf16.msra.mxu3 %v5617_v49 }
 0x11c   :  { %2436 = vmatpush.bf16.msra.mxu0 %v5589_v60 }
 0x11d   :  { %2449 = vmatpush.bf16.msra.mxu1 %v5593_v61  ;;  %2462 = vmatpush.bf16.msra.mxu2 %v5597_v0 }
 0x11e   :  { %2475 = vmatpush.bf16.msra.mxu3 %v5601_v6 }
 0x120   :  { %2437 = vmatpush.bf16.msra.mxu0 %v5573_v63  ;;  %v1305_v31 = vpop.f32.mrf.mxu0 }
 0x121   :  { %2450 = vmatpush.bf16.msra.mxu1 %v5577_v13  ;;  %2463 = vmatpush.bf16.msra.mxu2 %v5581_v14  ;;  %v1306_v32 = vadd.f32 %v1305_v31, %v1128_v23 }
 0x122   :  { %2476 = vmatpush.bf16.msra.mxu3 %v5585_v15 }
 0x123   :  { %2438 = vmatmul.bf16.vlgmr.msra.gmra.mxu0 %v2237_v17  ;;  %v1318_v20 = vpop.f32.mrf.mxu1 }
 0x124   :  { %2451 = vmatmul.bf16.vlgmr.msra.gmra.mxu1 %v2237_v17  ;;  %2464 = vmatmul.bf16.vlgmr.msra.gmra.mxu2 %v2237_v17  ;;  %v1319_v25 = vadd.f32 %v1318_v20, %v1129_v19 }
 0x125   :  { %2477 = vmatmul.bf16.vlgmr.msra.gmra.mxu3 %v2237_v17 }
 0x126   :  { %v1352_v29 = vrot.slane %v1319_v25, 6 }
 0x127   :  { %v1331_v33 = vpop.f32.mrf.mxu2 }
 0x128   :  { %v1332_v1 = vadd.f32 %v1331_v33, %v1130_v28  ;;  %v1355_v35 = vsel %vm280_vm0, %v1306_v32, %v1352_v29  ;;  %v1307_v38 = vpop.f32.mrf.mxu0  ;;  %v1930_v32 = vld [vmem:[%s10386_s3] sm:$0xf] }
 0x129   :  { %v1933_v33 = vperm.slane %v1930_v32, 1 }
 0x12a   :  { %v1344_v34 = vpop.f32.mrf.mxu3  ;;  %v1353_v22 = vrot.slane %v1332_v1, 4 }
 0x12b   :  { %v1345_v36 = vadd.f32 %v1344_v34, %v1131_v30  ;;  %v1320_v37 = vpop.f32.mrf.mxu1  ;;  %v1932_v34 = vperm.slane %v1930_v32, 0 }
 0x12c   :  { %v1935_v37 = vperm.slane %v1930_v32, 3 }
 0x12d   :  { %v1354_v26 = vrot.slane %v1345_v36, 2  ;;  %v1934_v36 = vperm.slane %v1930_v32, 2 }
 0x12f   :  { %v1356_v27 = vsel %vm282_vm1, %v1353_v22, %v1354_v26  ;;  %v1333_v39 = vpop.f32.mrf.mxu2 }
 0x130   :  { %v9096_v16 = vsel %vm284_vm2, %v1355_v35, %v1356_v27 }
 0x132   :  { %v1346_v40 = vpop.f32.mrf.mxu3 }
 0x140   :  { %v1573_v47 = vpop.f32.mrf.mxu0 }
 0x141   :  { %v1574_v48 = vadd.f32 %v1573_v47, %v1396_v42 }
 0x143   :  { %v1586_v58 = vpop.f32.mrf.mxu1 }
 0x144   :  { %v1587_v43 = vadd.f32 %v1586_v58, %v1397_v41 }
 0x146   :  { %v1620_v45 = vrot.slane %v1587_v43, 6 }
 0x147   :  { %v1599_v49 = vpop.f32.mrf.mxu2 }
 0x148   :  { %v1600_v50 = vadd.f32 %v1599_v49, %v1398_v44  ;;  %v1623_v54 = vsel %vm280_vm0, %v1574_v48, %v1620_v45  ;;  %v1575_v61 = vpop.f32.mrf.mxu0  ;;  %v5815_v49 = vld [vmem:[%s10388_s2 + $0xe0] sm:$0xf] }
 0x149   :  { %v6804_v61 = vld [vmem:[%s10388_s2 + $0xec] sm:$0xf] }
 0x14a   :  { %v1612_v53 = vpop.f32.mrf.mxu3  ;;  %v1621_v56 = vrot.slane %v1600_v50, 4  ;;  %v6805_v50 = vld [vmem:[%s10388_s2 + $0xec] sm:$0xf0] }
 0x14b   :  { %v1613_v55 = vadd.f32 %v1612_v53, %v1399_v46  ;;  %v1588_v57 = vpop.f32.mrf.mxu1  ;;  %v6803_v53 = vld [vmem:[%s10388_s2 + $0xe4] sm:$0xf] }
 0x14c   :  { %v6806_v57 = vld [vmem:[%s10388_s2 + $0xf4] sm:$0xf0] }
 0x14d   :  { %v1622_v59 = vrot.slane %v1613_v55, 2  ;;  %v5817_v55 = vld [vmem:[%s10388_s2 + $0xf0] sm:$0xf0] }
 0x14f   :  { %v1624_v60 = vsel %vm282_vm1, %v1621_v56, %v1622_v59  ;;  %v1601_v2 = vpop.f32.mrf.mxu2  ;;  %v5823_v56 = vld [vmem:[%s10388_s2 + $0xe8] sm:$0xf]  ;;  %v5820_v59 = vor.u32 %v6803_v53, %v5817_v55  ;;  %v6789_v53 = vld [vmem:[%s10388_s2 + $0x6c] sm:$0xf0] }
 0x150   :  { %v9104_v0 = vsel %vm284_vm2, %v1623_v54, %v1624_v60  ;;  %v5816_v54 = vor.u32 %v6805_v50, %v5815_v49  ;;  %v5824_v60 = vor.u32 %v6806_v57, %v5823_v56  ;;  %v5825_v2 = vld [vmem:[%s10388_s2 + $0xf8] sm:$0xf0]  ;;  %v5753_v57 = vld [vmem:[%s10388_s2 + $0x70] sm:$0xf0] }
 0x151   :  { %2772 = vmatpush.bf16.msrb.mxu1 %v5820_v59  ;;  %v5759_v59 = vld [vmem:[%s10388_s2 + $0x68] sm:$0xf] }
 0x152   :  { %v1614_v3 = vpop.f32.mrf.mxu3  ;;  %2759 = vmatpush.bf16.msrb.mxu0 %v5816_v54  ;;  %2785 = vmatpush.bf16.msrb.mxu2 %v5824_v60  ;;  %v6787_v54 = vld [vmem:[%s10388_s2 + $0x64] sm:$0xf]  ;;  %v6790_v60 = vld [vmem:[%s10388_s2 + $0x74] sm:$0xf0] }
 0x153   :  { %v5828_v3 = vor.u32 %v6804_v61, %v5825_v2  ;;  %v5756_v2 = vor.u32 %v6787_v54, %v5753_v57 }
 0x155   :  { %2798 = vmatpush.bf16.msrb.mxu3 %v5828_v3  ;;  %v5760_v3 = vor.u32 %v6790_v60, %v5759_v59 }
 0x160   :  { %v1841_v12 = vpop.f32.mrf.mxu0 }
 0x161   :  { %v1842_v63 = vadd.f32 %v1841_v12, %v1664_v7 }
 0x163   :  { %v1854_v6 = vpop.f32.mrf.mxu1 }
 0x164   :  { %v1855_v8 = vadd.f32 %v1854_v6, %v1665_v5  ;;  %v6801_v5 = vld [vmem:[%s10388_s2 + $0xcc] sm:$0xf0]  ;;  %v6799_v6 = vld [vmem:[%s10388_s2 + $0xc4] sm:$0xf] }
 0x166   :  { %v1888_v10 = vrot.slane %v1855_v8, 6  ;;  %v5800_v8 = vor.u32 %v6801_v5, %v5799_v4  ;;  %v6788_v4 = vld [vmem:[%s10388_s2 + $0x6c] sm:$0xf]  ;;  %v5761_v5 = vld [vmem:[%s10388_s2 + $0x78] sm:$0xf0] }
 0x167   :  { %v1867_v13 = vpop.f32.mrf.mxu2 }
 0x168   :  { %v1868_v14 = vadd.f32 %v1867_v13, %v1666_v9  ;;  %v1891_v17 = vsel %vm280_vm0, %v1842_v63, %v1888_v10  ;;  %v1843_v28 = vpop.f32.mrf.mxu0  ;;  %v5801_v9 = vld [vmem:[%s10388_s2 + $0xd0] sm:$0xf0]  ;;  %v5807_v10 = vld [vmem:[%s10388_s2 + $0xc8] sm:$0xf]  ;;  %2760 = vmatpush.bf16.msrb.mxu0 %v5800_v8  ;;  %v5764_v8 = vor.u32 %v6788_v4, %v5761_v5 }
 0x169   :  { %v5804_v63 = vor.u32 %v6799_v6, %v5801_v9  ;;  %v5785_v28 = vld [vmem:[%s10388_s2 + $0xb0] sm:$0xf0]  ;;  %v5735_v6 = vld [vmem:[%s10388_s2 + $0x40] sm:$0xf]  ;;  %v6785_v9 = vld [vmem:[%s10388_s2 + $0x4c] sm:$0xf0] }
 0x16a   :  { %v1880_v15 = vpop.f32.mrf.mxu3  ;;  %v1889_v19 = vrot.slane %v1868_v14, 4  ;;  %v6800_v14 = vld [vmem:[%s10388_s2 + $0xcc] sm:$0xf] }
 0x16b   :  { %v1881_v18 = vadd.f32 %v1880_v15, %v1667_v11  ;;  %v1856_v20 = vpop.f32.mrf.mxu1  ;;  %v6802_v11 = vld [vmem:[%s10388_s2 + $0xd4] sm:$0xf0]  ;;  %v5809_v15 = vld [vmem:[%s10388_s2 + $0xd8] sm:$0xf0]  ;;  %2773 = vmatpush.bf16.msrb.mxu1 %v5804_v63  ;;  %v5743_v63 = vld [vmem:[%s10388_s2 + $0x48] sm:$0xf] }
 0x16c   :  { %v5808_v13 = vor.u32 %v6802_v11, %v5807_v10  ;;  %v6797_v20 = vld [vmem:[%s10388_s2 + $0xac] sm:$0xf0]  ;;  %v6783_v10 = vld [vmem:[%s10388_s2 + $0x44] sm:$0xf]  ;;  %v5737_v11 = vld [vmem:[%s10388_s2 + $0x50] sm:$0xf0] }
 0x16d   :  { %v1890_v23 = vrot.slane %v1881_v18, 2  ;;  %v5812_v18 = vor.u32 %v6800_v14, %v5809_v15  ;;  %v6784_v14 = vld [vmem:[%s10388_s2 + $0x4c] sm:$0xf]  ;;  %v5736_v15 = vor.u32 %v6785_v9, %v5735_v6 }
 0x16e   :  { %2786 = vmatpush.bf16.msrb.mxu2 %v5808_v13  ;;  %v6786_v13 = vld [vmem:[%s10388_s2 + $0x54] sm:$0xf0] }
 0x16f   :  { %v1892_v25 = vsel %vm282_vm1, %v1889_v19, %v1890_v23  ;;  %v1869_v30 = vpop.f32.mrf.mxu2  ;;  %v5783_v19 = vld [vmem:[%s10388_s2 + $0xa0] sm:$0xf]  ;;  %v6795_v23 = vld [vmem:[%s10388_s2 + $0xa4] sm:$0xf]  ;;  %2799 = vmatpush.bf16.msrb.mxu3 %v5812_v18 }
 0x170   :  { %v9112_v29 = vsel %vm284_vm2, %v1891_v17, %v1892_v25  ;;  %v5784_v25 = vor.u32 %v6797_v20, %v5783_v19  ;;  %v5791_v30 = vld [vmem:[%s10388_s2 + $0xa8] sm:$0xf]  ;;  %v5788_v32 = vor.u32 %v6795_v23, %v5785_v28  ;;  %v5719_v18 = vld [vmem:[%s10388_s2 + $0x20] sm:$0xf]  ;;  %v5744_v28 = vor.u32 %v6786_v13, %v5743_v63 }
 0x172   :  { %v1882_v31 = vpop.f32.mrf.mxu3  ;;  %2761 = vmatpush.bf16.msrb.mxu0 %v5784_v25  ;;  %2774 = vmatpush.bf16.msrb.mxu1 %v5788_v32 }
 0x173   :  { %v6798_v31 = vld [vmem:[%s10388_s2 + $0xb4] sm:$0xf0] }
 0x180   :  { %v2109_v26 = vpop.f32.mrf.mxu0 }
 0x181   :  { %v2110_v27 = vadd.f32 %v2109_v26, %v1932_v34  ;;  %v5793_v34 = vld [vmem:[%s10388_s2 + $0xb8] sm:$0xf0]  ;;  %v5769_v26 = vld [vmem:[%s10388_s2 + $0x90] sm:$0xf0] }
 0x183   :  { %v2122_v1 = vpop.f32.mrf.mxu1 }
 0x184   :  { %v2123_v35 = vadd.f32 %v2122_v1, %v1933_v33  ;;  %v5792_v33 = vor.u32 %v6798_v31, %v5791_v30  ;;  %v6796_v1 = vld [vmem:[%s10388_s2 + $0xac] sm:$0xf]  ;;  %v6781_v30 = vld [vmem:[%s10388_s2 + $0x2c] sm:$0xf0] }
 0x186   :  { %v2156_v22 = vrot.slane %v2123_v35, 6  ;;  %v5767_v35 = vld [vmem:[%s10388_s2 + $0x80] sm:$0xf]  ;;  %2787 = vmatpush.bf16.msrb.mxu2 %v5792_v33  ;;  %v6779_v33 = vld [vmem:[%s10388_s2 + $0x24] sm:$0xf] }
 0x187   :  { %v2135_v38 = vpop.f32.mrf.mxu2 }
 0x188   :  { %v2136_v39 = vadd.f32 %v2135_v38, %v1934_v36  ;;  %v2159_v21 = vsel %vm280_vm0, %v2110_v27, %v2156_v22  ;;  %v2111_v45 = vpop.f32.mrf.mxu0  ;;  %v5796_v36 = vor.u32 %v6796_v1, %v5793_v34  ;;  %v6793_v22 = vld [vmem:[%s10388_s2 + $0x8c] sm:$0xf0]  ;;  %v5721_v1 = vld [vmem:[%s10388_s2 + $0x30] sm:$0xf0]  ;;  %v5727_v34 = vld [vmem:[%s10388_s2 + $0x28] sm:$0xf] }
 0x189   :  { %v5768_v38 = vor.u32 %v6793_v22, %v5767_v35  ;;  %v5777_v45 = vld [vmem:[%s10388_s2 + $0x98] sm:$0xf0]  ;;  %v6782_v22 = vld [vmem:[%s10388_s2 + $0x34] sm:$0xf0] }
 0x18a   :  { %v2148_v40 = vpop.f32.mrf.mxu3  ;;  %v2157_v58 = vrot.slane %v2136_v39, 4  ;;  %2800 = vmatpush.bf16.msrb.mxu3 %v5796_v36 }
 0x18b   :  { %v2149_v41 = vadd.f32 %v2148_v40, %v1935_v37  ;;  %v2124_v42 = vpop.f32.mrf.mxu1  ;;  %v6791_v37 = vld [vmem:[%s10388_s2 + $0x84] sm:$0xf]  ;;  %v5775_v40 = vld [vmem:[%s10388_s2 + $0x88] sm:$0xf]  ;;  %2762 = vmatpush.bf16.msrb.mxu0 %v5768_v38  ;;  %v5724_v38 = vor.u32 %v6779_v33, %v5721_v1 }
 0x18c   :  { %v5772_v39 = vor.u32 %v6791_v37, %v5769_v26  ;;  %v5720_v37 = vor.u32 %v6781_v30, %v5719_v18  ;;  %v6780_v26 = vld [vmem:[%s10388_s2 + $0x2c] sm:$0xf] }
 0x18d   :  { %v2158_v43 = vrot.slane %v2149_v41, 2  ;;  %v6792_v41 = vld [vmem:[%s10388_s2 + $0x8c] sm:$0xf] }
 0x18e   :  { %v5780_v50 = vor.u32 %v6792_v41, %v5777_v45  ;;  %2775 = vmatpush.bf16.msrb.mxu1 %v5772_v39  ;;  %v5728_v39 = vor.u32 %v6782_v22, %v5727_v34  ;;  %v6775_v41 = vld [vmem:[%s10388_s2 + $0x4] sm:$0xf]  ;;  %v6776_v45 = vld [vmem:[%s10388_s2 + $0xc] sm:$0xf] }
 0x18f   :  { %v2160_v44 = vsel %vm282_vm1, %v2157_v58, %v2158_v43  ;;  %v2137_v47 = vpop.f32.mrf.mxu2 }
 0x190   :  { %v9120_v46 = vsel %vm284_vm2, %v2159_v21, %v2160_v44  ;;  %v6794_v21 = vld [vmem:[%s10388_s2 + $0x94] sm:$0xf0]  ;;  %v5751_v47 = vld [vmem:[%s10388_s2 + $0x60] sm:$0xf]  ;;  %2801 = vmatpush.bf16.msrb.mxu3 %v5780_v50 }
 0x191   :  { %v5776_v44 = vor.u32 %v6794_v21, %v5775_v40  ;;  %v5752_v56 = vor.u32 %v6789_v53, %v5751_v47  ;;  %v5703_v40 = vld [vmem:[%s10388_s2] sm:$0xf]  ;;  %v6777_v21 = vld [vmem:[%s10388_s2 + $0xc] sm:$0xf0]  ;;  %v5713_v47 = vld [vmem:[%s10388_s2 + $0x18] sm:$0xf0] }
 0x192   :  { %v2150_v48 = vpop.f32.mrf.mxu3  ;;  %2776 = vmatpush.bf16.msrb.mxu1 %v5756_v2 }
 0x193   :  { %2788 = vmatpush.bf16.msrb.mxu2 %v5776_v44  ;;  %2763 = vmatpush.bf16.msrb.mxu0 %v5752_v56  ;;  %v6778_v44 = vld [vmem:[%s10388_s2 + $0x14] sm:$0xf0] }
 0x194   :  { %2802 = vmatpush.bf16.msrb.mxu3 %v5764_v8 }
 0x197   :  { %2789 = vmatpush.bf16.msrb.mxu2 %v5760_v3  ;;  %2764 = vmatpush.bf16.msrb.mxu0 %v5736_v15 }
 0x19b   :  { %2790 = vmatpush.bf16.msrb.mxu2 %v5744_v28  ;;  %2765 = vmatpush.bf16.msrb.mxu0 %v5720_v37 }
 0x19f   :  { %2791 = vmatpush.bf16.msrb.mxu2 %v5728_v39  ;;  %v5946_v39 = vld [vmem:[%s10388_s2 + $0xe0] sm:$0xf] }
 0x1a0   :  { %v2439_v7 = vpop.f32.mrf.mxu0 }
 0x1a1   :  { %v2452_v12 = vpop.f32.mrf.mxu1 }
 0x1a2   :  { %v2486_v17 = vrot.slane %v2452_v12, 6 }
 0x1a4   :  { %v2489_v55 = vsel %vm280_vm0, %v2439_v7, %v2486_v17  ;;  %v5740_v17 = vor.u32 %v6783_v10, %v5737_v11 }
 0x1a6   :  { %2777 = vmatpush.bf16.msrb.mxu1 %v5740_v17 }
 0x1a7   :  { %v2465_v27 = vpop.f32.mrf.mxu2 }
 0x1a8   :  { %v2487_v58 = vrot.slane %v2465_v27, 4  ;;  %v2478_v42 = vpop.f32.mrf.mxu3  ;;  %v2441_v43 = vpop.f32.mrf.mxu0  ;;  %v5729_v27 = vld [vmem:[%s10388_s2 + $0x38] sm:$0xf0] }
 0x1a9   :  { %v2488_v48 = vrot.slane %v2478_v42, 2  ;;  %v2454_v49 = vpop.f32.mrf.mxu1  ;;  %v5705_v42 = vld [vmem:[%s10388_s2 + $0x10] sm:$0xf0]  ;;  %v5711_v43 = vld [vmem:[%s10388_s2 + $0x8] sm:$0xf] }
 0x1aa   :  { %2778 = vmatpush.bf16.msrb.mxu1 %v5724_v38  ;;  %v5708_v50 = vor.u32 %v6775_v41, %v5705_v42  ;;  %v5712_v53 = vor.u32 %v6778_v44, %v5711_v43  ;;  %v5954_v42 = vld [vmem:[%s10388_s2 + $0xe8] sm:$0xf]  ;;  %v6838_v43 = vld [vmem:[%s10388_s2 + $0xf4] sm:$0xf0] }
 0x1ab   :  { %v2490_v61 = vsel %vm282_vm1, %v2487_v58, %v2488_v48  ;;  %v5732_v58 = vor.u32 %v6780_v26, %v5729_v27  ;;  %v5704_v48 = vor.u32 %v6777_v21, %v5703_v40  ;;  %v6837_v40 = vld [vmem:[%s10388_s2 + $0xec] sm:$0xf0]  ;;  %v6835_v21 = vld [vmem:[%s10388_s2 + $0xe4] sm:$0xf] }
 0x1ac   :  { %v2491_v7 = vsel %vm284_vm2, %v2489_v55, %v2490_v61  ;;  %v5716_v55 = vor.u32 %v6776_v45, %v5713_v47  ;;  %2792 = vmatpush.bf16.msrb.mxu2 %v5712_v53  ;;  %v5947_v41 = vor.u32 %v6837_v40, %v5946_v39  ;;  %v5955_v45 = vor.u32 %v6838_v43, %v5954_v42  ;;  %v6836_v47 = vld [vmem:[%s10388_s2 + $0xec] sm:$0xf]  ;;  %v6833_v53 = vld [vmem:[%s10388_s2 + $0xcc] sm:$0xf0]  ;;  %v5890_v43 = vld [vmem:[%s10388_s2 + $0x68] sm:$0xf] }
 0x1ad   :  { %v9258_v12 = vadd.f32 %v2491_v7, %v8619_v51  ;;  %v5745_v51 = vld [vmem:[%s10388_s2 + $0x58] sm:$0xf0]  ;;  %2766 = vmatpush.bf16.msrb.mxu0 %v5704_v48 }
 0x1ae   :  { %v5748_v32 = vor.u32 %v6784_v14, %v5745_v51  ;;  %2779 = vmatpush.bf16.msrb.mxu1 %v5708_v50  ;;  %v5956_v48 = vld [vmem:[%s10388_s2 + $0xf8] sm:$0xf0]  ;;  %v5930_v50 = vld [vmem:[%s10388_s2 + $0xc0] sm:$0xf] }
 0x1af   :  { %v5698_v19 = vmul.f32 -1.442695, %v9258_v12  ;;  %v2514_v20 = vrot.slane %v9258_v12, 2  ;;  %v2538_v23 = vrot.slane %v9258_v12, 6  ;;  %v2467_v25 = vpop.f32.mrf.mxu2  ;;  %v2535_v4 = vrot.slane %v9258_v12, 4 }
 0x1b0   :  { %v2480_v31 = vpop.f32.mrf.mxu3  ;;  %2803 = vmatpush.bf16.msrb.mxu3 %v5748_v32  ;;  %3114 = vmatpush.bf16.msra.mxu2 %v5955_v45  ;;  %v6820_v45 = vld [vmem:[%s10388_s2 + $0x6c] sm:$0xf] }
 0x1b1   :  { %6983 = vpow2.f32 %v5698_v19  ;;  %v5699_v35 = vmul.f32 -1.442695, %v2514_v20  ;;  %v5700_v36 = vmul.f32 -1.442695, %v2538_v23  ;;  %3088 = vmatpush.bf16.msra.mxu0 %v5947_v41  ;;  %v5884_v41 = vld [vmem:[%s10388_s2 + $0x70] sm:$0xf0] }
 0x1b3   :  { %6985 = vpow2.f32 %v5699_v35 }
 0x1b4   :  { %6987 = vpow2.f32 %v5700_v36  ;;  %2804 = vmatpush.bf16.msrb.mxu3 %v5732_v58  ;;  %v5948_v58 = vld [vmem:[%s10388_s2 + $0xf0] sm:$0xf0] }
 0x1b5   :  { %v5951_v44 = vor.u32 %v6835_v21, %v5948_v58  ;;  %v6819_v21 = vld [vmem:[%s10388_s2 + $0x64] sm:$0xf] }
 0x1b7   :  { %v6984_v49 = vpop.eup %6983  ;;  %3101 = vmatpush.bf16.msra.mxu1 %v5951_v44  ;;  %v6822_v44 = vld [vmem:[%s10388_s2 + $0x74] sm:$0xf0] }
 0x1b8   :  { %v2497_v54 = vadd.f32 1.0, %v6984_v49  ;;  %2805 = vmatpush.bf16.msrb.mxu3 %v5716_v55  ;;  %v5959_v49 = vor.u32 %v6836_v47, %v5956_v48  ;;  %v5931_v55 = vor.u32 %v6833_v53, %v5930_v50  ;;  %v5887_v48 = vor.u32 %v6819_v21, %v5884_v41  ;;  %v5892_v50 = vld [vmem:[%s10388_s2 + $0x78] sm:$0xf0]  ;;  %v5866_v53 = vld [vmem:[%s10388_s2 + $0x40] sm:$0xf] }
 0x1b9   :  { %v6986_v56 = vpop.eup %6985 }
 0x1ba   :  { %v6988_v57 = vpop.eup %6987  ;;  %6989 = vrcp.f32 %v2497_v54  ;;  %v2519_v59 = vadd.f32 1.0, %v6986_v56  ;;  %v2509_v8 = vand.u32 2147483648, %v2497_v54  ;;  %v2507_v63 = vand.u32 2147483647, %v2497_v54  ;;  %v5932_v56 = vld [vmem:[%s10388_s2 + $0xd0] sm:$0xf0]  ;;  %3089 = vmatpush.bf16.msra.mxu0 %v5931_v55 }
 0x1bb   :  { %v2543_v60 = vadd.f32 1.0, %v6988_v57  ;;  %vm2503_vm3 = vweird.f32 %v2497_v54  ;;  %v5938_v57 = vld [vmem:[%s10388_s2 + $0xc8] sm:$0xf] }
 0x1bc   :  { %6991 = vrcp.f32 %v2519_v59  ;;  %v2531_v13 = vand.u32 2147483648, %v2519_v59  ;;  %v2529_v17 = vand.u32 2147483647, %v2519_v59  ;;  %v2510_v51 = vor.u32 1.1754944e-38, %v2509_v8  ;;  %3127 = vmatpush.bf16.msra.mxu3 %v5959_v49  ;;  %v5914_v8 = vld [vmem:[%s10388_s2 + $0xa0] sm:$0xf] }
 0x1bd   :  { %6993 = vrcp.f32 %v2543_v60  ;;  %vm2508_vm6 = vcmp.eq.f32.partialorder %v2507_v63, 8.507059e+37  ;;  %vm2525_vm7 = vweird.f32 %v2519_v59  ;;  %v2555_v35 = vand.u32 2147483648, %v2543_v60  ;;  %v5916_v63 = vld [vmem:[%s10388_s2 + $0xb0] sm:$0xf0] }
 0x1be   :  { %6995 = vtanh.f32 %v2535_v4  ;;  %v2532_v23 = vor.u32 1.1754944e-38, %v2531_v13  ;;  %vm2530_vm9 = vcmp.eq.f32.partialorder %v2529_v17, 8.507059e+37  ;;  %vm2549_vm11 = vweird.f32 %v2543_v60  ;;  %v6832_v4 = vld [vmem:[%s10388_s2 + $0xcc] sm:$0xf]  ;;  %v5922_v13 = vld [vmem:[%s10388_s2 + $0xa8] sm:$0xf] }
 0x1bf   :  { %v2553_v36 = vand.u32 2147483647, %v2543_v60  ;;  %v2556_v37 = vor.u32 1.1754944e-38, %v2555_v35  ;;  %v5891_v49 = vor.u32 %v6822_v44, %v5890_v43 }
 0x1c0   :  { %v6990_v61 = vpop.eup %6989 }
 0x1c1   :  { %v2499_v2 = vmul.f32 %v6990_v61, %v2497_v54  ;;  %vm2504_vm15 = vweird.f32 %v6990_v61  ;;  %vm2554_vm13 = vcmp.eq.f32.partialorder %v2553_v36, 8.507059e+37  ;;  %v6831_v54 = vld [vmem:[%s10388_s2 + $0xc4] sm:$0xf] }
 0x1c2   :  { %v6992_v3 = vpop.eup %6991  ;;  %vm2505_vm5 = vmor %vm2503_vm3, %vm2504_vm15 }
 0x1c3   :  { %v6994_v5 = vpop.eup %6993  ;;  %v2500_v6 = vsub.f32 1.0, %v2499_v2  ;;  %v2521_v7 = vmul.f32 %v6992_v3, %v2519_v59  ;;  %vm2526_vm4 = vweird.f32 %v6992_v3  ;;  %v6834_v59 = vld [vmem:[%s10388_s2 + $0xd4] sm:$0xf0]  ;;  %v5935_v2 = vor.u32 %v6831_v54, %v5932_v56  ;;  %v6817_v54 = vld [vmem:[%s10388_s2 + $0x4c] sm:$0xf0] }
 0x1c4   :  { %v2545_v9 = vmul.f32 %v6994_v5, %v2543_v60  ;;  %vm2527_vm8 = vmor %vm2525_vm7, %vm2526_vm4  ;;  %v6996_v28 = vpop.eup %6995  ;;  %vm2550_vm10 = vweird.f32 %v6994_v5  ;;  %v5895_v56 = vor.u32 %v6820_v45, %v5892_v50 }
 0x1c5   :  { %v2522_v10 = vsub.f32 1.0, %v2521_v7  ;;  %v2501_v11 = vmul.f32 %v6990_v61, %v2500_v6  ;;  %vm2551_vm12 = vmor %vm2549_vm11, %vm2550_vm10  ;;  %3102 = vmatpush.bf16.msra.mxu1 %v5935_v2  ;;  %v6818_v2 = vld [vmem:[%s10388_s2 + $0x54] sm:$0xf0] }
 0x1c6   :  { %v2546_v18 = vsub.f32 1.0, %v2545_v9  ;;  %v6829_v9 = vld [vmem:[%s10388_s2 + $0xac] sm:$0xf0] }
 0x1c7   :  { %v2502_v14 = vadd.f32 %v6990_v61, %v2501_v11  ;;  %v2523_v15 = vmul.f32 %v6992_v3, %v2522_v10  ;;  %v6827_v10 = vld [vmem:[%s10388_s2 + $0xa4] sm:$0xf]  ;;  %v5915_v11 = vor.u32 %v6829_v9, %v5914_v8 }
 0x1c8   :  { %v2547_v31 = vmul.f32 %v6994_v5, %v2546_v18  ;;  %v5924_v18 = vld [vmem:[%s10388_s2 + $0xb8] sm:$0xf0] }
 0x1c9   :  { %v2506_v12 = vsel %vm2505_vm5, %v6990_v61, %v2502_v14  ;;  %v2524_v19 = vadd.f32 %v6992_v3, %v2523_v15  ;;  %v6830_v14 = vld [vmem:[%s10388_s2 + $0xb4] sm:$0xf0]  ;;  %v5919_v15 = vor.u32 %v6827_v10, %v5916_v63  ;;  %3090 = vmatpush.bf16.msra.mxu0 %v5915_v11  ;;  %v6811_v63 = vld [vmem:[%s10388_s2 + $0x24] sm:$0xf] }
 0x1ca   :  { %v2511_v20 = vsel %vm2508_vm6, %v2510_v51, %v2506_v12  ;;  %v2548_v34 = vadd.f32 %v6994_v5, %v2547_v31  ;;  %v5923_v17 = vor.u32 %v6830_v14, %v5922_v13  ;;  %v6828_v51 = vld [vmem:[%s10388_s2 + $0xac] sm:$0xf]  ;;  %v5898_v12 = vld [vmem:[%s10388_s2 + $0x80] sm:$0xf]  ;;  %v5906_v31 = vld [vmem:[%s10388_s2 + $0x88] sm:$0xf] }
 0x1cb   :  { %v2528_v25 = vsel %vm2527_vm8, %v6992_v3, %v2524_v19  ;;  %v2560_v33 = vmul.f32 %v6996_v28, %v2511_v20  ;;  %v5939_v3 = vor.u32 %v6834_v59, %v5938_v57  ;;  %v5927_v19 = vor.u32 %v6828_v51, %v5924_v18  ;;  %v6825_v20 = vld [vmem:[%s10388_s2 + $0x8c] sm:$0xf0]  ;;  %3103 = vmatpush.bf16.msra.mxu1 %v5919_v15  ;;  %v6815_v57 = vld [vmem:[%s10388_s2 + $0x44] sm:$0xf]  ;;  %v5868_v59 = vld [vmem:[%s10388_s2 + $0x50] sm:$0xf0] }
 0x1cc   :  { %v2533_v30 = vsel %vm2530_vm9, %v2532_v23, %v2528_v25  ;;  %v2552_v22 = vsel %vm2551_vm12, %v6994_v5, %v2548_v34  ;;  %v5940_v5 = vld [vmem:[%s10388_s2 + $0xd8] sm:$0xf0]  ;;  %v6823_v23 = vld [vmem:[%s10388_s2 + $0x84] sm:$0xf]  ;;  %v5900_v25 = vld [vmem:[%s10388_s2 + $0x90] sm:$0xf0]  ;;  %v5899_v28 = vor.u32 %v6825_v20, %v5898_v12 }
 0x1cd   :  { %v2559_v32 = vmul.f32 %v2533_v30, %v8674_v24  ;;  %v2557_v27 = vsel %vm2554_vm13, %v2556_v37, %v2552_v22  ;;  %v5943_v7 = vor.u32 %v6832_v4, %v5940_v5  ;;  %3115 = vmatpush.bf16.msra.mxu2 %v5939_v3  ;;  %v5903_v30 = vor.u32 %v6823_v23, %v5900_v25  ;;  %v5908_v22 = vld [vmem:[%s10388_s2 + $0x98] sm:$0xf0]  ;;  %v5882_v37 = vld [vmem:[%s10388_s2 + $0x60] sm:$0xf]  ;;  %v6816_v3 = vld [vmem:[%s10388_s2 + $0x4c] sm:$0xf] }
 0x1ce   :  { %3091 = vmatpush.bf16.msra.mxu0 %v5899_v28  ;;  %v5876_v4 = vld [vmem:[%s10388_s2 + $0x58] sm:$0xf0]  ;;  %v5867_v5 = vor.u32 %v6817_v54, %v5866_v53  ;;  %v5858_v51 = vld [vmem:[%s10388_s2 + $0x28] sm:$0xf]  ;;  %v6814_v18 = vld [vmem:[%s10388_s2 + $0x34] sm:$0xf0] }
 0x1cf   :  { %v9325_v1 = vadd.f32 %v2560_v33, %v2559_v32  ;;  %3128 = vmatpush.bf16.msra.mxu3 %v5943_v7  ;;  %v6826_v32 = vld [vmem:[%s10388_s2 + $0x94] sm:$0xf0]  ;;  %v6824_v33 = vld [vmem:[%s10388_s2 + $0x8c] sm:$0xf]  ;;  %3104 = vmatpush.bf16.msra.mxu1 %v5903_v30  ;;  %v6813_v7 = vld [vmem:[%s10388_s2 + $0x2c] sm:$0xf0]  ;;  %v5879_v15 = vor.u32 %v6816_v3, %v5876_v4  ;;  %v5859_v30 = vor.u32 %v6814_v18, %v5858_v51 }
 0x1d0   :  { %v5907_v36 = vor.u32 %v6826_v32, %v5906_v31  ;;  %v5911_v40 = vor.u32 %v6824_v33, %v5908_v22  ;;  %v6812_v20 = vld [vmem:[%s10388_s2 + $0x2c] sm:$0xf]  ;;  %v5860_v25 = vld [vmem:[%s10388_s2 + $0x38] sm:$0xf0]  ;;  %v5834_v31 = vld [vmem:[%s10388_s2] sm:$0xf] }
 0x1d1   :  { %6997 = vtanh.f32 %v9325_v1  ;;  %3116 = vmatpush.bf16.msra.mxu2 %v5923_v17  ;;  %v5852_v17 = vld [vmem:[%s10388_s2 + $0x30] sm:$0xf0]  ;;  %v6809_v32 = vld [vmem:[%s10388_s2 + $0xc] sm:$0xf0]  ;;  %v6807_v33 = vld [vmem:[%s10388_s2 + $0x4] sm:$0xf] }
 0x1d2   :  { %v5855_v28 = vor.u32 %v6811_v63, %v5852_v17  ;;  %v6810_v22 = vld [vmem:[%s10388_s2 + $0x14] sm:$0xf0] }
 0x1d3   :  { %3129 = vmatpush.bf16.msra.mxu3 %v5927_v19  ;;  %3105 = vmatpush.bf16.msra.mxu1 %v5887_v48 }
 0x1d5   :  { %3117 = vmatpush.bf16.msra.mxu2 %v5907_v36  ;;  %v5842_v36 = vld [vmem:[%s10388_s2 + $0x8] sm:$0xf] }
 0x1d7   :  { %v6998_v26 = vpop.eup %6997  ;;  %3130 = vmatpush.bf16.msra.mxu3 %v5911_v40 }
 0x1d8   :  { %v2563_v38 = vmul.f32 %v6998_v26, %v2557_v27  ;;  %v6821_v26 = vld [vmem:[%s10388_s2 + $0x6c] sm:$0xf0] }
 0x1d9   :  { %v5883_v42 = vor.u32 %v6821_v26, %v5882_v37  ;;  %3118 = vmatpush.bf16.msra.mxu2 %v5891_v49  ;;  %v6808_v37 = vld [vmem:[%s10388_s2 + $0xc] sm:$0xf]  ;;  %v5844_v26 = vld [vmem:[%s10388_s2 + $0x18] sm:$0xf0] }
 0x1da   :  { %2564 = vst [vmem:[%s10387_s4 + $0x2] sm:$0x3] %v2563_v38  ;;  %v2566_v24 = vpack.c.bf16 %v2563_v38, %v2563_v38  ;;  %v5847_v21 = vor.u32 %v6808_v37, %v5844_v26  ;;  %v6868_v37 = vld [vmem:[%s10388_s2 + $0xec] sm:$0xf]  ;;  %v6087_v26 = vld [vmem:[%s10388_s2 + $0xf8] sm:$0xf0] }
 0x1db   :  { %3092 = vmatpush.bf16.msra.mxu0 %v5883_v42  ;;  %3131 = vmatpush.bf16.msra.mxu3 %v5895_v56 }
 0x1dc   :  { %2767 = vmatmul.bf16.vlgmr.msrb.gmra.mxu0 %v2566_v24  ;;  %2780 = vmatmul.bf16.vlgmr.msrb.gmra.mxu1 %v2566_v24 }
 0x1dd   :  { %2793 = vmatmul.bf16.vlgmr.msrb.gmra.mxu2 %v2566_v24  ;;  %2806 = vmatmul.bf16.vlgmr.msrb.gmra.mxu3 %v2566_v24 }
 0x1df   :  { %3093 = vmatpush.bf16.msra.mxu0 %v5867_v5  ;;  %3132 = vmatpush.bf16.msra.mxu3 %v5879_v15 }
 0x259   :  { %v2768_v60 = vpop.f32.mrf.mxu0  ;;  %v2781_v61 = vpop.f32.mrf.mxu1 }
 0x25a   :  { %v2815_v6 = vrot.slane %v2781_v61, 6 }
 0x25c   :  { %v2818_v58 = vsel %vm280_vm0, %v2768_v60, %v2815_v6  ;;  %v5874_v60 = vld [vmem:[%s10388_s2 + $0x48] sm:$0xf]  ;;  %v5871_v6 = vor.u32 %v6815_v57, %v5868_v59 }
 0x25d   :  { %v5875_v11 = vor.u32 %v6818_v2, %v5874_v60 }
 0x25e   :  { %3106 = vmatpush.bf16.msra.mxu1 %v5871_v6 }
 0x25f   :  { %3119 = vmatpush.bf16.msra.mxu2 %v5875_v11 }
 0x260   :  { %v2794_v34 = vpop.f32.mrf.mxu2  ;;  %v2807_v35 = vpop.f32.mrf.mxu3 }
 0x261   :  { %v2816_v27 = vrot.slane %v2794_v34, 4  ;;  %v2817_v38 = vrot.slane %v2807_v35, 2  ;;  %v2770_v24 = vpop.f32.mrf.mxu0  ;;  %v2783_v39 = vpop.f32.mrf.mxu1  ;;  %v5863_v34 = vor.u32 %v6812_v20, %v5860_v25  ;;  %v5836_v35 = vld [vmem:[%s10388_s2 + $0x10] sm:$0xf0] }
 0x262   :  { %3107 = vmatpush.bf16.msra.mxu1 %v5855_v28  ;;  %v5839_v24 = vor.u32 %v6807_v33, %v5836_v35  ;;  %v5843_v39 = vor.u32 %v6810_v22, %v5842_v36  ;;  %v6077_v28 = vld [vmem:[%s10388_s2 + $0xe0] sm:$0xf]  ;;  %v6079_v33 = vld [vmem:[%s10388_s2 + $0xf0] sm:$0xf0]  ;;  %v6870_v35 = vld [vmem:[%s10388_s2 + $0xf4] sm:$0xf0] }
 0x263   :  { %v2819_v47 = vsel %vm282_vm1, %v2816_v27, %v2817_v38  ;;  %v5835_v27 = vor.u32 %v6809_v32, %v5834_v31  ;;  %3120 = vmatpush.bf16.msra.mxu2 %v5859_v30  ;;  %3133 = vmatpush.bf16.msra.mxu3 %v5863_v34  ;;  %v6869_v30 = vld [vmem:[%s10388_s2 + $0xec] sm:$0xf0]  ;;  %v6867_v31 = vld [vmem:[%s10388_s2 + $0xe4] sm:$0xf]  ;;  %v6085_v34 = vld [vmem:[%s10388_s2 + $0xe8] sm:$0xf] }
 0x264   :  { %v2820_v55 = vsel %vm284_vm2, %v2818_v58, %v2819_v47  ;;  %v6078_v32 = vor.u32 %v6869_v30, %v6077_v28  ;;  %v6082_v36 = vor.u32 %v6867_v31, %v6079_v33  ;;  %v6086_v22 = vor.u32 %v6870_v35, %v6085_v34  ;;  %v6851_v30 = vld [vmem:[%s10388_s2 + $0x64] sm:$0xf]  ;;  %v6015_v31 = vld [vmem:[%s10388_s2 + $0x70] sm:$0xf0]  ;;  %v6021_v34 = vld [vmem:[%s10388_s2 + $0x68] sm:$0xf] }
 0x265   :  { %v9470_v61 = vadd.f32 %v2820_v55, %v8859_v62  ;;  %v5850_v62 = vld [vmem:[%s10388_s2 + $0x20] sm:$0xf]  ;;  %v6854_v35 = vld [vmem:[%s10388_s2 + $0x74] sm:$0xf0] }
 0x266   :  { %v5851_v23 = vor.u32 %v6813_v7, %v5850_v62  ;;  %3108 = vmatpush.bf16.msra.mxu1 %v5839_v24  ;;  %v6865_v24 = vld [vmem:[%s10388_s2 + $0xcc] sm:$0xf0] }
 0x267   :  { %v5829_v8 = vmul.f32 -1.442695, %v9470_v61  ;;  %v2843_v9 = vrot.slane %v9470_v61, 2  ;;  %v2867_v10 = vrot.slane %v9470_v61, 6  ;;  %3121 = vmatpush.bf16.msra.mxu2 %v5843_v39  ;;  %3134 = vmatpush.bf16.msra.mxu3 %v5847_v21  ;;  %v2864_v48 = vrot.slane %v9470_v61, 4 }
 0x268   :  { %v2796_v13 = vpop.f32.mrf.mxu2  ;;  %v2809_v14 = vpop.f32.mrf.mxu3  ;;  %3094 = vmatpush.bf16.msra.mxu0 %v5851_v23  ;;  %v6863_v39 = vld [vmem:[%s10388_s2 + $0xc4] sm:$0xf]  ;;  %v6063_v21 = vld [vmem:[%s10388_s2 + $0xd0] sm:$0xf0] }
 0x269   :  { %6999 = vpow2.f32 %v5829_v8  ;;  %v5830_v12 = vmul.f32 -1.442695, %v2843_v9  ;;  %v5831_v19 = vmul.f32 -1.442695, %v2867_v10 }
 0x26a   :  { %3430 = vmatpush.bf16.msrb.mxu1 %v6082_v36  ;;  %v6852_v36 = vld [vmem:[%s10388_s2 + $0x6c] sm:$0xf] }
 0x26b   :  { %7001 = vpow2.f32 %v5830_v12  ;;  %3443 = vmatpush.bf16.msrb.mxu2 %v6086_v22 }
 0x26c   :  { %7003 = vpow2.f32 %v5831_v19  ;;  %3095 = vmatpush.bf16.msra.mxu0 %v5835_v27  ;;  %v6090_v27 = vor.u32 %v6868_v37, %v6087_v26  ;;  %v6018_v37 = vor.u32 %v6851_v30, %v6015_v31  ;;  %v6022_v26 = vor.u32 %v6854_v35, %v6021_v34 }
 0x26e   :  { %3456 = vmatpush.bf16.msrb.mxu3 %v6090_v27  ;;  %v6023_v27 = vld [vmem:[%s10388_s2 + $0x78] sm:$0xf0] }
 0x26f   :  { %v7000_v38 = vpop.eup %6999 }
 0x270   :  { %v2826_v40 = vadd.f32 1.0, %v7000_v38  ;;  %3417 = vmatpush.bf16.msrb.mxu0 %v6078_v32  ;;  %v6061_v38 = vld [vmem:[%s10388_s2 + $0xc0] sm:$0xf] }
 0x271   :  { %v7002_v41 = vpop.eup %7001 }
 0x272   :  { %v7004_v58 = vpop.eup %7003  ;;  %7005 = vrcp.f32 %v2826_v40  ;;  %v2848_v42 = vadd.f32 1.0, %v7002_v41  ;;  %v2838_v54 = vand.u32 2147483648, %v2826_v40  ;;  %v2836_v59 = vand.u32 2147483647, %v2826_v40  ;;  %v6069_v41 = vld [vmem:[%s10388_s2 + $0xc8] sm:$0xf] }
 0x273   :  { %v2872_v43 = vadd.f32 1.0, %v7004_v58  ;;  %vm2832_vm15 = vweird.f32 %v2826_v40  ;;  %v6866_v58 = vld [vmem:[%s10388_s2 + $0xd4] sm:$0xf0] }
 0x274   :  { %7007 = vrcp.f32 %v2848_v42  ;;  %v2860_v60 = vand.u32 2147483648, %v2848_v42  ;;  %v2858_v4 = vand.u32 2147483647, %v2848_v42  ;;  %v2839_v5 = vor.u32 1.1754944e-38, %v2838_v54  ;;  %v6861_v54 = vld [vmem:[%s10388_s2 + $0xac] sm:$0xf0] }
 0x275   :  { %7009 = vrcp.f32 %v2872_v43  ;;  %vm2837_vm5 = vcmp.eq.f32.partialorder %v2836_v59, 8.507059e+37  ;;  %vm2854_vm6 = vweird.f32 %v2848_v42  ;;  %v2884_v51 = vand.u32 2147483648, %v2872_v43  ;;  %v6053_v59 = vld [vmem:[%s10388_s2 + $0xa8] sm:$0xf] }
 0x276   :  { %7011 = vtanh.f32 %v2864_v48  ;;  %v2861_v8 = vor.u32 1.1754944e-38, %v2860_v60  ;;  %vm2859_vm8 = vcmp.eq.f32.partialorder %v2858_v4, 8.507059e+37  ;;  %vm2878_vm10 = vweird.f32 %v2872_v43  ;;  %v6071_v48 = vld [vmem:[%s10388_s2 + $0xd8] sm:$0xf0]  ;;  %v6862_v60 = vld [vmem:[%s10388_s2 + $0xb4] sm:$0xf0] }
 0x277   :  { %v2882_v18 = vand.u32 2147483647, %v2872_v43  ;;  %v2885_v19 = vor.u32 1.1754944e-38, %v2884_v51  ;;  %v6860_v4 = vld [vmem:[%s10388_s2 + $0xac] sm:$0xf] }
 0x278   :  { %v7006_v44 = vpop.eup %7005 }
 0x279   :  { %v2828_v45 = vmul.f32 %v7006_v44, %v2826_v40  ;;  %vm2833_vm14 = vweird.f32 %v7006_v44  ;;  %vm2883_vm12 = vcmp.eq.f32.partialorder %v2882_v18, 8.507059e+37  ;;  %v6062_v40 = vor.u32 %v6865_v24, %v6061_v38  ;;  %v6039_v18 = vld [vmem:[%s10388_s2 + $0x98] sm:$0xf0]  ;;  %v5997_v38 = vld [vmem:[%s10388_s2 + $0x40] sm:$0xf] }
 0x27a   :  { %v7008_v47 = vpop.eup %7007  ;;  %vm2834_vm4 = vmor %vm2832_vm15, %vm2833_vm14  ;;  %v6849_v24 = vld [vmem:[%s10388_s2 + $0x4c] sm:$0xf0] }
 0x27b   :  { %v7010_v49 = vpop.eup %7009  ;;  %v2829_v50 = vsub.f32 1.0, %v2828_v45  ;;  %v2850_v53 = vmul.f32 %v7008_v47, %v2848_v42  ;;  %vm2855_vm3 = vweird.f32 %v7008_v47  ;;  %v6070_v45 = vor.u32 %v6866_v58, %v6069_v41  ;;  %3418 = vmatpush.bf16.msrb.mxu0 %v6062_v40  ;;  %v5999_v41 = vld [vmem:[%s10388_s2 + $0x50] sm:$0xf0]  ;;  %v6005_v58 = vld [vmem:[%s10388_s2 + $0x48] sm:$0xf] }
 0x27c   :  { %v2874_v55 = vmul.f32 %v7010_v49, %v2872_v43  ;;  %vm2856_vm7 = vmor %vm2854_vm6, %vm2855_vm3  ;;  %v7012_v10 = vpop.eup %7011  ;;  %vm2879_vm9 = vweird.f32 %v7010_v49  ;;  %v6026_v40 = vor.u32 %v6852_v36, %v6023_v27 }
 0x27d   :  { %v2851_v56 = vsub.f32 1.0, %v2850_v53  ;;  %v2830_v57 = vmul.f32 %v7006_v44, %v2829_v50  ;;  %vm2880_vm11 = vmor %vm2878_vm10, %vm2879_vm9  ;;  %3444 = vmatpush.bf16.msrb.mxu2 %v6070_v45  ;;  %v6045_v53 = vld [vmem:[%s10388_s2 + $0xa0] sm:$0xf]  ;;  %v6007_v45 = vld [vmem:[%s10388_s2 + $0x58] sm:$0xf0] }
 0x27e   :  { %v2875_v6 = vsub.f32 1.0, %v2874_v55  ;;  %v6859_v55 = vld [vmem:[%s10388_s2 + $0xa4] sm:$0xf] }
 0x27f   :  { %v2831_v2 = vadd.f32 %v7006_v44, %v2830_v57  ;;  %v2852_v3 = vmul.f32 %v7008_v47, %v2851_v56  ;;  %v6046_v56 = vor.u32 %v6861_v54, %v6045_v53  ;;  %v6047_v57 = vld [vmem:[%s10388_s2 + $0xb0] sm:$0xf0] }
 0x280   :  { %v2876_v63 = vmul.f32 %v7010_v49, %v2875_v6  ;;  %v6029_v6 = vld [vmem:[%s10388_s2 + $0x80] sm:$0xf] }
 0x281   :  { %v2835_v61 = vsel %vm2834_vm4, %v7006_v44, %v2831_v2  ;;  %v2853_v62 = vadd.f32 %v7008_v47, %v2852_v3  ;;  %v6066_v44 = vor.u32 %v6863_v39, %v6063_v21  ;;  %v6050_v2 = vor.u32 %v6859_v55, %v6047_v57  ;;  %3419 = vmatpush.bf16.msrb.mxu0 %v6046_v56  ;;  %v6847_v21 = vld [vmem:[%s10388_s2 + $0x44] sm:$0xf] }
 0x282   :  { %v2840_v7 = vsel %vm2837_vm5, %v2839_v5, %v2835_v61  ;;  %v2877_v17 = vadd.f32 %v7010_v49, %v2876_v63  ;;  %v6054_v3 = vor.u32 %v6862_v60, %v6053_v59  ;;  %v6055_v5 = vld [vmem:[%s10388_s2 + $0xb8] sm:$0xf0]  ;;  %v6858_v63 = vld [vmem:[%s10388_s2 + $0x94] sm:$0xf0]  ;;  %v6843_v56 = vld [vmem:[%s10388_s2 + $0x24] sm:$0xf] }
 0x283   :  { %v2857_v9 = vsel %vm2856_vm7, %v7008_v47, %v2853_v62  ;;  %v2889_v14 = vmul.f32 %v7012_v10, %v2840_v7  ;;  %v6864_v47 = vld [vmem:[%s10388_s2 + $0xcc] sm:$0xf]  ;;  %3431 = vmatpush.bf16.msrb.mxu1 %v6066_v44  ;;  %v6058_v61 = vor.u32 %v6860_v4, %v6055_v5  ;;  %v6857_v62 = vld [vmem:[%s10388_s2 + $0x8c] sm:$0xf0]  ;;  %v6855_v7 = vld [vmem:[%s10388_s2 + $0x84] sm:$0xf] }
 0x284   :  { %v2862_v11 = vsel %vm2859_vm8, %v2861_v8, %v2857_v9  ;;  %v2881_v12 = vsel %vm2880_vm11, %v7010_v49, %v2877_v17  ;;  %v6074_v50 = vor.u32 %v6864_v47, %v6071_v48  ;;  %v6031_v8 = vld [vmem:[%s10388_s2 + $0x90] sm:$0xf0]  ;;  %3445 = vmatpush.bf16.msrb.mxu2 %v6054_v3  ;;  %v6030_v9 = vor.u32 %v6857_v62, %v6029_v6  ;;  %v6848_v44 = vld [vmem:[%s10388_s2 + $0x4c] sm:$0xf]  ;;  %v5989_v3 = vld [vmem:[%s10388_s2 + $0x28] sm:$0xf] }
 0x285   :  { %v2888_v13 = vmul.f32 %v2862_v11, %v9325_v1  ;;  %v2886_v23 = vsel %vm2883_vm12, %v2885_v19, %v2881_v12  ;;  %v6034_v10 = vor.u32 %v6855_v7, %v6031_v8  ;;  %v6037_v11 = vld [vmem:[%s10388_s2 + $0x88] sm:$0xf]  ;;  %v6013_v12 = vld [vmem:[%s10388_s2 + $0x60] sm:$0xf]  ;;  %v6853_v19 = vld [vmem:[%s10388_s2 + $0x6c] sm:$0xf0]  ;;  %v5998_v47 = vor.u32 %v6849_v24, %v5997_v38 }
 0x286   :  { %3457 = vmatpush.bf16.msrb.mxu3 %v6074_v50  ;;  %v6038_v51 = vor.u32 %v6858_v63, %v6037_v11  ;;  %3420 = vmatpush.bf16.msrb.mxu0 %v6030_v9  ;;  %v6014_v33 = vor.u32 %v6853_v19, %v6013_v12  ;;  %v6002_v48 = vor.u32 %v6847_v21, %v5999_v41  ;;  %v6846_v4 = vld [vmem:[%s10388_s2 + $0x34] sm:$0xf0]  ;;  %v5991_v7 = vld [vmem:[%s10388_s2 + $0x38] sm:$0xf0]  ;;  %v6841_v11 = vld [vmem:[%s10388_s2 + $0xc] sm:$0xf0] }
 0x287   :  { %v9534_v15 = vadd.f32 %v2889_v14, %v2888_v13  ;;  %3432 = vmatpush.bf16.msrb.mxu1 %v6050_v2  ;;  %v6856_v13 = vld [vmem:[%s10388_s2 + $0x8c] sm:$0xf]  ;;  %v6010_v60 = vor.u32 %v6848_v44, %v6007_v45  ;;  %v5983_v2 = vld [vmem:[%s10388_s2 + $0x30] sm:$0xf0]  ;;  %v5990_v9 = vor.u32 %v6846_v4, %v5989_v3  ;;  %v6839_v63 = vld [vmem:[%s10388_s2 + $0x4] sm:$0xf] }
 0x288   :  { %v6042_v28 = vor.u32 %v6856_v13, %v6039_v18  ;;  %3446 = vmatpush.bf16.msrb.mxu2 %v6038_v51  ;;  %v5986_v8 = vor.u32 %v6843_v56, %v5983_v2  ;;  %v6842_v51 = vld [vmem:[%s10388_s2 + $0x14] sm:$0xf0]  ;;  %v6840_v18 = vld [vmem:[%s10388_s2 + $0xc] sm:$0xf]  ;;  %v5975_v12 = vld [vmem:[%s10388_s2 + $0x18] sm:$0xf0] }
 0x289   :  { %7013 = vtanh.f32 %v9534_v15 }
 0x28a   :  { %3458 = vmatpush.bf16.msrb.mxu3 %v6058_v61  ;;  %3421 = vmatpush.bf16.msrb.mxu0 %v6014_v33  ;;  %v6844_v61 = vld [vmem:[%s10388_s2 + $0x2c] sm:$0xf] }
 0x28b   :  { %3433 = vmatpush.bf16.msrb.mxu1 %v6034_v10  ;;  %v5965_v10 = vld [vmem:[%s10388_s2] sm:$0xf]  ;;  %v5994_v13 = vor.u32 %v6844_v61, %v5991_v7 }
 0x28c   :  { %3447 = vmatpush.bf16.msrb.mxu2 %v6022_v26  ;;  %v5966_v19 = vor.u32 %v6841_v11, %v5965_v10  ;;  %v6208_v7 = vld [vmem:[%s10388_s2 + $0xe0] sm:$0xf]  ;;  %v6210_v11 = vld [vmem:[%s10388_s2 + $0xf0] sm:$0xf0] }
 0x28e   :  { %3459 = vmatpush.bf16.msrb.mxu3 %v6042_v28  ;;  %3422 = vmatpush.bf16.msrb.mxu0 %v5998_v47  ;;  %v5978_v28 = vor.u32 %v6840_v18, %v5975_v12  ;;  %v6218_v18 = vld [vmem:[%s10388_s2 + $0xf8] sm:$0xf0] }
 0x28f   :  { %v7014_v20 = vpop.eup %7013  ;;  %3434 = vmatpush.bf16.msrb.mxu1 %v6018_v37 }
 0x290   :  { %v2892_v25 = vmul.f32 %v7014_v20, %v2886_v23 }
 0x292   :  { %2893 = vst [vmem:[%s10387_s4 + $0x4] sm:$0x3] %v2892_v25  ;;  %v2895_v1 = vpack.c.bf16 %v2892_v25, %v2892_v25  ;;  %3460 = vmatpush.bf16.msrb.mxu3 %v6026_v40 }
 0x293   :  { %3435 = vmatpush.bf16.msrb.mxu1 %v6002_v48 }
 0x294   :  { %3096 = vmatmul.bf16.vlgmr.msra.gmra.mxu0 %v2895_v1  ;;  %3109 = vmatmul.bf16.vlgmr.msra.gmra.mxu1 %v2895_v1 }
 0x295   :  { %3122 = vmatmul.bf16.vlgmr.msra.gmra.mxu2 %v2895_v1  ;;  %3135 = vmatmul.bf16.vlgmr.msra.gmra.mxu3 %v2895_v1 }
 0x296   :  { %3461 = vmatpush.bf16.msrb.mxu3 %v6010_v60 }
 0x297   :  { %3436 = vmatpush.bf16.msrb.mxu1 %v5986_v8  ;;  %v6901_v8 = vld [vmem:[%s10388_s2 + $0xec] sm:$0xf0] }
 0x298   :  { %v6209_v10 = vor.u32 %v6901_v8, %v6208_v7  ;;  %v6144_v7 = vld [vmem:[%s10388_s2 + $0x60] sm:$0xf]  ;;  %v6885_v8 = vld [vmem:[%s10388_s2 + $0x6c] sm:$0xf0] }
 0x29a   :  { %3462 = vmatpush.bf16.msrb.mxu3 %v5994_v13  ;;  %v6902_v13 = vld [vmem:[%s10388_s2 + $0xf4] sm:$0xf0] }
 0x29e   :  { %3463 = vmatpush.bf16.msrb.mxu3 %v5978_v28 }
 0x311   :  { %v3097_v42 = vpop.f32.mrf.mxu0  ;;  %v3110_v43 = vpop.f32.mrf.mxu1 }
 0x312   :  { %v3144_v49 = vrot.slane %v3110_v43, 6  ;;  %v6850_v43 = vld [vmem:[%s10388_s2 + $0x54] sm:$0xf0] }
 0x313   :  { %v6006_v55 = vor.u32 %v6850_v43, %v6005_v58 }
 0x314   :  { %v3147_v32 = vsel %vm280_vm0, %v3097_v42, %v3144_v49  ;;  %v6845_v49 = vld [vmem:[%s10388_s2 + $0x2c] sm:$0xf0] }
 0x315   :  { %3448 = vmatpush.bf16.msrb.mxu2 %v6006_v55 }
 0x318   :  { %v3123_v14 = vpop.f32.mrf.mxu2  ;;  %v3136_v17 = vpop.f32.mrf.mxu3 }
 0x319   :  { %v3145_v20 = vrot.slane %v3123_v14, 4  ;;  %v3146_v23 = vrot.slane %v3136_v17, 2  ;;  %v3099_v25 = vpop.f32.mrf.mxu0  ;;  %v3112_v1 = vpop.f32.mrf.mxu1  ;;  %v5967_v14 = vld [vmem:[%s10388_s2 + $0x10] sm:$0xf0]  ;;  %v5973_v17 = vld [vmem:[%s10388_s2 + $0x8] sm:$0xf]  ;;  %3449 = vmatpush.bf16.msrb.mxu2 %v5990_v9 }
 0x31a   :  { %v5974_v25 = vor.u32 %v6842_v51, %v5973_v17  ;;  %v6899_v9 = vld [vmem:[%s10388_s2 + $0xe4] sm:$0xf]  ;;  %v6900_v51 = vld [vmem:[%s10388_s2 + $0xec] sm:$0xf] }
 0x31b   :  { %v3148_v22 = vsel %vm282_vm1, %v3145_v20, %v3146_v23  ;;  %v5970_v23 = vor.u32 %v6839_v63, %v5967_v14  ;;  %v6216_v63 = vld [vmem:[%s10388_s2 + $0xe8] sm:$0xf]  ;;  %v6213_v14 = vor.u32 %v6899_v9, %v6210_v11  ;;  %v6221_v12 = vor.u32 %v6900_v51, %v6218_v18  ;;  %v6883_v9 = vld [vmem:[%s10388_s2 + $0x64] sm:$0xf] }
 0x31c   :  { %v3149_v39 = vsel %vm284_vm2, %v3147_v32, %v3148_v22  ;;  %v6217_v17 = vor.u32 %v6902_v13, %v6216_v63  ;;  %v6145_v11 = vor.u32 %v6885_v8, %v6144_v7  ;;  %v6146_v63 = vld [vmem:[%s10388_s2 + $0x70] sm:$0xf0]  ;;  %v6152_v13 = vld [vmem:[%s10388_s2 + $0x68] sm:$0xf] }
 0x31d   :  { %v9679_v42 = vadd.f32 %v3149_v39, %v9062_v52  ;;  %v5981_v52 = vld [vmem:[%s10388_s2 + $0x20] sm:$0xf]  ;;  %3437 = vmatpush.bf16.msrb.mxu1 %v5970_v23  ;;  %3450 = vmatpush.bf16.msrb.mxu2 %v5974_v25  ;;  %v6895_v23 = vld [vmem:[%s10388_s2 + $0xc4] sm:$0xf]  ;;  %v6149_v51 = vor.u32 %v6883_v9, %v6146_v63 }
 0x31e   :  { %v5982_v62 = vor.u32 %v6845_v49, %v5981_v52  ;;  %3785 = vmatpush.bf16.msra.mxu3 %v6221_v12  ;;  %v6884_v12 = vld [vmem:[%s10388_s2 + $0x6c] sm:$0xf] }
 0x31f   :  { %v5960_v50 = vmul.f32 -1.442695, %v9679_v42  ;;  %v3172_v53 = vrot.slane %v9679_v42, 2  ;;  %v3196_v54 = vrot.slane %v9679_v42, 6  ;;  %v3193_v22 = vrot.slane %v9679_v42, 4 }
 0x320   :  { %v3125_v57 = vpop.f32.mrf.mxu2  ;;  %v3138_v59 = vpop.f32.mrf.mxu3  ;;  %3423 = vmatpush.bf16.msrb.mxu0 %v5982_v62 }
 0x321   :  { %7015 = vpow2.f32 %v5960_v50  ;;  %v5961_v5 = vmul.f32 -1.442695, %v3172_v53  ;;  %v5962_v6 = vmul.f32 -1.442695, %v3196_v54  ;;  %3759 = vmatpush.bf16.msra.mxu1 %v6213_v14  ;;  %3772 = vmatpush.bf16.msra.mxu2 %v6217_v17  ;;  %v6886_v14 = vld [vmem:[%s10388_s2 + $0x74] sm:$0xf0] }
 0x322   :  { %v6153_v18 = vor.u32 %v6886_v14, %v6152_v13 }
 0x323   :  { %7017 = vpow2.f32 %v5961_v5 }
 0x324   :  { %7019 = vpow2.f32 %v5962_v6  ;;  %3424 = vmatpush.bf16.msrb.mxu0 %v5966_v19  ;;  %v6192_v19 = vld [vmem:[%s10388_s2 + $0xc0] sm:$0xf] }
 0x327   :  { %v7016_v20 = vpop.eup %7015 }
 0x328   :  { %v3155_v1 = vadd.f32 1.0, %v7016_v20  ;;  %3746 = vmatpush.bf16.msra.mxu0 %v6209_v10  ;;  %v6897_v20 = vld [vmem:[%s10388_s2 + $0xcc] sm:$0xf0] }
 0x329   :  { %v7018_v30 = vpop.eup %7017  ;;  %v6193_v28 = vor.u32 %v6897_v20, %v6192_v19  ;;  %v6154_v19 = vld [vmem:[%s10388_s2 + $0x78] sm:$0xf0]  ;;  %v6128_v20 = vld [vmem:[%s10388_s2 + $0x40] sm:$0xf] }
 0x32a   :  { %v7020_v31 = vpop.eup %7019  ;;  %7021 = vrcp.f32 %v3155_v1  ;;  %v3177_v32 = vadd.f32 1.0, %v7018_v30  ;;  %v3167_v38 = vand.u32 2147483648, %v3155_v1  ;;  %v3165_v21 = vand.u32 2147483647, %v3155_v1  ;;  %v6194_v30 = vld [vmem:[%s10388_s2 + $0xd0] sm:$0xf0] }
 0x32b   :  { %v3201_v33 = vadd.f32 1.0, %v7020_v31  ;;  %vm3161_vm14 = vweird.f32 %v3155_v1  ;;  %v6200_v31 = vld [vmem:[%s10388_s2 + $0xc8] sm:$0xf] }
 0x32c   :  { %7023 = vrcp.f32 %v3177_v32  ;;  %v3189_v41 = vand.u32 2147483648, %v3177_v32  ;;  %v3187_v44 = vand.u32 2147483647, %v3177_v32  ;;  %v3168_v45 = vor.u32 1.1754944e-38, %v3167_v38  ;;  %3747 = vmatpush.bf16.msra.mxu0 %v6193_v28 }
 0x32d   :  { %7025 = vrcp.f32 %v3201_v33  ;;  %vm3166_vm4 = vcmp.eq.f32.partialorder %v3165_v21, 8.507059e+37  ;;  %vm3183_vm5 = vweird.f32 %v3177_v32  ;;  %v3213_v2 = vand.u32 2147483648, %v3201_v33 }
 0x32e   :  { %7027 = vtanh.f32 %v3193_v22  ;;  %v3190_v49 = vor.u32 1.1754944e-38, %v3189_v41  ;;  %vm3188_vm7 = vcmp.eq.f32.partialorder %v3187_v44, 8.507059e+37  ;;  %vm3207_vm9 = vweird.f32 %v3201_v33 }
 0x32f   :  { %v3211_v3 = vand.u32 2147483647, %v3201_v33  ;;  %v3214_v5 = vor.u32 1.1754944e-38, %v3213_v2 }
 0x330   :  { %v7022_v34 = vpop.eup %7021 }
 0x331   :  { %v3157_v35 = vmul.f32 %v7022_v34, %v3155_v1  ;;  %vm3162_vm13 = vweird.f32 %v7022_v34  ;;  %vm3212_vm11 = vcmp.eq.f32.partialorder %v3211_v3, 8.507059e+37  ;;  %v6890_v3 = vld [vmem:[%s10388_s2 + $0x94] sm:$0xf0] }
 0x332   :  { %v7024_v36 = vpop.eup %7023  ;;  %vm3163_vm3 = vmor %vm3161_vm14, %vm3162_vm13 }
 0x333   :  { %v7026_v37 = vpop.eup %7025  ;;  %v3158_v26 = vsub.f32 1.0, %v3157_v35  ;;  %v3179_v27 = vmul.f32 %v7024_v36, %v3177_v32  ;;  %vm3184_vm15 = vweird.f32 %v7024_v36  ;;  %v6898_v32 = vld [vmem:[%s10388_s2 + $0xd4] sm:$0xf0]  ;;  %v6896_v35 = vld [vmem:[%s10388_s2 + $0xcc] sm:$0xf] }
 0x334   :  { %v3203_v24 = vmul.f32 %v7026_v37, %v3201_v33  ;;  %vm3185_vm6 = vmor %vm3183_vm5, %vm3184_vm15  ;;  %v7028_v53 = vpop.eup %7027  ;;  %vm3208_vm8 = vweird.f32 %v7026_v37  ;;  %v6197_v33 = vor.u32 %v6895_v23, %v6194_v30  ;;  %v6157_v23 = vor.u32 %v6884_v12, %v6154_v19 }
 0x335   :  { %v3180_v39 = vsub.f32 1.0, %v3179_v27  ;;  %v3159_v40 = vmul.f32 %v7022_v34, %v3158_v26  ;;  %vm3209_vm10 = vmor %vm3207_vm9, %vm3208_vm8  ;;  %v6893_v26 = vld [vmem:[%s10388_s2 + $0xac] sm:$0xf0]  ;;  %v6891_v27 = vld [vmem:[%s10388_s2 + $0xa4] sm:$0xf] }
 0x336   :  { %v3204_v47 = vsub.f32 1.0, %v3203_v24  ;;  %3760 = vmatpush.bf16.msra.mxu1 %v6197_v33  ;;  %v6178_v24 = vld [vmem:[%s10388_s2 + $0xb0] sm:$0xf0] }
 0x337   :  { %v3160_v58 = vadd.f32 %v7022_v34, %v3159_v40  ;;  %v3181_v43 = vmul.f32 %v7024_v36, %v3180_v39  ;;  %v6184_v39 = vld [vmem:[%s10388_s2 + $0xa8] sm:$0xf]  ;;  %v6894_v40 = vld [vmem:[%s10388_s2 + $0xb4] sm:$0xf0]  ;;  %v6181_v21 = vor.u32 %v6891_v27, %v6178_v24  ;;  %v6138_v24 = vld [vmem:[%s10388_s2 + $0x58] sm:$0xf0] }
 0x338   :  { %v3205_v55 = vmul.f32 %v7026_v37, %v3204_v47  ;;  %v6185_v41 = vor.u32 %v6894_v40, %v6184_v39  ;;  %v6112_v40 = vld [vmem:[%s10388_s2 + $0x20] sm:$0xf] }
 0x339   :  { %v3164_v42 = vsel %vm3163_vm3, %v7022_v34, %v3160_v58  ;;  %v3182_v48 = vadd.f32 %v7024_v36, %v3181_v43  ;;  %v6201_v34 = vor.u32 %v6898_v32, %v6200_v31  ;;  %v6892_v58 = vld [vmem:[%s10388_s2 + $0xac] sm:$0xf]  ;;  %v6186_v43 = vld [vmem:[%s10388_s2 + $0xb8] sm:$0xf0] }
 0x33a   :  { %v3169_v52 = vsel %vm3166_vm4, %v3168_v45, %v3164_v42  ;;  %v3206_v60 = vadd.f32 %v7026_v37, %v3205_v55  ;;  %v6189_v45 = vor.u32 %v6892_v58, %v6186_v43  ;;  %3761 = vmatpush.bf16.msra.mxu1 %v6181_v21  ;;  %v6877_v21 = vld [vmem:[%s10388_s2 + $0x2c] sm:$0xf0]  ;;  %v6114_v43 = vld [vmem:[%s10388_s2 + $0x30] sm:$0xf0] }
 0x33b   :  { %v3186_v50 = vsel %vm3185_vm6, %v7024_v36, %v3182_v48  ;;  %v3218_v57 = vmul.f32 %v7028_v53, %v3169_v52  ;;  %v6202_v36 = vld [vmem:[%s10388_s2 + $0xd8] sm:$0xf0]  ;;  %3773 = vmatpush.bf16.msra.mxu2 %v6201_v34  ;;  %v6160_v48 = vld [vmem:[%s10388_s2 + $0x80] sm:$0xf]  ;;  %v6889_v52 = vld [vmem:[%s10388_s2 + $0x8c] sm:$0xf0]  ;;  %v6113_v58 = vor.u32 %v6877_v21, %v6112_v40 }
 0x33c   :  { %v3191_v54 = vsel %vm3188_vm7, %v3190_v49, %v3186_v50  ;;  %v3210_v4 = vsel %vm3209_vm10, %v7026_v37, %v3206_v60  ;;  %v6205_v22 = vor.u32 %v6896_v35, %v6202_v36  ;;  %v6176_v37 = vld [vmem:[%s10388_s2 + $0xa0] sm:$0xf]  ;;  %v6887_v49 = vld [vmem:[%s10388_s2 + $0x84] sm:$0xf]  ;;  %v6168_v60 = vld [vmem:[%s10388_s2 + $0x88] sm:$0xf] }
 0x33d   :  { %v3217_v56 = vmul.f32 %v3191_v54, %v9534_v15  ;;  %v3215_v61 = vsel %vm3212_vm11, %v3214_v5, %v3210_v4  ;;  %v6177_v38 = vor.u32 %v6893_v26, %v6176_v37  ;;  %v6888_v4 = vld [vmem:[%s10388_s2 + $0x8c] sm:$0xf]  ;;  %v6170_v5 = vld [vmem:[%s10388_s2 + $0x98] sm:$0xf0]  ;;  %v6136_v36 = vld [vmem:[%s10388_s2 + $0x48] sm:$0xf] }
 0x33e   :  { %3786 = vmatpush.bf16.msra.mxu3 %v6205_v22  ;;  %v6882_v22 = vld [vmem:[%s10388_s2 + $0x54] sm:$0xf0]  ;;  %v6880_v37 = vld [vmem:[%s10388_s2 + $0x4c] sm:$0xf] }
 0x33f   :  { %v9743_v59 = vadd.f32 %v3218_v57, %v3217_v56  ;;  %3748 = vmatpush.bf16.msra.mxu0 %v6177_v38  ;;  %3774 = vmatpush.bf16.msra.mxu2 %v6185_v41  ;;  %v6161_v56 = vor.u32 %v6889_v52, %v6160_v48  ;;  %v6162_v57 = vld [vmem:[%s10388_s2 + $0x90] sm:$0xf0]  ;;  %v6137_v38 = vor.u32 %v6882_v22, %v6136_v36  ;;  %v6875_v41 = vld [vmem:[%s10388_s2 + $0x24] sm:$0xf]  ;;  %v6122_v48 = vld [vmem:[%s10388_s2 + $0x38] sm:$0xf0] }
 0x340   :  { %v6165_v2 = vor.u32 %v6887_v49, %v6162_v57  ;;  %v6141_v39 = vor.u32 %v6880_v37, %v6138_v24  ;;  %v6096_v52 = vld [vmem:[%s10388_s2] sm:$0xf]  ;;  %v6874_v57 = vld [vmem:[%s10388_s2 + $0x14] sm:$0xf0] }
 0x341   :  { %7029 = vtanh.f32 %v9743_v59 }
 0x342   :  { %3787 = vmatpush.bf16.msra.mxu3 %v6189_v45  ;;  %3762 = vmatpush.bf16.msra.mxu1 %v6165_v2  ;;  %v6878_v45 = vld [vmem:[%s10388_s2 + $0x34] sm:$0xf0] }
 0x343   :  { %3749 = vmatpush.bf16.msra.mxu0 %v6161_v56  ;;  %v6104_v56 = vld [vmem:[%s10388_s2 + $0x8] sm:$0xf] }
 0x346   :  { %3763 = vmatpush.bf16.msra.mxu1 %v6149_v51 }
 0x347   :  { %v7030_v6 = vpop.eup %7029  ;;  %3750 = vmatpush.bf16.msra.mxu0 %v6145_v11 }
 0x348   :  { %v3221_v62 = vmul.f32 %v7030_v6, %v3215_v61 }
 0x34a   :  { %3222 = vst [vmem:[%s10387_s4 + $0x6] sm:$0x3] %v3221_v62  ;;  %v3224_v15 = vpack.c.bf16 %v3221_v62, %v3221_v62  ;;  %v6169_v62 = vor.u32 %v6890_v3, %v6168_v60  ;;  %v6872_v60 = vld [vmem:[%s10388_s2 + $0xc] sm:$0xf] }
 0x34c   :  { %3425 = vmatmul.bf16.vlgmr.msrb.gmra.mxu0 %v3224_v15  ;;  %3438 = vmatmul.bf16.vlgmr.msrb.gmra.mxu1 %v3224_v15 }
 0x34d   :  { %3451 = vmatmul.bf16.vlgmr.msrb.gmra.mxu2 %v3224_v15  ;;  %3464 = vmatmul.bf16.vlgmr.msrb.gmra.mxu3 %v3224_v15  ;;  %v6173_v15 = vor.u32 %v6888_v4, %v6170_v5  ;;  %v6106_v4 = vld [vmem:[%s10388_s2 + $0x18] sm:$0xf0] }
 0x34e   :  { %3775 = vmatpush.bf16.msra.mxu2 %v6169_v62  ;;  %v6105_v62 = vor.u32 %v6874_v57, %v6104_v56  ;;  %v6932_v56 = vld [vmem:[%s10388_s2 + $0xec] sm:$0xf]  ;;  %v6349_v57 = vld [vmem:[%s10388_s2 + $0xf8] sm:$0xf0] }
 0x34f   :  { %3788 = vmatpush.bf16.msra.mxu3 %v6173_v15  ;;  %v6109_v15 = vor.u32 %v6872_v60, %v6106_v4  ;;  %v6352_v60 = vor.u32 %v6932_v56, %v6349_v57  ;;  %v6927_v4 = vld [vmem:[%s10388_s2 + $0xc4] sm:$0xf]  ;;  %v6916_v57 = vld [vmem:[%s10388_s2 + $0x6c] sm:$0xf] }
 0x352   :  { %3776 = vmatpush.bf16.msra.mxu2 %v6153_v18 }
 0x353   :  { %3789 = vmatpush.bf16.msra.mxu3 %v6157_v23 }
 0x356   :  { %3777 = vmatpush.bf16.msra.mxu2 %v6137_v38 }
 0x357   :  { %3790 = vmatpush.bf16.msra.mxu3 %v6141_v39 }
 0x3c9   :  { %v3426_v25 = vpop.f32.mrf.mxu0  ;;  %v3439_v1 = vpop.f32.mrf.mxu1 }
 0x3ca   :  { %v3473_v44 = vrot.slane %v3439_v1, 6  ;;  %v6130_v1 = vld [vmem:[%s10388_s2 + $0x50] sm:$0xf0] }
 0x3cc   :  { %v3476_v6 = vsel %vm280_vm0, %v3426_v25, %v3473_v44  ;;  %v6879_v25 = vld [vmem:[%s10388_s2 + $0x44] sm:$0xf]  ;;  %v6120_v44 = vld [vmem:[%s10388_s2 + $0x28] sm:$0xf] }
 0x3cd   :  { %v6133_v35 = vor.u32 %v6879_v25, %v6130_v1  ;;  %v6121_v49 = vor.u32 %v6878_v45, %v6120_v44 }
 0x3cf   :  { %3764 = vmatpush.bf16.msra.mxu1 %v6133_v35  ;;  %3778 = vmatpush.bf16.msra.mxu2 %v6121_v49  ;;  %v6341_v49 = vld [vmem:[%s10388_s2 + $0xf0] sm:$0xf0] }
 0x3d0   :  { %v3452_v47 = vpop.f32.mrf.mxu2  ;;  %v3465_v42 = vpop.f32.mrf.mxu3 }
 0x3d1   :  { %v3474_v50 = vrot.slane %v3452_v47, 4  ;;  %v3475_v53 = vrot.slane %v3465_v42, 2  ;;  %v3428_v54 = vpop.f32.mrf.mxu0  ;;  %v3441_v55 = vpop.f32.mrf.mxu1  ;;  %v6117_v47 = vor.u32 %v6875_v41, %v6114_v43  ;;  %v6876_v42 = vld [vmem:[%s10388_s2 + $0x2c] sm:$0xf] }
 0x3d2   :  { %v6871_v54 = vld [vmem:[%s10388_s2 + $0x4] sm:$0xf]  ;;  %v6098_v55 = vld [vmem:[%s10388_s2 + $0x10] sm:$0xf0] }
 0x3d3   :  { %v3477_v61 = vsel %vm282_vm1, %v3474_v50, %v3475_v53  ;;  %v6125_v50 = vor.u32 %v6876_v42, %v6122_v48  ;;  %v6873_v53 = vld [vmem:[%s10388_s2 + $0xc] sm:$0xf0]  ;;  %3765 = vmatpush.bf16.msra.mxu1 %v6117_v47  ;;  %3779 = vmatpush.bf16.msra.mxu2 %v6105_v62  ;;  %v6339_v47 = vld [vmem:[%s10388_s2 + $0xe0] sm:$0xf]  ;;  %v6931_v48 = vld [vmem:[%s10388_s2 + $0xe4] sm:$0xf] }
 0x3d4   :  { %v3478_v10 = vsel %vm284_vm2, %v3476_v6, %v3477_v61  ;;  %v6097_v3 = vor.u32 %v6873_v53, %v6096_v52  ;;  %v6101_v6 = vor.u32 %v6871_v54, %v6098_v55  ;;  %v6933_v42 = vld [vmem:[%s10388_s2 + $0xec] sm:$0xf0]  ;;  %v6934_v53 = vld [vmem:[%s10388_s2 + $0xf4] sm:$0xf0]  ;;  %v6344_v54 = vor.u32 %v6931_v48, %v6341_v49  ;;  %v6325_v62 = vld [vmem:[%s10388_s2 + $0xd0] sm:$0xf0] }
 0x3d5   :  { %v9867_v17 = vadd.f32 %v3478_v10, %v9096_v16  ;;  %v6881_v16 = vld [vmem:[%s10388_s2 + $0x4c] sm:$0xf0]  ;;  %3791 = vmatpush.bf16.msra.mxu3 %v6125_v50  ;;  %v6340_v52 = vor.u32 %v6933_v42, %v6339_v47  ;;  %v6347_v50 = vld [vmem:[%s10388_s2 + $0xe8] sm:$0xf]  ;;  %v6915_v42 = vld [vmem:[%s10388_s2 + $0x64] sm:$0xf] }
 0x3d6   :  { %v6129_v34 = vor.u32 %v6881_v16, %v6128_v20  ;;  %v6348_v55 = vor.u32 %v6934_v53, %v6347_v50  ;;  %v6917_v47 = vld [vmem:[%s10388_s2 + $0x6c] sm:$0xf0]  ;;  %v6277_v49 = vld [vmem:[%s10388_s2 + $0x70] sm:$0xf0]  ;;  %v6283_v50 = vld [vmem:[%s10388_s2 + $0x68] sm:$0xf] }
 0x3d7   :  { %v6091_v28 = vmul.f32 -1.442695, %v9867_v17  ;;  %v3501_v30 = vrot.slane %v9867_v17, 2  ;;  %v3525_v31 = vrot.slane %v9867_v17, 6  ;;  %3766 = vmatpush.bf16.msra.mxu1 %v6101_v6  ;;  %v3522_v14 = vrot.slane %v9867_v17, 4 }
 0x3d8   :  { %v3454_v32 = vpop.f32.mrf.mxu2  ;;  %v3467_v33 = vpop.f32.mrf.mxu3  ;;  %3751 = vmatpush.bf16.msra.mxu0 %v6129_v34  ;;  %4101 = vmatpush.bf16.msrb.mxu2 %v6348_v55  ;;  %v6918_v53 = vld [vmem:[%s10388_s2 + $0x74] sm:$0xf0]  ;;  %v6280_v55 = vor.u32 %v6915_v42, %v6277_v49 }
 0x3d9   :  { %7031 = vpow2.f32 %v6091_v28  ;;  %v6092_v26 = vmul.f32 -1.442695, %v3501_v30  ;;  %v6093_v27 = vmul.f32 -1.442695, %v3525_v31  ;;  %3792 = vmatpush.bf16.msra.mxu3 %v6109_v15  ;;  %v6331_v15 = vld [vmem:[%s10388_s2 + $0xc8] sm:$0xf]  ;;  %v6284_v56 = vor.u32 %v6918_v53, %v6283_v50 }
 0x3db   :  { %7033 = vpow2.f32 %v6092_v26  ;;  %4088 = vmatpush.bf16.msrb.mxu1 %v6344_v54 }
 0x3dc   :  { %7035 = vpow2.f32 %v6093_v27  ;;  %3752 = vmatpush.bf16.msra.mxu0 %v6113_v58 }
 0x3dd   :  { %4114 = vmatpush.bf16.msrb.mxu3 %v6352_v60  ;;  %v6285_v60 = vld [vmem:[%s10388_s2 + $0x78] sm:$0xf0] }
 0x3df   :  { %v7032_v2 = vpop.eup %7031 }
 0x3e0   :  { %v3484_v5 = vadd.f32 1.0, %v7032_v2  ;;  %3753 = vmatpush.bf16.msra.mxu0 %v6097_v3  ;;  %v6323_v2 = vld [vmem:[%s10388_s2 + $0xc0] sm:$0xf]  ;;  %v6929_v3 = vld [vmem:[%s10388_s2 + $0xcc] sm:$0xf0] }
 0x3e1   :  { %v7034_v61 = vpop.eup %7033 }
 0x3e2   :  { %v7036_v7 = vpop.eup %7035  ;;  %7037 = vrcp.f32 %v3484_v5  ;;  %v3506_v8 = vadd.f32 1.0, %v7034_v61  ;;  %v3496_v19 = vand.u32 2147483648, %v3484_v5  ;;  %v3494_v23 = vand.u32 2147483647, %v3484_v5 }
 0x3e3   :  { %v3530_v9 = vadd.f32 1.0, %v7036_v7  ;;  %vm3490_vm13 = vweird.f32 %v3484_v5  ;;  %v6324_v61 = vor.u32 %v6929_v3, %v6323_v2  ;;  %v6930_v7 = vld [vmem:[%s10388_s2 + $0xd4] sm:$0xf0]  ;;  %v6259_v2 = vld [vmem:[%s10388_s2 + $0x40] sm:$0xf]  ;;  %v6288_v3 = vor.u32 %v6916_v57, %v6285_v60 }
 0x3e4   :  { %7039 = vrcp.f32 %v3506_v8  ;;  %v3518_v1 = vand.u32 2147483648, %v3506_v8  ;;  %v3516_v30 = vand.u32 2147483647, %v3506_v8  ;;  %v3497_v32 = vor.u32 1.1754944e-38, %v3496_v19  ;;  %4075 = vmatpush.bf16.msrb.mxu0 %v6340_v52  ;;  %v6315_v19 = vld [vmem:[%s10388_s2 + $0xa8] sm:$0xf] }
 0x3e5   :  { %7041 = vrcp.f32 %v3530_v9  ;;  %vm3495_vm3 = vcmp.eq.f32.partialorder %v3494_v23, 8.507059e+37  ;;  %vm3512_vm4 = vweird.f32 %v3506_v8  ;;  %v3542_v40 = vand.u32 2147483648, %v3530_v9 }
 0x3e6   :  { %7043 = vtanh.f32 %v3522_v14  ;;  %v3519_v35 = vor.u32 1.1754944e-38, %v3518_v1  ;;  %vm3517_vm6 = vcmp.eq.f32.partialorder %v3516_v30, 8.507059e+37  ;;  %vm3536_vm8 = vweird.f32 %v3530_v9  ;;  %v6925_v14 = vld [vmem:[%s10388_s2 + $0xac] sm:$0xf0]  ;;  %v6317_v1 = vld [vmem:[%s10388_s2 + $0xb8] sm:$0xf0] }
 0x3e7   :  { %v3540_v21 = vand.u32 2147483647, %v3530_v9  ;;  %v3543_v58 = vor.u32 1.1754944e-38, %v3542_v40  ;;  %v6922_v40 = vld [vmem:[%s10388_s2 + $0x94] sm:$0xf0] }
 0x3e8   :  { %v7038_v10 = vpop.eup %7037  ;;  %4076 = vmatpush.bf16.msrb.mxu0 %v6324_v61 }
 0x3e9   :  { %v3486_v11 = vmul.f32 %v7038_v10, %v3484_v5  ;;  %vm3491_vm12 = vweird.f32 %v7038_v10  ;;  %vm3541_vm10 = vcmp.eq.f32.partialorder %v3540_v21, 8.507059e+37  ;;  %v6920_v21 = vld [vmem:[%s10388_s2 + $0x8c] sm:$0xf] }
 0x3ea   :  { %v7040_v63 = vpop.eup %7039  ;;  %vm3492_vm14 = vmor %vm3490_vm13, %vm3491_vm12 }
 0x3eb   :  { %v3487_v13 = vsub.f32 1.0, %v3486_v11  ;;  %v7042_v51 = vpop.eup %7041  ;;  %v3508_v18 = vmul.f32 %v7040_v63, %v3506_v8  ;;  %vm3513_vm15 = vweird.f32 %v7040_v63  ;;  %v6328_v8 = vor.u32 %v6927_v4, %v6325_v62  ;;  %v6333_v11 = vld [vmem:[%s10388_s2 + $0xd8] sm:$0xf0]  ;;  %v6911_v4 = vld [vmem:[%s10388_s2 + $0x44] sm:$0xf] }
 0x3ec   :  { %v3532_v20 = vmul.f32 %v7042_v51, %v3530_v9  ;;  %vm3514_vm5 = vmor %vm3512_vm4, %vm3513_vm15  ;;  %v7044_v22 = vpop.eup %7043  ;;  %vm3537_vm7 = vweird.f32 %v7042_v51  ;;  %v6332_v9 = vor.u32 %v6930_v7, %v6331_v15 }
 0x3ed   :  { %v3488_v12 = vmul.f32 %v7038_v10, %v3487_v13  ;;  %v3509_v16 = vsub.f32 1.0, %v3508_v18  ;;  %vm3538_vm9 = vmor %vm3536_vm8, %vm3537_vm7  ;;  %4089 = vmatpush.bf16.msrb.mxu1 %v6328_v8  ;;  %v6307_v13 = vld [vmem:[%s10388_s2 + $0xa0] sm:$0xf] }
 0x3ee   :  { %v3533_v33 = vsub.f32 1.0, %v3532_v20  ;;  %4102 = vmatpush.bf16.msrb.mxu2 %v6332_v9  ;;  %v6308_v18 = vor.u32 %v6925_v14, %v6307_v13  ;;  %v6926_v20 = vld [vmem:[%s10388_s2 + $0xb4] sm:$0xf0] }
 0x3ef   :  { %v3489_v25 = vadd.f32 %v7038_v10, %v3488_v12  ;;  %v3510_v28 = vmul.f32 %v7040_v63, %v3509_v16  ;;  %v6309_v12 = vld [vmem:[%s10388_s2 + $0xb0] sm:$0xf0]  ;;  %v6316_v16 = vor.u32 %v6926_v20, %v6315_v19  ;;  %v6243_v19 = vld [vmem:[%s10388_s2 + $0x20] sm:$0xf]  ;;  %v6909_v20 = vld [vmem:[%s10388_s2 + $0x2c] sm:$0xf0] }
 0x3f0   :  { %v3534_v26 = vmul.f32 %v7042_v51, %v3533_v33  ;;  %4077 = vmatpush.bf16.msrb.mxu0 %v6308_v18  ;;  %v6291_v33 = vld [vmem:[%s10388_s2 + $0x80] sm:$0xf]  ;;  %v6269_v18 = vld [vmem:[%s10388_s2 + $0x58] sm:$0xf0] }
 0x3f1   :  { %v3493_v31 = vsel %vm3492_vm14, %v7038_v10, %v3489_v25  ;;  %v3511_v17 = vadd.f32 %v7040_v63, %v3510_v28  ;;  %v6928_v10 = vld [vmem:[%s10388_s2 + $0xcc] sm:$0xf] }
 0x3f2   :  { %v3498_v34 = vsel %vm3495_vm3, %v3497_v32, %v3493_v31  ;;  %v3535_v39 = vadd.f32 %v7042_v51, %v3534_v26  ;;  %v6924_v25 = vld [vmem:[%s10388_s2 + $0xac] sm:$0xf]  ;;  %4103 = vmatpush.bf16.msrb.mxu2 %v6316_v16  ;;  %v6244_v16 = vor.u32 %v6909_v20, %v6243_v19 }
 0x3f3   :  { %v3515_v36 = vsel %vm3514_vm5, %v7040_v63, %v3511_v17  ;;  %v3547_v27 = vmul.f32 %v7044_v22, %v3498_v34  ;;  %v6336_v63 = vor.u32 %v6928_v10, %v6333_v11  ;;  %v6320_v30 = vor.u32 %v6924_v25, %v6317_v1  ;;  %v6921_v17 = vld [vmem:[%s10388_s2 + $0x8c] sm:$0xf0]  ;;  %v6919_v34 = vld [vmem:[%s10388_s2 + $0x84] sm:$0xf]  ;;  %v6267_v10 = vld [vmem:[%s10388_s2 + $0x48] sm:$0xf] }
 0x3f4   :  { %v3520_v37 = vsel %vm3517_vm6, %v3519_v35, %v3515_v36  ;;  %v3539_v41 = vsel %vm3538_vm9, %v7042_v51, %v3535_v39  ;;  %v6923_v51 = vld [vmem:[%s10388_s2 + $0xa4] sm:$0xf]  ;;  %v6292_v26 = vor.u32 %v6921_v17, %v6291_v33  ;;  %v6914_v11 = vld [vmem:[%s10388_s2 + $0x54] sm:$0xf0]  ;;  %v6245_v25 = vld [vmem:[%s10388_s2 + $0x30] sm:$0xf0] }
 0x3f5   :  { %v3546_v38 = vmul.f32 %v3520_v37, %v9743_v59  ;;  %v3544_v44 = vsel %vm3541_vm10, %v3543_v58, %v3539_v41  ;;  %4115 = vmatpush.bf16.msrb.mxu3 %v6336_v63  ;;  %v6312_v23 = vor.u32 %v6923_v51, %v6309_v12  ;;  %v6301_v41 = vld [vmem:[%s10388_s2 + $0x98] sm:$0xf0]  ;;  %v6912_v63 = vld [vmem:[%s10388_s2 + $0x4c] sm:$0xf]  ;;  %v6268_v51 = vor.u32 %v6914_v11, %v6267_v10  ;;  %v6251_v1 = vld [vmem:[%s10388_s2 + $0x28] sm:$0xf] }
 0x3f6   :  { %4078 = vmatpush.bf16.msrb.mxu0 %v6292_v26  ;;  %v6272_v12 = vor.u32 %v6912_v63, %v6269_v18  ;;  %v6227_v33 = vld [vmem:[%s10388_s2] sm:$0xf]  ;;  %v6906_v26 = vld [vmem:[%s10388_s2 + $0x14] sm:$0xf0] }
 0x3f7   :  { %v9952_v24 = vadd.f32 %v3547_v27, %v3546_v38  ;;  %4090 = vmatpush.bf16.msrb.mxu1 %v6312_v23  ;;  %v6293_v27 = vld [vmem:[%s10388_s2 + $0x90] sm:$0xf0]  ;;  %v6299_v38 = vld [vmem:[%s10388_s2 + $0x88] sm:$0xf]  ;;  %v6907_v23 = vld [vmem:[%s10388_s2 + $0x24] sm:$0xf] }
 0x3f8   :  { %v6296_v39 = vor.u32 %v6919_v34, %v6293_v27  ;;  %v6904_v27 = vld [vmem:[%s10388_s2 + $0xc] sm:$0xf] }
 0x3f9   :  { %7045 = vtanh.f32 %v9952_v24  ;;  %4116 = vmatpush.bf16.msrb.mxu3 %v6320_v30  ;;  %v6248_v30 = vor.u32 %v6907_v23, %v6245_v25 }
 0x3fb   :  { %4091 = vmatpush.bf16.msrb.mxu1 %v6296_v39 }
 0x3ff   :  { %v7046_v43 = vpop.eup %7045  ;;  %4092 = vmatpush.bf16.msrb.mxu1 %v6280_v55 }
 0x400   :  { %v3550_v45 = vmul.f32 %v7046_v43, %v3544_v44  ;;  %v6300_v44 = vor.u32 %v6922_v40, %v6299_v38  ;;  %v6237_v40 = vld [vmem:[%s10388_s2 + $0x18] sm:$0xf0] }
 0x402   :  { %3551 = vst [vmem:[%s10387_s4 + $0x8] sm:$0x3] %v3550_v45  ;;  %v3553_v59 = vpack.c.bf16 %v3550_v45, %v3550_v45  ;;  %v6304_v45 = vor.u32 %v6920_v21, %v6301_v41  ;;  %4104 = vmatpush.bf16.msrb.mxu2 %v6300_v44  ;;  %v6240_v44 = vor.u32 %v6904_v27, %v6237_v40  ;;  %v6454_v27 = vld [vmem:[%s10388_s2 + $0xc0] sm:$0xf] }
 0x404   :  { %3754 = vmatmul.bf16.vlgmr.msra.gmra.mxu0 %v3553_v59  ;;  %3767 = vmatmul.bf16.vlgmr.msra.gmra.mxu1 %v3553_v59 }
 0x405   :  { %3780 = vmatmul.bf16.vlgmr.msra.gmra.mxu2 %v3553_v59  ;;  %3793 = vmatmul.bf16.vlgmr.msra.gmra.mxu3 %v3553_v59  ;;  %v6275_v59 = vld [vmem:[%s10388_s2 + $0x60] sm:$0xf] }
 0x406   :  { %v6276_v52 = vor.u32 %v6917_v47, %v6275_v59  ;;  %4117 = vmatpush.bf16.msrb.mxu3 %v6304_v45  ;;  %4105 = vmatpush.bf16.msrb.mxu2 %v6284_v56 }
 0x408   :  { %4079 = vmatpush.bf16.msrb.mxu0 %v6276_v52 }
 0x40a   :  { %4118 = vmatpush.bf16.msrb.mxu3 %v6288_v3  ;;  %4106 = vmatpush.bf16.msrb.mxu2 %v6268_v51 }
 0x40e   :  { %4119 = vmatpush.bf16.msrb.mxu3 %v6272_v12 }
 0x481   :  { %v3755_v5 = vpop.f32.mrf.mxu0  ;;  %v3768_v6 = vpop.f32.mrf.mxu1 }
 0x482   :  { %v3802_v28 = vrot.slane %v3768_v6, 6 }
 0x484   :  { %v3805_v58 = vsel %vm280_vm0, %v3755_v5, %v3802_v28  ;;  %v6261_v5 = vld [vmem:[%s10388_s2 + $0x50] sm:$0xf0]  ;;  %v6910_v28 = vld [vmem:[%s10388_s2 + $0x34] sm:$0xf0] }
 0x485   :  { %v6264_v9 = vor.u32 %v6911_v4, %v6261_v5  ;;  %v6252_v17 = vor.u32 %v6910_v28, %v6251_v1  ;;  %v6470_v28 = vld [vmem:[%s10388_s2 + $0xe0] sm:$0xf] }
 0x487   :  { %4093 = vmatpush.bf16.msrb.mxu1 %v6264_v9  ;;  %4107 = vmatpush.bf16.msrb.mxu2 %v6252_v17  ;;  %v6478_v17 = vld [vmem:[%s10388_s2 + $0xe8] sm:$0xf] }
 0x488   :  { %v3781_v31 = vpop.f32.mrf.mxu2  ;;  %v3794_v32 = vpop.f32.mrf.mxu3 }
 0x489   :  { %v3803_v35 = vrot.slane %v3781_v31, 4  ;;  %v3804_v36 = vrot.slane %v3794_v32, 2  ;;  %v3757_v22 = vpop.f32.mrf.mxu0  ;;  %v3770_v37 = vpop.f32.mrf.mxu1  ;;  %v6908_v31 = vld [vmem:[%s10388_s2 + $0x2c] sm:$0xf]  ;;  %v6253_v32 = vld [vmem:[%s10388_s2 + $0x38] sm:$0xf0] }
 0x48a   :  { %v6256_v34 = vor.u32 %v6908_v31, %v6253_v32  ;;  %v6229_v22 = vld [vmem:[%s10388_s2 + $0x10] sm:$0xf0]  ;;  %v6235_v37 = vld [vmem:[%s10388_s2 + $0x8] sm:$0xf]  ;;  %v6963_v31 = vld [vmem:[%s10388_s2 + $0xe4] sm:$0xf] }
 0x48b   :  { %v3806_v43 = vsel %vm282_vm1, %v3803_v35, %v3804_v36  ;;  %v6905_v35 = vld [vmem:[%s10388_s2 + $0xc] sm:$0xf0]  ;;  %v6903_v36 = vld [vmem:[%s10388_s2 + $0x4] sm:$0xf]  ;;  %4094 = vmatpush.bf16.msrb.mxu1 %v6248_v30 }
 0x48c   :  { %v3807_v48 = vsel %vm284_vm2, %v3805_v58, %v3806_v43  ;;  %v6228_v39 = vor.u32 %v6905_v35, %v6227_v33  ;;  %v6232_v41 = vor.u32 %v6903_v36, %v6229_v22  ;;  %4120 = vmatpush.bf16.msrb.mxu3 %v6256_v34  ;;  %v6236_v43 = vor.u32 %v6906_v26, %v6235_v37  ;;  %v6965_v30 = vld [vmem:[%s10388_s2 + $0xec] sm:$0xf0]  ;;  %v6472_v33 = vld [vmem:[%s10388_s2 + $0xf0] sm:$0xf0]  ;;  %v6966_v34 = vld [vmem:[%s10388_s2 + $0xf4] sm:$0xf0] }
 0x48d   :  { %v10076_v54 = vadd.f32 %v3807_v48, %v9104_v0  ;;  %v6913_v0 = vld [vmem:[%s10388_s2 + $0x4c] sm:$0xf0]  ;;  %v6471_v32 = vor.u32 %v6965_v30, %v6470_v28  ;;  %v6475_v35 = vor.u32 %v6963_v31, %v6472_v33  ;;  %v6479_v36 = vor.u32 %v6966_v34, %v6478_v17  ;;  %v6964_v22 = vld [vmem:[%s10388_s2 + $0xec] sm:$0xf]  ;;  %v6480_v37 = vld [vmem:[%s10388_s2 + $0xf8] sm:$0xf0] }
 0x48e   :  { %v6260_v8 = vor.u32 %v6913_v0, %v6259_v2  ;;  %4108 = vmatpush.bf16.msrb.mxu2 %v6236_v43  ;;  %v6483_v26 = vor.u32 %v6964_v22, %v6480_v37  ;;  %v6462_v43 = vld [vmem:[%s10388_s2 + $0xc8] sm:$0xf]  ;;  %v6947_v28 = vld [vmem:[%s10388_s2 + $0x64] sm:$0xf]  ;;  %v6950_v17 = vld [vmem:[%s10388_s2 + $0x74] sm:$0xf0] }
 0x48f   :  { %v6222_v6 = vmul.f32 -1.442695, %v10076_v54  ;;  %v3830_v61 = vrot.slane %v10076_v54, 2  ;;  %v3854_v62 = vrot.slane %v10076_v54, 6  ;;  %4095 = vmatpush.bf16.msrb.mxu1 %v6232_v41  ;;  %v3851_v50 = vrot.slane %v10076_v54, 4 }
 0x490   :  { %v3783_v15 = vpop.f32.mrf.mxu2  ;;  %v3796_v7 = vpop.f32.mrf.mxu3  ;;  %4080 = vmatpush.bf16.msrb.mxu0 %v6260_v8  ;;  %4121 = vmatpush.bf16.msrb.mxu3 %v6240_v44  ;;  %v6962_v44 = vld [vmem:[%s10388_s2 + $0xd4] sm:$0xf0]  ;;  %v6414_v33 = vld [vmem:[%s10388_s2 + $0x68] sm:$0xf]  ;;  %v6948_v22 = vld [vmem:[%s10388_s2 + $0x6c] sm:$0xf] }
 0x491   :  { %7047 = vpow2.f32 %v6222_v6  ;;  %v6223_v13 = vmul.f32 -1.442695, %v3830_v61  ;;  %v6224_v14 = vmul.f32 -1.442695, %v3854_v62  ;;  %v6416_v37 = vld [vmem:[%s10388_s2 + $0x78] sm:$0xf0] }
 0x492   :  { %4430 = vmatpush.bf16.msra.mxu2 %v6479_v36  ;;  %v6415_v36 = vor.u32 %v6950_v17, %v6414_v33 }
 0x493   :  { %7049 = vpow2.f32 %v6223_v13  ;;  %4417 = vmatpush.bf16.msra.mxu1 %v6475_v35 }
 0x494   :  { %7051 = vpow2.f32 %v6224_v14  ;;  %4081 = vmatpush.bf16.msrb.mxu0 %v6244_v16  ;;  %4443 = vmatpush.bf16.msra.mxu3 %v6483_v26  ;;  %v6390_v26 = vld [vmem:[%s10388_s2 + $0x40] sm:$0xf] }
 0x497   :  { %v7048_v38 = vpop.eup %7047 }
 0x498   :  { %v3813_v21 = vadd.f32 1.0, %v7048_v38  ;;  %4082 = vmatpush.bf16.msrb.mxu0 %v6228_v39  ;;  %v6961_v38 = vld [vmem:[%s10388_s2 + $0xcc] sm:$0xf0]  ;;  %v6959_v39 = vld [vmem:[%s10388_s2 + $0xc4] sm:$0xf] }
 0x499   :  { %v7050_v58 = vpop.eup %7049  ;;  %v6455_v41 = vor.u32 %v6961_v38, %v6454_v27  ;;  %v6419_v27 = vor.u32 %v6948_v22, %v6416_v37  ;;  %v6943_v38 = vld [vmem:[%s10388_s2 + $0x44] sm:$0xf] }
 0x49a   :  { %v7052_v45 = vpop.eup %7051  ;;  %7053 = vrcp.f32 %v3813_v21  ;;  %v3835_v59 = vadd.f32 1.0, %v7050_v58  ;;  %v3825_v57 = vand.u32 2147483648, %v3813_v21  ;;  %v3823_v2 = vand.u32 2147483647, %v3813_v21  ;;  %v6456_v58 = vld [vmem:[%s10388_s2 + $0xd0] sm:$0xf0] }
 0x49b   :  { %v3859_v47 = vadd.f32 1.0, %v7052_v45  ;;  %vm3819_vm12 = vweird.f32 %v3813_v21  ;;  %v6459_v45 = vor.u32 %v6959_v39, %v6456_v58  ;;  %v6392_v39 = vld [vmem:[%s10388_s2 + $0x50] sm:$0xf0] }
 0x49c   :  { %7055 = vrcp.f32 %v3835_v59  ;;  %v3847_v4 = vand.u32 2147483648, %v3835_v59  ;;  %v3845_v6 = vand.u32 2147483647, %v3835_v59  ;;  %v3826_v62 = vor.u32 1.1754944e-38, %v3825_v57  ;;  %4404 = vmatpush.bf16.msra.mxu0 %v6471_v32  ;;  %v6958_v57 = vld [vmem:[%s10388_s2 + $0xb4] sm:$0xf0] }
 0x49d   :  { %7057 = vrcp.f32 %v3859_v47  ;;  %vm3824_vm15 = vcmp.eq.f32.partialorder %v3823_v2, 8.507059e+37  ;;  %vm3841_vm3 = vweird.f32 %v3835_v59  ;;  %v3871_v12 = vand.u32 2147483648, %v3859_v47  ;;  %4418 = vmatpush.bf16.msra.mxu1 %v6459_v45  ;;  %v6408_v32 = vld [vmem:[%s10388_s2 + $0x70] sm:$0xf0] }
 0x49e   :  { %7059 = vtanh.f32 %v3851_v50  ;;  %v3848_v8 = vor.u32 1.1754944e-38, %v3847_v4  ;;  %vm3846_vm5 = vcmp.eq.f32.partialorder %v3845_v6, 8.507059e+37  ;;  %vm3865_vm7 = vweird.f32 %v3859_v47  ;;  %v6955_v50 = vld [vmem:[%s10388_s2 + $0xa4] sm:$0xf] }
 0x49f   :  { %v3869_v19 = vand.u32 2147483647, %v3859_v47  ;;  %v3872_v23 = vor.u32 1.1754944e-38, %v3871_v12  ;;  %v6952_v12 = vld [vmem:[%s10388_s2 + $0x8c] sm:$0xf]  ;;  %v6411_v35 = vor.u32 %v6947_v28, %v6408_v32  ;;  %v6395_v45 = vor.u32 %v6943_v38, %v6392_v39 }
 0x4a0   :  { %v7054_v42 = vpop.eup %7053  ;;  %4405 = vmatpush.bf16.msra.mxu0 %v6455_v41 }
 0x4a1   :  { %v3815_v48 = vmul.f32 %v7054_v42, %v3813_v21  ;;  %vm3820_vm11 = vweird.f32 %v7054_v42  ;;  %vm3870_vm9 = vcmp.eq.f32.partialorder %v3869_v19, 8.507059e+37  ;;  %v6432_v19 = vld [vmem:[%s10388_s2 + $0x98] sm:$0xf0] }
 0x4a2   :  { %v7056_v52 = vpop.eup %7055  ;;  %vm3821_vm13 = vmor %vm3819_vm12, %vm3820_vm11 }
 0x4a3   :  { %v3816_v49 = vsub.f32 1.0, %v3815_v48  ;;  %v7058_v53 = vpop.eup %7057  ;;  %v3837_v55 = vmul.f32 %v7056_v52, %v3835_v59  ;;  %vm3842_vm14 = vweird.f32 %v7056_v52  ;;  %v6463_v59 = vor.u32 %v6962_v44, %v6462_v43 }
 0x4a4   :  { %v3861_v60 = vmul.f32 %v7058_v53, %v3859_v47  ;;  %vm3843_vm4 = vmor %vm3841_vm3, %vm3842_vm14  ;;  %v7060_v10 = vpop.eup %7059  ;;  %vm3866_vm6 = vweird.f32 %v7058_v53  ;;  %v6960_v47 = vld [vmem:[%s10388_s2 + $0xcc] sm:$0xf] }
 0x4a5   :  { %v3817_v56 = vmul.f32 %v7054_v42, %v3816_v49  ;;  %v3838_v3 = vsub.f32 1.0, %v3837_v55  ;;  %vm3867_vm8 = vmor %vm3865_vm7, %vm3866_vm6  ;;  %4431 = vmatpush.bf16.msra.mxu2 %v6463_v59  ;;  %v6957_v49 = vld [vmem:[%s10388_s2 + $0xac] sm:$0xf0]  ;;  %v6440_v55 = vld [vmem:[%s10388_s2 + $0xb0] sm:$0xf0] }
 0x4a6   :  { %v3862_v15 = vsub.f32 1.0, %v3861_v60  ;;  %v6443_v60 = vor.u32 %v6955_v50, %v6440_v55  ;;  %v6398_v59 = vld [vmem:[%s10388_s2 + $0x48] sm:$0xf]  ;;  %v6400_v50 = vld [vmem:[%s10388_s2 + $0x58] sm:$0xf0] }
 0x4a7   :  { %v3818_v0 = vadd.f32 %v7054_v42, %v3817_v56  ;;  %v3839_v5 = vmul.f32 %v7056_v52, %v3838_v3  ;;  %v6446_v56 = vld [vmem:[%s10388_s2 + $0xa8] sm:$0xf]  ;;  %v6956_v3 = vld [vmem:[%s10388_s2 + $0xac] sm:$0xf]  ;;  %v6374_v55 = vld [vmem:[%s10388_s2 + $0x20] sm:$0xf] }
 0x4a8   :  { %v3863_v63 = vmul.f32 %v7058_v53, %v3862_v15  ;;  %v6447_v2 = vor.u32 %v6958_v57, %v6446_v56  ;;  %4419 = vmatpush.bf16.msra.mxu1 %v6443_v60  ;;  %v6953_v15 = vld [vmem:[%s10388_s2 + $0x8c] sm:$0xf0]  ;;  %v6939_v57 = vld [vmem:[%s10388_s2 + $0x24] sm:$0xf] }
 0x4a9   :  { %v3822_v61 = vsel %vm3821_vm13, %v7054_v42, %v3818_v0  ;;  %v3840_v54 = vadd.f32 %v7056_v52, %v3839_v5  ;;  %v6464_v42 = vld [vmem:[%s10388_s2 + $0xd8] sm:$0xf0]  ;;  %v6941_v56 = vld [vmem:[%s10388_s2 + $0x2c] sm:$0xf0] }
 0x4aa   :  { %v3827_v7 = vsel %vm3824_vm15, %v3826_v62, %v3822_v61  ;;  %v3864_v18 = vadd.f32 %v7058_v53, %v3863_v63  ;;  %v6467_v48 = vor.u32 %v6960_v47, %v6464_v42  ;;  %v6448_v0 = vld [vmem:[%s10388_s2 + $0xb8] sm:$0xf0]  ;;  %4432 = vmatpush.bf16.msra.mxu2 %v6447_v2  ;;  %v6422_v62 = vld [vmem:[%s10388_s2 + $0x80] sm:$0xf]  ;;  %v6424_v63 = vld [vmem:[%s10388_s2 + $0x90] sm:$0xf0]  ;;  %v6375_v60 = vor.u32 %v6941_v56, %v6374_v55 }
 0x4ab   :  { %v3844_v9 = vsel %vm3843_vm4, %v7056_v52, %v3840_v54  ;;  %v3876_v13 = vmul.f32 %v7060_v10, %v3827_v7  ;;  %v6438_v52 = vld [vmem:[%s10388_s2 + $0xa0] sm:$0xf]  ;;  %v6451_v5 = vor.u32 %v6956_v3, %v6448_v0  ;;  %v6951_v54 = vld [vmem:[%s10388_s2 + $0x84] sm:$0xf]  ;;  %v6946_v47 = vld [vmem:[%s10388_s2 + $0x54] sm:$0xf0] }
 0x4ac   :  { %v3849_v11 = vsel %vm3846_vm5, %v3848_v8, %v3844_v9  ;;  %v3868_v20 = vsel %vm3867_vm8, %v7058_v53, %v3864_v18  ;;  %4444 = vmatpush.bf16.msra.mxu3 %v6467_v48  ;;  %v6439_v53 = vor.u32 %v6957_v49, %v6438_v52  ;;  %v6954_v18 = vld [vmem:[%s10388_s2 + $0x94] sm:$0xf0]  ;;  %v6944_v42 = vld [vmem:[%s10388_s2 + $0x4c] sm:$0xf]  ;;  %v6399_v49 = vor.u32 %v6946_v47, %v6398_v59  ;;  %v6376_v2 = vld [vmem:[%s10388_s2 + $0x30] sm:$0xf0] }
 0x4ad   :  { %v3875_v14 = vmul.f32 %v3849_v11, %v9952_v24  ;;  %v3873_v25 = vsel %vm3870_vm9, %v3872_v23, %v3868_v20  ;;  %v6423_v11 = vor.u32 %v6953_v15, %v6422_v62  ;;  %v6382_v3 = vld [vmem:[%s10388_s2 + $0x28] sm:$0xf]  ;;  %v6942_v0 = vld [vmem:[%s10388_s2 + $0x34] sm:$0xf0] }
 0x4ae   :  { %4406 = vmatpush.bf16.msra.mxu0 %v6439_v53  ;;  %v6403_v53 = vor.u32 %v6944_v42, %v6400_v50  ;;  %v6383_v62 = vor.u32 %v6942_v0, %v6382_v3 }
 0x4af   :  { %v10161_v51 = vadd.f32 %v3876_v13, %v3875_v14  ;;  %v6430_v13 = vld [vmem:[%s10388_s2 + $0x88] sm:$0xf]  ;;  %v6427_v14 = vor.u32 %v6951_v54, %v6424_v63  ;;  %v6937_v54 = vld [vmem:[%s10388_s2 + $0xc] sm:$0xf0] }
 0x4b0   :  { %4445 = vmatpush.bf16.msra.mxu3 %v6451_v5  ;;  %v6940_v5 = vld [vmem:[%s10388_s2 + $0x2c] sm:$0xf] }
 0x4b1   :  { %7061 = vtanh.f32 %v10161_v51  ;;  %4420 = vmatpush.bf16.msra.mxu1 %v6427_v14  ;;  %v6368_v14 = vld [vmem:[%s10388_s2 + $0x18] sm:$0xf0] }
 0x4b2   :  { %4407 = vmatpush.bf16.msra.mxu0 %v6423_v11  ;;  %v6936_v11 = vld [vmem:[%s10388_s2 + $0xc] sm:$0xf] }
 0x4b5   :  { %4421 = vmatpush.bf16.msra.mxu1 %v6411_v35 }
 0x4b7   :  { %v7062_v16 = vpop.eup %7061 }
 0x4b8   :  { %v3879_v1 = vmul.f32 %v7062_v16, %v3873_v25  ;;  %v6431_v16 = vor.u32 %v6954_v18, %v6430_v13  ;;  %v6435_v25 = vor.u32 %v6952_v12, %v6432_v19 }
 0x4b9   :  { %4422 = vmatpush.bf16.msra.mxu1 %v6395_v45 }
 0x4ba   :  { %3880 = vst [vmem:[%s10387_s4 + $0xa] sm:$0x3] %v3879_v1  ;;  %v3882_v24 = vpack.c.bf16 %v3879_v1, %v3879_v1  ;;  %v6406_v1 = vld [vmem:[%s10388_s2 + $0x60] sm:$0xf]  ;;  %4433 = vmatpush.bf16.msra.mxu2 %v6431_v16  ;;  %4446 = vmatpush.bf16.msra.mxu3 %v6435_v25 }
 0x4bc   :  { %4083 = vmatmul.bf16.vlgmr.msrb.gmra.mxu0 %v3882_v24  ;;  %4096 = vmatmul.bf16.vlgmr.msrb.gmra.mxu1 %v3882_v24 }
 0x4bd   :  { %4109 = vmatmul.bf16.vlgmr.msrb.gmra.mxu2 %v3882_v24  ;;  %4122 = vmatmul.bf16.vlgmr.msrb.gmra.mxu3 %v3882_v24  ;;  %v6949_v24 = vld [vmem:[%s10388_s2 + $0x6c] sm:$0xf0] }
 0x4be   :  { %v6407_v31 = vor.u32 %v6949_v24, %v6406_v1  ;;  %4434 = vmatpush.bf16.msra.mxu2 %v6415_v36  ;;  %4447 = vmatpush.bf16.msra.mxu3 %v6419_v27 }
 0x4c0   :  { %4408 = vmatpush.bf16.msra.mxu0 %v6407_v31 }
 0x4c2   :  { %4435 = vmatpush.bf16.msra.mxu2 %v6399_v49  ;;  %4448 = vmatpush.bf16.msra.mxu3 %v6403_v53 }
 0x4c6   :  { %4436 = vmatpush.bf16.msra.mxu2 %v6383_v62 }
 0x539   :  { %v4084_v40 = vpop.f32.mrf.mxu0  ;;  %v4097_v21 = vpop.f32.mrf.mxu1 }
 0x53a   :  { %v4131_v4 = vrot.slane %v4097_v21, 6 }
 0x53c   :  { %v4134_v20 = vsel %vm280_vm0, %v4084_v40, %v4131_v4  ;;  %v6379_v4 = vor.u32 %v6939_v57, %v6376_v2 }
 0x53e   :  { %4423 = vmatpush.bf16.msra.mxu1 %v6379_v4 }
 0x540   :  { %v4110_v6 = vpop.f32.mrf.mxu2  ;;  %v4123_v61 = vpop.f32.mrf.mxu3 }
 0x541   :  { %v4132_v7 = vrot.slane %v4110_v6, 4  ;;  %v4133_v8 = vrot.slane %v4123_v61, 2  ;;  %v4086_v9 = vpop.f32.mrf.mxu0  ;;  %v4099_v10 = vpop.f32.mrf.mxu1  ;;  %v6384_v6 = vld [vmem:[%s10388_s2 + $0x38] sm:$0xf0]  ;;  %v6358_v61 = vld [vmem:[%s10388_s2] sm:$0xf] }
 0x542   :  { %v6387_v15 = vor.u32 %v6940_v5, %v6384_v6  ;;  %v6366_v9 = vld [vmem:[%s10388_s2 + $0x8] sm:$0xf]  ;;  %v6938_v10 = vld [vmem:[%s10388_s2 + $0x14] sm:$0xf0]  ;;  %v6359_v13 = vor.u32 %v6937_v54, %v6358_v61 }
 0x543   :  { %v4135_v23 = vsel %vm282_vm1, %v4132_v7, %v4133_v8  ;;  %v6935_v7 = vld [vmem:[%s10388_s2 + $0x4] sm:$0xf]  ;;  %v6360_v8 = vld [vmem:[%s10388_s2 + $0x10] sm:$0xf0] }
 0x544   :  { %v4136_v30 = vsel %vm284_vm2, %v4134_v20, %v4135_v23  ;;  %v6363_v12 = vor.u32 %v6935_v7, %v6360_v8  ;;  %4449 = vmatpush.bf16.msra.mxu3 %v6387_v15  ;;  %v6367_v20 = vor.u32 %v6938_v10, %v6366_v9  ;;  %v6371_v23 = vor.u32 %v6936_v11, %v6368_v14 }
 0x545   :  { %v10285_v34 = vadd.f32 %v4136_v30, %v9112_v29  ;;  %v6945_v29 = vld [vmem:[%s10388_s2 + $0x4c] sm:$0xf0] }
 0x546   :  { %v6391_v44 = vor.u32 %v6945_v29, %v6390_v26  ;;  %4424 = vmatpush.bf16.msra.mxu1 %v6363_v12  ;;  %4437 = vmatpush.bf16.msra.mxu2 %v6367_v20 }
 0x547   :  { %v6353_v40 = vmul.f32 -1.442695, %v10285_v34  ;;  %v4159_v21 = vrot.slane %v10285_v34, 2  ;;  %v4183_v41 = vrot.slane %v10285_v34, 6  ;;  %v4180_v32 = vrot.slane %v10285_v34, 4 }
 0x548   :  { %v4112_v58 = vpop.f32.mrf.mxu2  ;;  %v4125_v43 = vpop.f32.mrf.mxu3  ;;  %4409 = vmatpush.bf16.msra.mxu0 %v6391_v44  ;;  %4450 = vmatpush.bf16.msra.mxu3 %v6371_v23 }
 0x549   :  { %7063 = vpow2.f32 %v6353_v40  ;;  %v6354_v48 = vmul.f32 -1.442695, %v4159_v21  ;;  %v6355_v52 = vmul.f32 -1.442695, %v4183_v41 }
 0x54b   :  { %7065 = vpow2.f32 %v6354_v48 }
 0x54c   :  { %7067 = vpow2.f32 %v6355_v52  ;;  %4410 = vmatpush.bf16.msra.mxu0 %v6375_v60 }
 0x54f   :  { %v7064_v63 = vpop.eup %7063 }
 0x550   :  { %v4142_v18 = vadd.f32 1.0, %v7064_v63  ;;  %4411 = vmatpush.bf16.msra.mxu0 %v6359_v13 }
 0x551   :  { %v7066_v19 = vpop.eup %7065 }
 0x552   :  { %v7068_v16 = vpop.eup %7067  ;;  %7069 = vrcp.f32 %v4142_v18  ;;  %v4164_v25 = vadd.f32 1.0, %v7066_v19  ;;  %v4154_v36 = vand.u32 2147483648, %v4142_v18  ;;  %v4152_v37 = vand.u32 2147483647, %v4142_v18 }
 0x553   :  { %v4188_v1 = vadd.f32 1.0, %v7068_v16  ;;  %vm4148_vm11 = vweird.f32 %v4142_v18 }
 0x554   :  { %7071 = vrcp.f32 %v4164_v25  ;;  %v4176_v29 = vand.u32 2147483648, %v4164_v25  ;;  %v4174_v39 = vand.u32 2147483647, %v4164_v25  ;;  %v4155_v21 = vor.u32 1.1754944e-38, %v4154_v36 }
 0x555   :  { %7073 = vrcp.f32 %v4188_v1  ;;  %vm4153_vm14 = vcmp.eq.f32.partialorder %v4152_v37, 8.507059e+37  ;;  %vm4170_vm15 = vweird.f32 %v4164_v25  ;;  %v4200_v50 = vand.u32 2147483648, %v4188_v1 }
 0x556   :  { %7075 = vtanh.f32 %v4180_v32  ;;  %v4177_v43 = vor.u32 1.1754944e-38, %v4176_v29  ;;  %vm4175_vm4 = vcmp.eq.f32.partialorder %v4174_v39, 8.507059e+37  ;;  %vm4194_vm6 = vweird.f32 %v4188_v1 }
 0x557   :  { %v4198_v53 = vand.u32 2147483647, %v4188_v1  ;;  %v4201_v56 = vor.u32 1.1754944e-38, %v4200_v50 }
 0x558   :  { %v7070_v24 = vpop.eup %7069 }
 0x559   :  { %v4144_v28 = vmul.f32 %v7070_v24, %v4142_v18  ;;  %vm4149_vm10 = vweird.f32 %v7070_v24  ;;  %vm4199_vm8 = vcmp.eq.f32.partialorder %v4198_v53, 8.507059e+37 }
 0x55a   :  { %v7072_v30 = vpop.eup %7071  ;;  %vm4150_vm12 = vmor %vm4148_vm11, %vm4149_vm10 }
 0x55b   :  { %v4145_v31 = vsub.f32 1.0, %v4144_v28  ;;  %v7074_v33 = vpop.eup %7073  ;;  %v4166_v17 = vmul.f32 %v7072_v30, %v4164_v25  ;;  %vm4171_vm13 = vweird.f32 %v7072_v30 }
 0x55c   :  { %v4190_v22 = vmul.f32 %v7074_v33, %v4188_v1  ;;  %vm4172_vm3 = vmor %vm4170_vm15, %vm4171_vm13  ;;  %v7076_v45 = vpop.eup %7075  ;;  %vm4195_vm5 = vweird.f32 %v7074_v33 }
 0x55d   :  { %v4146_v35 = vmul.f32 %v7070_v24, %v4145_v31  ;;  %v4167_v26 = vsub.f32 1.0, %v4166_v17  ;;  %vm4196_vm7 = vmor %vm4194_vm6, %vm4195_vm5 }
 0x55e   :  { %v4191_v41 = vsub.f32 1.0, %v4190_v22 }
 0x55f   :  { %v4147_v27 = vadd.f32 %v7070_v24, %v4146_v35  ;;  %v4168_v38 = vmul.f32 %v7072_v30, %v4167_v26 }
 0x560   :  { %v4192_v47 = vmul.f32 %v7074_v33, %v4191_v41 }
 0x561   :  { %v4151_v40 = vsel %vm4150_vm12, %v7070_v24, %v4147_v27  ;;  %v4169_v34 = vadd.f32 %v7072_v30, %v4168_v38 }
 0x562   :  { %v4156_v58 = vsel %vm4153_vm14, %v4155_v21, %v4151_v40  ;;  %v4193_v49 = vadd.f32 %v7074_v33, %v4192_v47 }
 0x563   :  { %v4173_v44 = vsel %vm4172_vm3, %v7072_v30, %v4169_v34  ;;  %v4205_v42 = vmul.f32 %v7076_v45, %v4156_v58 }
 0x564   :  { %v4178_v59 = vsel %vm4175_vm4, %v4177_v43, %v4173_v44  ;;  %v4197_v55 = vsel %vm4196_vm7, %v7074_v33, %v4193_v49 }
 0x565   :  { %v4204_v48 = vmul.f32 %v4178_v59, %v10161_v51  ;;  %v4202_v60 = vsel %vm4199_vm8, %v4201_v56, %v4197_v55 }
 0x567   :  { %v10370_v52 = vadd.f32 %v4205_v42, %v4204_v48 }
 0x569   :  { %7077 = vtanh.f32 %v10370_v52 }
 0x56f   :  { %v7078_v57 = vpop.eup %7077 }
 0x570   :  { %v4208_v2 = vmul.f32 %v7078_v57, %v4202_v60 }
 0x572   :  { %4209 = vst [vmem:[%s10387_s4 + $0xc] sm:$0x3] %v4208_v2  ;;  %v4211_v51 = vpack.c.bf16 %v4208_v2, %v4208_v2 }
 0x574   :  { %4412 = vmatmul.bf16.vlgmr.msra.gmra.mxu0 %v4211_v51  ;;  %4425 = vmatmul.bf16.vlgmr.msra.gmra.mxu1 %v4211_v51 }
 0x575   :  { %4438 = vmatmul.bf16.vlgmr.msra.gmra.mxu2 %v4211_v51  ;;  %4451 = vmatmul.bf16.vlgmr.msra.gmra.mxu3 %v4211_v51 }
 0x5f1   :  { %v4413_v3 = vpop.f32.mrf.mxu0  ;;  %v4426_v0 = vpop.f32.mrf.mxu1 }
 0x5f2   :  { %v4460_v4 = vrot.slane %v4426_v0, 6 }
 0x5f4   :  { %v4463_v7 = vsel %vm280_vm0, %v4413_v3, %v4460_v4 }
 0x5f8   :  { %v4439_v5 = vpop.f32.mrf.mxu2  ;;  %v4452_v6 = vpop.f32.mrf.mxu3 }
 0x5f9   :  { %v4461_v61 = vrot.slane %v4439_v5, 4  ;;  %v4462_v62 = vrot.slane %v4452_v6, 2  ;;  %v4415_v15 = vpop.f32.mrf.mxu0  ;;  %v4428_v54 = vpop.f32.mrf.mxu1 }
 0x5fb   :  { %v4464_v8 = vsel %vm282_vm1, %v4461_v61, %v4462_v62 }
 0x5fc   :  { %v4465_v9 = vsel %vm284_vm2, %v4463_v7, %v4464_v8 }
 0x5fd   :  { %v4467_v10 = vadd.f32 %v4465_v9, %v9120_v46 }
 0x5ff   :  { %v6484_v11 = vmul.f32 -1.442695, %v4467_v10  ;;  %v4488_v63 = vrot.slane %v4467_v10, 2  ;;  %v4512_v13 = vrot.slane %v4467_v10, 6  ;;  %v4509_v32 = vrot.slane %v4467_v10, 4 }
 0x600   :  { %v4441_v14 = vpop.f32.mrf.mxu2  ;;  %v4454_v18 = vpop.f32.mrf.mxu3 }
 0x601   :  { %7079 = vpow2.f32 %v6484_v11  ;;  %v6485_v12 = vmul.f32 -1.442695, %v4488_v63  ;;  %v6486_v19 = vmul.f32 -1.442695, %v4512_v13 }
 0x603   :  { %7081 = vpow2.f32 %v6485_v12 }
 0x604   :  { %7083 = vpow2.f32 %v6486_v19 }
 0x607   :  { %v7080_v20 = vpop.eup %7079 }
 0x608   :  { %v4471_v23 = vadd.f32 1.0, %v7080_v20 }
 0x609   :  { %v7082_v16 = vpop.eup %7081 }
 0x60a   :  { %v7084_v25 = vpop.eup %7083  ;;  %7085 = vrcp.f32 %v4471_v23  ;;  %v4493_v1 = vadd.f32 1.0, %v7082_v16  ;;  %v4483_v36 = vand.u32 2147483648, %v4471_v23  ;;  %v4481_v37 = vand.u32 2147483647, %v4471_v23 }
 0x60b   :  { %v4517_v24 = vadd.f32 1.0, %v7084_v25  ;;  %vm4477_vm1 = vweird.f32 %v4471_v23 }
 0x60c   :  { %7087 = vrcp.f32 %v4493_v1  ;;  %v4505_v29 = vand.u32 2147483648, %v4493_v1  ;;  %v4503_v39 = vand.u32 2147483647, %v4493_v1  ;;  %v4484_v21 = vor.u32 1.1754944e-38, %v4483_v36 }
 0x60d   :  { %7089 = vrcp.f32 %v4517_v24  ;;  %vm4482_vm10 = vcmp.eq.f32.partialorder %v4481_v37, 8.507059e+37  ;;  %vm4499_vm11 = vweird.f32 %v4493_v1  ;;  %v4529_v53 = vand.u32 2147483648, %v4517_v24 }
 0x60e   :  { %7091 = vtanh.f32 %v4509_v32  ;;  %v4506_v43 = vor.u32 1.1754944e-38, %v4505_v29  ;;  %vm4504_vm13 = vcmp.eq.f32.partialorder %v4503_v39, 8.507059e+37  ;;  %vm4523_vm15 = vweird.f32 %v4517_v24 }
 0x60f   :  { %v4527_v55 = vand.u32 2147483647, %v4517_v24  ;;  %v4530_v57 = vor.u32 1.1754944e-38, %v4529_v53 }
 0x610   :  { %v7086_v46 = vpop.eup %7085 }
 0x611   :  { %v4473_v28 = vmul.f32 %v7086_v46, %v4471_v23  ;;  %vm4478_vm0 = vweird.f32 %v7086_v46  ;;  %vm4528_vm4 = vcmp.eq.f32.partialorder %v4527_v55, 8.507059e+37 }
 0x612   :  { %v7088_v30 = vpop.eup %7087  ;;  %vm4479_vm2 = vmor %vm4477_vm1, %vm4478_vm0 }
 0x613   :  { %v4474_v31 = vsub.f32 1.0, %v4473_v28  ;;  %v7090_v33 = vpop.eup %7089  ;;  %v4495_v17 = vmul.f32 %v7088_v30, %v4493_v1  ;;  %vm4500_vm9 = vweird.f32 %v7088_v30 }
 0x614   :  { %v4519_v22 = vmul.f32 %v7090_v33, %v4517_v24  ;;  %vm4501_vm12 = vmor %vm4499_vm11, %vm4500_vm9  ;;  %v7092_v45 = vpop.eup %7091  ;;  %vm4524_vm14 = vweird.f32 %v7090_v33 }
 0x615   :  { %v4475_v35 = vmul.f32 %v7086_v46, %v4474_v31  ;;  %v4496_v26 = vsub.f32 1.0, %v4495_v17  ;;  %vm4525_vm3 = vmor %vm4523_vm15, %vm4524_vm14 }
 0x616   :  { %v4520_v41 = vsub.f32 1.0, %v4519_v22 }
 0x617   :  { %v4476_v27 = vadd.f32 %v7086_v46, %v4475_v35  ;;  %v4497_v38 = vmul.f32 %v7088_v30, %v4496_v26 }
 0x618   :  { %v4521_v47 = vmul.f32 %v7090_v33, %v4520_v41 }
 0x619   :  { %v4480_v40 = vsel %vm4479_vm2, %v7086_v46, %v4476_v27  ;;  %v4498_v34 = vadd.f32 %v7088_v30, %v4497_v38 }
 0x61a   :  { %v4485_v58 = vsel %vm4482_vm10, %v4484_v21, %v4480_v40  ;;  %v4522_v50 = vadd.f32 %v7090_v33, %v4521_v47 }
 0x61b   :  { %v4502_v44 = vsel %vm4501_vm12, %v7088_v30, %v4498_v34  ;;  %v4534_v48 = vmul.f32 %v7092_v45, %v4485_v58 }
 0x61c   :  { %v4507_v59 = vsel %vm4504_vm13, %v4506_v43, %v4502_v44  ;;  %v4526_v56 = vsel %vm4525_vm3, %v7090_v33, %v4522_v50 }
 0x61d   :  { %v4533_v42 = vmul.f32 %v4507_v59, %v10370_v52  ;;  %v4531_v2 = vsel %vm4528_vm4, %v4530_v57, %v4526_v56 }
 0x61f   :  { %v4535_v49 = vadd.f32 %v4534_v48, %v4533_v42 }
 0x621   :  { %7093 = vtanh.f32 %v4535_v49 }
 0x627   :  { %v7094_v60 = vpop.eup %7093 }
 0x628   :  { %v4537_v51 = vmul.f32 %v7094_v60, %v4531_v2 }
 0x62a   :  { %4538 = vst [vmem:[%s10387_s4 + $0xe] sm:$0x3] %v4537_v51 }

</bundles_post_ra>
